<compile_context>
chip_gen: v7x
topology: tpu7x:2x2x1
jax: 0.10.0
libtpu: 0.0.40
codegen_flags: <defaults>
</compile_context>

<pallas_src>
import functools

import jax
import jax.numpy as jnp
from jax.experimental import pallas as pl
from jax.experimental.pallas import tpu as pltpu

_LANE = 128          # hidden padded to a multiple of this -> lane-aligned gate slices
_SUBLANE_BF16 = 16   # batch tiles are multiples of this (bf16 sublane packing)


def _round_up(n, m):
    return ((n + m - 1) // m) * m


def _vmem_capacity_bytes():
    try:
        return int(pltpu.get_tpu_info().vmem_capacity_bytes)
    except Exception:  # fall back to v5e/v6e physical VMEM
        return 128 * 1024 * 1024


def _pad_gate_dim(w, hid, hp):
    """(4*hid, ...) -> (4*hp, ...): zero-pad each of the 4 gate blocks to hp rows."""
    w4 = w.reshape((4, hid) + w.shape[1:])
    pad = [(0, 0), (0, hp - hid)] + [(0, 0)] * (w.ndim - 1)
    return jnp.pad(w4, pad).reshape((4 * hp,) + w.shape[1:])


def _input_projection(x, w_ih, bias, compute_dtype):
    """gates_x = x @ W_ih^T + bias, one big matmul (XLA), stored in compute_dtype."""
    gx = jnp.einsum(
        "tbi,gi->tbg",
        x.astype(compute_dtype),
        w_ih.astype(compute_dtype),
        preferred_element_type=jnp.float32,
    )
    return (gx + bias).astype(compute_dtype)  # (T, B, 4H)


def lstm_cell_kernel(gx_ref, w_hh_ref, out_ref, c_scr):
    """Recurrent part only.

    gx_ref : (tc, tb, 4H) compute_dtype  -- streamed, double-buffered
    w_hh_ref: (H, 4H)     compute_dtype  -- whole array, single resident VMEM copy
    out_ref : (tb, H)     f32            -- resident h state / final output
    c_scr   : (tb, H)     f32 scratch    -- resident c state
    """
    t = pl.program_id(1)  # trailing "arbitrary" time-chunk axis

    @pl.when(t == 0)
    def _():
        out_ref[...] = jnp.zeros_like(out_ref)
        c_scr[...] = jnp.zeros_like(c_scr)

    hid = out_ref.shape[-1]
    tb = out_ref.shape[0]
    t_block = gx_ref.shape[0]
    w_hh = w_hh_ref[...]  # constant across all steps

    def sig(v):  # sigmoid via tanh: 1 EUP pass instead of exp + reciprocal
        return 0.5 * jnp.tanh(0.5 * v) + 0.5

    def cell(gx_f32, h, c):
        # (rows, 4H) f32 gate pre-activations; PyTorch gate order [i, f, g, o]
        gates = gx_f32 + jnp.dot(
            h.astype(w_hh.dtype), w_hh, preferred_element_type=jnp.float32
        )
        i_g = sig(gates[:, 0 * hid:1 * hid])
        f_g = sig(gates[:, 1 * hid:2 * hid])
        g_g = jnp.tanh(gates[:, 2 * hid:3 * hid])
        o_g = sig(gates[:, 3 * hid:4 * hid])
        c = f_g * c + i_g * g_g
        h = o_g * jnp.tanh(c)
        return h, c

    split = (tb % 16 == 0) and tb >= 16  # two independent half-batch recurrences
    if split:
        half = tb // 2

        def step(i, carry):
            ha, ca, hb, cb = carry
            gx = gx_ref[i].astype(jnp.float32)  # f32 first -> sublane-8 clean slices
            ha, ca = cell(gx[:half], ha, ca)    # independent of (hb, cb):
            hb, cb = cell(gx[half:], hb, cb)    # LLO overlaps MXU(B) with EUP/VPU(A)
            return ha, ca, hb, cb

        h0, c0 = out_ref[...], c_scr[...]
        ha, ca, hb, cb = jax.lax.fori_loop(
            0, t_block, step,
            (h0[:half], c0[:half], h0[half:], c0[half:]),
            unroll=True,
        )
        out_ref[:half, :] = ha
        out_ref[half:, :] = hb
        c_scr[:half, :] = ca
        c_scr[half:, :] = cb
    else:
        def step(i, carry):
            h, c = carry
            return cell(gx_ref[i].astype(jnp.float32), h, c)

        h, c = jax.lax.fori_loop(
            0, t_block, step, (out_ref[...], c_scr[...]), unroll=True
        )
        out_ref[...] = h
        c_scr[...] = c


@functools.partial(
    jax.jit,
    static_argnames=("hidden_size", "time_block", "batch_block", "compute_dtype"),
)
def lstm_last_hidden(
    x,
    w_ih,
    w_hh,
    b_ih,
    b_hh,
    *,
    hidden_size,
    time_block=None,
    batch_block=256,
    compute_dtype=jnp.bfloat16,
):
    """x: (T, B, I).  Returns (B, H) == out[-1] of nn.LSTM (zero initial state)."""
    seq_len, batch, _ = x.shape
    hid = hidden_size
    hp = _round_up(hid, _LANE)  # lane-aligned gate slices, clean MXU tiles

    # ---- zero-pad hidden channels; padded channels stay exactly 0 through time ----
    if hp != hid:
        w_ih = _pad_gate_dim(w_ih, hid, hp)
        w_hh = _pad_gate_dim(jnp.pad(w_hh, ((0, 0), (0, hp - hid))), hid, hp)
        b_ih = _pad_gate_dim(b_ih, hid, hp)
        b_hh = _pad_gate_dim(b_hh, hid, hp)

    # ---- hoisted input projection (one large matmul, outside the serial loop) ----
    bias = (b_ih + b_hh).astype(jnp.float32)
    gates_x = _input_projection(x, w_ih, bias, compute_dtype)  # (T, B, 4*hp)
    w_hh_t = jnp.transpose(w_hh).astype(compute_dtype)         # (hp, 4*hp)

    # ---- tile selection from a device-aware VMEM budget ----------------------
    if time_block is None:
        time_block = 32 if hp <= 256 else 8  # small H: amortize grid overhead
    gx_bytes = jnp.dtype(compute_dtype).itemsize
    vmem_cap = int(0.75 * _vmem_capacity_bytes())  # ~96 MiB v5e/v6e, ~48 MiB v7x

    tc = max(1, min(time_block, seq_len))
    tb = max(_SUBLANE_BF16, min(batch_block, _round_up(batch, _SUBLANE_BF16)))
    tb = _round_up(tb, _SUBLANE_BF16)

    def footprint(tc_, tb_):
        gx = 2 * tc_ * tb_ * 4 * hp * gx_bytes   # double-buffered gx stream
        w = hp * 4 * hp * 2                      # resident bf16 W_hh^T
        state = 3 * tb_ * hp * 4                 # out (x2 conservative) + c scratch
        temps = 4 * tb_ * 4 * hp * 4             # f32 gate temporaries (slack)
        return gx + w + state + temps

    while footprint(tc, tb) > vmem_cap and tc > 1:
        tc = max(1, tc // 2)
    while footprint(tc, tb) > vmem_cap and tb > _SUBLANE_BF16:
        tb = max(_SUBLANE_BF16, tb // 2)

    # ---- pad (never shrink) to tile multiples ---------------------------------
    batch_p = _round_up(batch, tb)
    seq_p = _round_up(seq_len, tc)
    if batch_p != batch:
        gates_x = jnp.pad(gates_x, ((0, 0), (0, batch_p - batch), (0, 0)))
    if seq_p != seq_len:
        # Front-pad time with saturated-off pre-activations: i,f,o ~ sigmoid(-30) ~ 0,
        # so h and c stay (numerically) at the zero initial state through the pad.
        pad = jnp.full((seq_p - seq_len, batch_p, 4 * hp), -30.0, compute_dtype)
        gates_x = jnp.concatenate([pad, gates_x], axis=0)

    grid_spec = pltpu.PrefetchScalarGridSpec(
        num_scalar_prefetch=0,
        # batch = leading "parallel" axis, time = trailing "arbitrary" axis
        # (required: h/c state is resident across the time axis).
        grid=(batch_p // tb, seq_p // tc),
        in_specs=[
            pl.BlockSpec((tc, tb, 4 * hp), lambda b, t: (t, b, 0)),
            # constant weight: whole array, single copy in VMEM (no double-buffer)
            pl.BlockSpec(memory_space=pltpu.MemorySpace.VMEM),
        ],
        out_specs=pl.BlockSpec((tb, hp), lambda b, t: (b, 0)),
        scratch_shapes=[
            pltpu.VMEM((tb, hp), jnp.float32),  # cell state c
        ],
    )

    out = pl.pallas_call(
        lstm_cell_kernel,
        out_shape=jax.ShapeDtypeStruct((batch_p, hp), jnp.float32),
        grid_spec=grid_spec,
        compiler_params=pltpu.CompilerParams(
            dimension_semantics=("parallel", "arbitrary"),
            vmem_limit_bytes=vmem_cap,
        ),
    )(gates_x, w_hh_t)
    return out[:batch, :hid].astype(x.dtype)


def lstm_reference(x, w_ih, w_hh, b_ih, b_hh, hidden_size, compute_dtype=jnp.float32):
    """Pure-JAX lax.scan reference mirroring torch.nn.LSTM forward.

    With compute_dtype=float32 this is the exact f32 LSTM; with bfloat16 it applies
    the same operand casts the kernel uses (state / accumulation stay f32).
    """
    _, batch, _ = x.shape
    bias = (b_ih + b_hh).astype(jnp.float32)
    gates_x = _input_projection(x, w_ih, bias, compute_dtype)
    w_hh_t = jnp.transpose(w_hh).astype(compute_dtype)

    h = jnp.zeros((batch, hidden_size), jnp.float32)
    c = jnp.zeros((batch, hidden_size), jnp.float32)

    def step(carry, gx):
        h, c = carry
        gates = gx.astype(jnp.float32) + jnp.dot(
            h.astype(compute_dtype), w_hh_t, preferred_element_type=jnp.float32
        )
        i, f, g, o = jnp.split(gates, 4, axis=-1)
        i, f, o = jax.nn.sigmoid(i), jax.nn.sigmoid(f), jax.nn.sigmoid(o)
        g = jnp.tanh(g)
        c = f * c + i * g
        h = o * jnp.tanh(c)
        return (h, c), None

    (h, c), _ = jax.lax.scan(step, (h, c), gates_x)
    return h


if __name__ == "__main__":
    def run_case(seq_len, batch, input_size, hidden_size, time_block):
        key = jax.random.PRNGKey(0)
        kx, k1, k2, k3, k4 = jax.random.split(key, 5)

        # PyTorch-style uniform(-1/sqrt(H), 1/sqrt(H)) params, gate order [i,f,g,o]
        bound = 1.0 / (hidden_size ** 0.5)
        w_ih = jax.random.uniform(k1, (4 * hidden_size, input_size),
                                  jnp.float32, -bound, bound)
        w_hh = jax.random.uniform(k2, (4 * hidden_size, hidden_size),
                                  jnp.float32, -bound, bound)
        b_ih = jax.random.uniform(k3, (4 * hidden_size,), jnp.float32, -bound, bound)
        b_hh = jax.random.uniform(k4, (4 * hidden_size,), jnp.float32, -bound, bound)
        x = jax.random.normal(kx, (seq_len, batch, input_size), jnp.float32)

        out = lstm_last_hidden(
            x, w_ih, w_hh, b_ih, b_hh,
            hidden_size=hidden_size, time_block=time_block,
            compute_dtype=jnp.bfloat16,
        )
        out = jax.block_until_ready(out)
        assert out.shape == (batch, hidden_size)

        # Strict algorithmic check vs a lax.scan reference that uses the same
        # bf16 matmul operands / f32 state as the kernel.
        ref_matched = lstm_reference(x, w_ih, w_hh, b_ih, b_hh, hidden_size,
                                     compute_dtype=jnp.bfloat16)
        assert jnp.allclose(out, ref_matched, atol=2e-3, rtol=2e-3), \
            "mismatch vs bf16-matched reference"

        # Loose sanity bound vs the pure-f32 LSTM (only bf16 operand quantization).
        ref_f32 = lstm_reference(x, w_ih, w_hh, b_ih, b_hh, hidden_size,
                                 compute_dtype=jnp.float32)
        assert jnp.allclose(out, ref_f32, atol=1e-1, rtol=1e-1), \
            "mismatch vs f32 reference beyond bf16 quantization bound"

    # Small "nice" shapes (spec-consistent demo).
    run_case(seq_len=16, batch=8, input_size=16, hidden_size=32, time_block=None)
    # Awkward shapes: exercises hidden-pad (20->128), batch-pad (5->16) and
    # front time-pad (37->40) paths, plus multi-chunk time carry.
    run_case(seq_len=37, batch=5, input_size=16, hidden_size=20, time_block=8)

    print("KERNEL_OK")
</pallas_src>

<mosaic_0001>
module attributes {stable_mosaic.version = 11 : i64} {
  func.func @lstm_cell_kernel(%arg0: i32, %arg1: i32, %arg2: memref<16x16x512xbf16, #tpu.memory_space<vmem>>, %arg3: memref<128x512xbf16, #tpu.memory_space<vmem>>, %arg4: memref<16x128xf32, #tpu.memory_space<vmem>>, %arg5: memref<16x128xf32, #tpu.memory_space<vmem>>) attributes {dimension_semantics = [#tpu.dimension_semantics<parallel>, #tpu.dimension_semantics<arbitrary>], iteration_bounds = array<i64: 1, 1>, scalar_prefetch = 0 : i64, scratch_operands = 1 : i64, tpu.core_type = #tpu.core_type<tc>, window_params = [{transform_indices = @transform_0, window_bounds = array<i64: 16, 16, 512>}, {pipeline_mode = #tpu.pipeline_mode<synchronous>, transform_indices = @transform_1, window_bounds = array<i64: 128, 512>}, {transform_indices = @transform_2, window_bounds = array<i64: 16, 128>}]} {
    %c0_i32 = arith.constant 0 : i32
    %0 = arith.cmpi eq, %arg1, %c0_i32 : i32
    %1 = arith.extui %0 : i1 to i32
    %c0_i32_0 = arith.constant 0 : i32
    %2 = arith.cmpi ne, %1, %c0_i32_0 : i32
    scf.if %2 {
      %cst_365 = arith.constant 0.000000e+00 : f32
      %1198 = vector.broadcast %cst_365 : f32 to vector<16x128xf32>
      %c0_366 = arith.constant 0 : index
      %c0_367 = arith.constant 0 : index
      %1199 = vector.load %arg4[%c0_366, %c0_367] : memref<16x128xf32, #tpu.memory_space<vmem>>, vector<16x128xf32>
      tpu.vector_store %arg4[%c0_366, %c0_367], %1198 {strides = array<i32>} : memref<16x128xf32, #tpu.memory_space<vmem>>, vector<16x128xf32>,
      %cst_368 = arith.constant 0.000000e+00 : f32
      %1200 = vector.broadcast %cst_368 : f32 to vector<16x128xf32>
      %c0_369 = arith.constant 0 : index
      %c0_370 = arith.constant 0 : index
      %1201 = vector.load %arg5[%c0_369, %c0_370] : memref<16x128xf32, #tpu.memory_space<vmem>>, vector<16x128xf32>
      tpu.vector_store %arg5[%c0_369, %c0_370], %1200 {strides = array<i32>} : memref<16x128xf32, #tpu.memory_space<vmem>>, vector<16x128xf32>,
    } else {
    }
    %c0 = arith.constant 0 : index
    %c0_1 = arith.constant 0 : index
    %3 = vector.load %arg3[%c0, %c0_1] : memref<128x512xbf16, #tpu.memory_space<vmem>>, vector<128x512xbf16>
    %c0_2 = arith.constant 0 : index
    %c0_3 = arith.constant 0 : index
    %4 = vector.load %arg4[%c0_2, %c0_3] : memref<16x128xf32, #tpu.memory_space<vmem>>, vector<16x128xf32>
    %c0_4 = arith.constant 0 : index
    %c0_5 = arith.constant 0 : index
    %5 = vector.load %arg5[%c0_4, %c0_5] : memref<16x128xf32, #tpu.memory_space<vmem>>, vector<16x128xf32>
    %6 = vector.extract_strided_slice %4 {offsets = [0, 0], sizes = [8, 128], strides = [1, 1]} : vector<16x128xf32> to vector<8x128xf32>
    %7 = vector.extract_strided_slice %5 {offsets = [0, 0], sizes = [8, 128], strides = [1, 1]} : vector<16x128xf32> to vector<8x128xf32>
    %8 = vector.extract_strided_slice %4 {offsets = [8, 0], sizes = [8, 128], strides = [1, 1]} : vector<16x128xf32> to vector<8x128xf32>
    %9 = vector.extract_strided_slice %5 {offsets = [8, 0], sizes = [8, 128], strides = [1, 1]} : vector<16x128xf32> to vector<8x128xf32>
    %c0_i32_6 = arith.constant 0 : i32
    %10 = arith.index_cast %c0_i32_6 : i32 to index
    %c0_7 = arith.constant 0 : index
    %c0_8 = arith.constant 0 : index
    %11 = vector.load %arg2[%10, %c0_7, %c0_8] : memref<16x16x512xbf16, #tpu.memory_space<vmem>>, vector<1x16x512xbf16>
    %12 = vector.shape_cast %11 : vector<1x16x512xbf16> to vector<16x512xbf16>
    %13 = arith.extf %12 : vector<16x512xbf16> to vector<16x512xf32>
    %14 = vector.extract_strided_slice %13 {offsets = [0, 0], sizes = [8, 512], strides = [1, 1]} : vector<16x512xf32> to vector<8x512xf32>
    %15 = arith.truncf %6 : vector<8x128xf32> to vector<8x128xbf16>
    %cst = arith.constant dense<0.000000e+00> : vector<8x512xf32>
    %16 = tpu.matmul %15, %3, %cst {dimension_numbers = #tpu.dot_dimension_numbers<[1], [0], [0], [1], [0, 0, 1, 1], [], []>} : vector<8x128xbf16>, vector<128x512xbf16>, vector<8x512xf32> -> vector<8x512xf32>
    %17 = arith.addf %14, %16 : vector<8x512xf32>
    %18 = vector.extract_strided_slice %17 {offsets = [0, 0], sizes = [8, 128], strides = [1, 1]} : vector<8x512xf32> to vector<8x128xf32>
    %cst_9 = arith.constant 5.000000e-01 : f32
    %19 = vector.broadcast %cst_9 : f32 to vector<8x128xf32>
    %20 = arith.mulf %19, %18 : vector<8x128xf32>
    %21 = math.tanh %20 : vector<8x128xf32>
    %cst_10 = arith.constant 5.000000e-01 : f32
    %22 = vector.broadcast %cst_10 : f32 to vector<8x128xf32>
    %23 = arith.mulf %22, %21 : vector<8x128xf32>
    %cst_11 = arith.constant 5.000000e-01 : f32
    %24 = vector.broadcast %cst_11 : f32 to vector<8x128xf32>
    %25 = arith.addf %23, %24 : vector<8x128xf32>
    %26 = vector.extract_strided_slice %17 {offsets = [0, 128], sizes = [8, 128], strides = [1, 1]} : vector<8x512xf32> to vector<8x128xf32>
    %cst_12 = arith.constant 5.000000e-01 : f32
    %27 = vector.broadcast %cst_12 : f32 to vector<8x128xf32>
    %28 = arith.mulf %27, %26 : vector<8x128xf32>
    %29 = math.tanh %28 : vector<8x128xf32>
    %cst_13 = arith.constant 5.000000e-01 : f32
    %30 = vector.broadcast %cst_13 : f32 to vector<8x128xf32>
    %31 = arith.mulf %30, %29 : vector<8x128xf32>
    %cst_14 = arith.constant 5.000000e-01 : f32
    %32 = vector.broadcast %cst_14 : f32 to vector<8x128xf32>
    %33 = arith.addf %31, %32 : vector<8x128xf32>
    %34 = vector.extract_strided_slice %17 {offsets = [0, 256], sizes = [8, 128], strides = [1, 1]} : vector<8x512xf32> to vector<8x128xf32>
    %35 = math.tanh %34 : vector<8x128xf32>
    %36 = vector.extract_strided_slice %17 {offsets = [0, 384], sizes = [8, 128], strides = [1, 1]} : vector<8x512xf32> to vector<8x128xf32>
    %cst_15 = arith.constant 5.000000e-01 : f32
    %37 = vector.broadcast %cst_15 : f32 to vector<8x128xf32>
    %38 = arith.mulf %37, %36 : vector<8x128xf32>
    %39 = math.tanh %38 : vector<8x128xf32>
    %cst_16 = arith.constant 5.000000e-01 : f32
    %40 = vector.broadcast %cst_16 : f32 to vector<8x128xf32>
    %41 = arith.mulf %40, %39 : vector<8x128xf32>
    %cst_17 = arith.constant 5.000000e-01 : f32
    %42 = vector.broadcast %cst_17 : f32 to vector<8x128xf32>
    %43 = arith.addf %41, %42 : vector<8x128xf32>
    %44 = arith.mulf %33, %7 : vector<8x128xf32>
    %45 = arith.mulf %25, %35 : vector<8x128xf32>
    %46 = arith.addf %44, %45 : vector<8x128xf32>
    %47 = math.tanh %46 : vector<8x128xf32>
    %48 = arith.mulf %43, %47 : vector<8x128xf32>
    %49 = vector.extract_strided_slice %13 {offsets = [8, 0], sizes = [8, 512], strides = [1, 1]} : vector<16x512xf32> to vector<8x512xf32>
    %50 = arith.truncf %8 : vector<8x128xf32> to vector<8x128xbf16>
    %cst_18 = arith.constant dense<0.000000e+00> : vector<8x512xf32>
    %51 = tpu.matmul %50, %3, %cst_18 {dimension_numbers = #tpu.dot_dimension_numbers<[1], [0], [0], [1], [0, 0, 1, 1], [], []>} : vector<8x128xbf16>, vector<128x512xbf16>, vector<8x512xf32> -> vector<8x512xf32>
    %52 = arith.addf %49, %51 : vector<8x512xf32>
    %53 = vector.extract_strided_slice %52 {offsets = [0, 0], sizes = [8, 128], strides = [1, 1]} : vector<8x512xf32> to vector<8x128xf32>
    %cst_19 = arith.constant 5.000000e-01 : f32
    %54 = vector.broadcast %cst_19 : f32 to vector<8x128xf32>
    %55 = arith.mulf %54, %53 : vector<8x128xf32>
    %56 = math.tanh %55 : vector<8x128xf32>
    %cst_20 = arith.constant 5.000000e-01 : f32
    %57 = vector.broadcast %cst_20 : f32 to vector<8x128xf32>
    %58 = arith.mulf %57, %56 : vector<8x128xf32>
    %cst_21 = arith.constant 5.000000e-01 : f32
    %59 = vector.broadcast %cst_21 : f32 to vector<8x128xf32>
    %60 = arith.addf %58, %59 : vector<8x128xf32>
    %61 = vector.extract_strided_slice %52 {offsets = [0, 128], sizes = [8, 128], strides = [1, 1]} : vector<8x512xf32> to vector<8x128xf32>
    %cst_22 = arith.constant 5.000000e-01 : f32
    %62 = vector.broadcast %cst_22 : f32 to vector<8x128xf32>
    %63 = arith.mulf %62, %61 : vector<8x128xf32>
    %64 = math.tanh %63 : vector<8x128xf32>
    %cst_23 = arith.constant 5.000000e-01 : f32
    %65 = vector.broadcast %cst_23 : f32 to vector<8x128xf32>
    %66 = arith.mulf %65, %64 : vector<8x128xf32>
    %cst_24 = arith.constant 5.000000e-01 : f32
    %67 = vector.broadcast %cst_24 : f32 to vector<8x128xf32>
    %68 = arith.addf %66, %67 : vector<8x128xf32>
    %69 = vector.extract_strided_slice %52 {offsets = [0, 256], sizes = [8, 128], strides = [1, 1]} : vector<8x512xf32> to vector<8x128xf32>
    %70 = math.tanh %69 : vector<8x128xf32>
    %71 = vector.extract_strided_slice %52 {offsets = [0, 384], sizes = [8, 128], strides = [1, 1]} : vector<8x512xf32> to vector<8x128xf32>
    %cst_25 = arith.constant 5.000000e-01 : f32
    %72 = vector.broadcast %cst_25 : f32 to vector<8x128xf32>
    %73 = arith.mulf %72, %71 : vector<8x128xf32>
    %74 = math.tanh %73 : vector<8x128xf32>
    %cst_26 = arith.constant 5.000000e-01 : f32
    %75 = vector.broadcast %cst_26 : f32 to vector<8x128xf32>
    %76 = arith.mulf %75, %74 : vector<8x128xf32>
    %cst_27 = arith.constant 5.000000e-01 : f32
    %77 = vector.broadcast %cst_27 : f32 to vector<8x128xf32>
    %78 = arith.addf %76, %77 : vector<8x128xf32>
    %79 = arith.mulf %68, %9 : vector<8x128xf32>
    %80 = arith.mulf %60, %70 : vector<8x128xf32>
    %81 = arith.addf %79, %80 : vector<8x128xf32>
    %82 = math.tanh %81 : vector<8x128xf32>
    %83 = arith.mulf %78, %82 : vector<8x128xf32>
    %c1_i32 = arith.constant 1 : i32
    %84 = arith.index_cast %c1_i32 : i32 to index
    %c0_28 = arith.constant 0 : index
    %c0_29 = arith.constant 0 : index
    %85 = vector.load %arg2[%84, %c0_28, %c0_29] : memref<16x16x512xbf16, #tpu.memory_space<vmem>>, vector<1x16x512xbf16>
    %86 = vector.shape_cast %85 : vector<1x16x512xbf16> to vector<16x512xbf16>
    %87 = arith.extf %86 : vector<16x512xbf16> to vector<16x512xf32>
    %88 = vector.extract_strided_slice %87 {offsets = [0, 0], sizes = [8, 512], strides = [1, 1]} : vector<16x512xf32> to vector<8x512xf32>
    %89 = arith.truncf %48 : vector<8x128xf32> to vector<8x128xbf16>
    %cst_30 = arith.constant dense<0.000000e+00> : vector<8x512xf32>
    %90 = tpu.matmul %89, %3, %cst_30 {dimension_numbers = #tpu.dot_dimension_numbers<[1], [0], [0], [1], [0, 0, 1, 1], [], []>} : vector<8x128xbf16>, vector<128x512xbf16>, vector<8x512xf32> -> vector<8x512xf32>
    %91 = arith.addf %88, %90 : vector<8x512xf32>
    %92 = vector.extract_strided_slice %91 {offsets = [0, 0], sizes = [8, 128], strides = [1, 1]} : vector<8x512xf32> to vector<8x128xf32>
    %cst_31 = arith.constant 5.000000e-01 : f32
    %93 = vector.broadcast %cst_31 : f32 to vector<8x128xf32>
    %94 = arith.mulf %93, %92 : vector<8x128xf32>
    %95 = math.tanh %94 : vector<8x128xf32>
    %cst_32 = arith.constant 5.000000e-01 : f32
    %96 = vector.broadcast %cst_32 : f32 to vector<8x128xf32>
    %97 = arith.mulf %96, %95 : vector<8x128xf32>
    %cst_33 = arith.constant 5.000000e-01 : f32
    %98 = vector.broadcast %cst_33 : f32 to vector<8x128xf32>
    %99 = arith.addf %97, %98 : vector<8x128xf32>
    %100 = vector.extract_strided_slice %91 {offsets = [0, 128], sizes = [8, 128], strides = [1, 1]} : vector<8x512xf32> to vector<8x128xf32>
    %cst_34 = arith.constant 5.000000e-01 : f32
    %101 = vector.broadcast %cst_34 : f32 to vector<8x128xf32>
    %102 = arith.mulf %101, %100 : vector<8x128xf32>
    %103 = math.tanh %102 : vector<8x128xf32>
    %cst_35 = arith.constant 5.000000e-01 : f32
    %104 = vector.broadcast %cst_35 : f32 to vector<8x128xf32>
    %105 = arith.mulf %104, %103 : vector<8x128xf32>
    %cst_36 = arith.constant 5.000000e-01 : f32
    %106 = vector.broadcast %cst_36 : f32 to vector<8x128xf32>
    %107 = arith.addf %105, %106 : vector<8x128xf32>
    %108 = vector.extract_strided_slice %91 {offsets = [0, 256], sizes = [8, 128], strides = [1, 1]} : vector<8x512xf32> to vector<8x128xf32>
    %109 = math.tanh %108 : vector<8x128xf32>
    %110 = vector.extract_strided_slice %91 {offsets = [0, 384], sizes = [8, 128], strides = [1, 1]} : vector<8x512xf32> to vector<8x128xf32>
    %cst_37 = arith.constant 5.000000e-01 : f32
    %111 = vector.broadcast %cst_37 : f32 to vector<8x128xf32>
    %112 = arith.mulf %111, %110 : vector<8x128xf32>
    %113 = math.tanh %112 : vector<8x128xf32>
    %cst_38 = arith.constant 5.000000e-01 : f32
    %114 = vector.broadcast %cst_38 : f32 to vector<8x128xf32>
    %115 = arith.mulf %114, %113 : vector<8x128xf32>
    %cst_39 = arith.constant 5.000000e-01 : f32
    %116 = vector.broadcast %cst_39 : f32 to vector<8x128xf32>
    %117 = arith.addf %115, %116 : vector<8x128xf32>
    %118 = arith.mulf %107, %46 : vector<8x128xf32>
    %119 = arith.mulf %99, %109 : vector<8x128xf32>
    %120 = arith.addf %118, %119 : vector<8x128xf32>
    %121 = math.tanh %120 : vector<8x128xf32>
    %122 = arith.mulf %117, %121 : vector<8x128xf32>
    %123 = vector.extract_strided_slice %87 {offsets = [8, 0], sizes = [8, 512], strides = [1, 1]} : vector<16x512xf32> to vector<8x512xf32>
    %124 = arith.truncf %83 : vector<8x128xf32> to vector<8x128xbf16>
    %cst_40 = arith.constant dense<0.000000e+00> : vector<8x512xf32>
    %125 = tpu.matmul %124, %3, %cst_40 {dimension_numbers = #tpu.dot_dimension_numbers<[1], [0], [0], [1], [0, 0, 1, 1], [], []>} : vector<8x128xbf16>, vector<128x512xbf16>, vector<8x512xf32> -> vector<8x512xf32>
    %126 = arith.addf %123, %125 : vector<8x512xf32>
    %127 = vector.extract_strided_slice %126 {offsets = [0, 0], sizes = [8, 128], strides = [1, 1]} : vector<8x512xf32> to vector<8x128xf32>
    %cst_41 = arith.constant 5.000000e-01 : f32
    %128 = vector.broadcast %cst_41 : f32 to vector<8x128xf32>
    %129 = arith.mulf %128, %127 : vector<8x128xf32>
    %130 = math.tanh %129 : vector<8x128xf32>
    %cst_42 = arith.constant 5.000000e-01 : f32
    %131 = vector.broadcast %cst_42 : f32 to vector<8x128xf32>
    %132 = arith.mulf %131, %130 : vector<8x128xf32>
    %cst_43 = arith.constant 5.000000e-01 : f32
    %133 = vector.broadcast %cst_43 : f32 to vector<8x128xf32>
    %134 = arith.addf %132, %133 : vector<8x128xf32>
    %135 = vector.extract_strided_slice %126 {offsets = [0, 128], sizes = [8, 128], strides = [1, 1]} : vector<8x512xf32> to vector<8x128xf32>
    %cst_44 = arith.constant 5.000000e-01 : f32
    %136 = vector.broadcast %cst_44 : f32 to vector<8x128xf32>
    %137 = arith.mulf %136, %135 : vector<8x128xf32>
    %138 = math.tanh %137 : vector<8x128xf32>
    %cst_45 = arith.constant 5.000000e-01 : f32
    %139 = vector.broadcast %cst_45 : f32 to vector<8x128xf32>
    %140 = arith.mulf %139, %138 : vector<8x128xf32>
    %cst_46 = arith.constant 5.000000e-01 : f32
    %141 = vector.broadcast %cst_46 : f32 to vector<8x128xf32>
    %142 = arith.addf %140, %141 : vector<8x128xf32>
    %143 = vector.extract_strided_slice %126 {offsets = [0, 256], sizes = [8, 128], strides = [1, 1]} : vector<8x512xf32> to vector<8x128xf32>
    %144 = math.tanh %143 : vector<8x128xf32>
    %145 = vector.extract_strided_slice %126 {offsets = [0, 384], sizes = [8, 128], strides = [1, 1]} : vector<8x512xf32> to vector<8x128xf32>
    %cst_47 = arith.constant 5.000000e-01 : f32
    %146 = vector.broadcast %cst_47 : f32 to vector<8x128xf32>
    %147 = arith.mulf %146, %145 : vector<8x128xf32>
    %148 = math.tanh %147 : vector<8x128xf32>
    %cst_48 = arith.constant 5.000000e-01 : f32
    %149 = vector.broadcast %cst_48 : f32 to vector<8x128xf32>
    %150 = arith.mulf %149, %148 : vector<8x128xf32>
    %cst_49 = arith.constant 5.000000e-01 : f32
    %151 = vector.broadcast %cst_49 : f32 to vector<8x128xf32>
    %152 = arith.addf %150, %151 : vector<8x128xf32>
    %153 = arith.mulf %142, %81 : vector<8x128xf32>
    %154 = arith.mulf %134, %144 : vector<8x128xf32>
    %155 = arith.addf %153, %154 : vector<8x128xf32>
    %156 = math.tanh %155 : vector<8x128xf32>
    %157 = arith.mulf %152, %156 : vector<8x128xf32>
    %c2_i32 = arith.constant 2 : i32
    %158 = arith.index_cast %c2_i32 : i32 to index
    %c0_50 = arith.constant 0 : index
    %c0_51 = arith.constant 0 : index
    %159 = vector.load %arg2[%158, %c0_50, %c0_51] : memref<16x16x512xbf16, #tpu.memory_space<vmem>>, vector<1x16x512xbf16>
    %160 = vector.shape_cast %159 : vector<1x16x512xbf16> to vector<16x512xbf16>
    %161 = arith.extf %160 : vector<16x512xbf16> to vector<16x512xf32>
    %162 = vector.extract_strided_slice %161 {offsets = [0, 0], sizes = [8, 512], strides = [1, 1]} : vector<16x512xf32> to vector<8x512xf32>
    %163 = arith.truncf %122 : vector<8x128xf32> to vector<8x128xbf16>
    %cst_52 = arith.constant dense<0.000000e+00> : vector<8x512xf32>
    %164 = tpu.matmul %163, %3, %cst_52 {dimension_numbers = #tpu.dot_dimension_numbers<[1], [0], [0], [1], [0, 0, 1, 1], [], []>} : vector<8x128xbf16>, vector<128x512xbf16>, vector<8x512xf32> -> vector<8x512xf32>
    %165 = arith.addf %162, %164 : vector<8x512xf32>
    %166 = vector.extract_strided_slice %165 {offsets = [0, 0], sizes = [8, 128], strides = [1, 1]} : vector<8x512xf32> to vector<8x128xf32>
    %cst_53 = arith.constant 5.000000e-01 : f32
    %167 = vector.broadcast %cst_53 : f32 to vector<8x128xf32>
    %168 = arith.mulf %167, %166 : vector<8x128xf32>
    %169 = math.tanh %168 : vector<8x128xf32>
    %cst_54 = arith.constant 5.000000e-01 : f32
    %170 = vector.broadcast %cst_54 : f32 to vector<8x128xf32>
    %171 = arith.mulf %170, %169 : vector<8x128xf32>
    %cst_55 = arith.constant 5.000000e-01 : f32
    %172 = vector.broadcast %cst_55 : f32 to vector<8x128xf32>
    %173 = arith.addf %171, %172 : vector<8x128xf32>
    %174 = vector.extract_strided_slice %165 {offsets = [0, 128], sizes = [8, 128], strides = [1, 1]} : vector<8x512xf32> to vector<8x128xf32>
    %cst_56 = arith.constant 5.000000e-01 : f32
    %175 = vector.broadcast %cst_56 : f32 to vector<8x128xf32>
    %176 = arith.mulf %175, %174 : vector<8x128xf32>
    %177 = math.tanh %176 : vector<8x128xf32>
    %cst_57 = arith.constant 5.000000e-01 : f32
    %178 = vector.broadcast %cst_57 : f32 to vector<8x128xf32>
    %179 = arith.mulf %178, %177 : vector<8x128xf32>
    %cst_58 = arith.constant 5.000000e-01 : f32
    %180 = vector.broadcast %cst_58 : f32 to vector<8x128xf32>
    %181 = arith.addf %179, %180 : vector<8x128xf32>
    %182 = vector.extract_strided_slice %165 {offsets = [0, 256], sizes = [8, 128], strides = [1, 1]} : vector<8x512xf32> to vector<8x128xf32>
    %183 = math.tanh %182 : vector<8x128xf32>
    %184 = vector.extract_strided_slice %165 {offsets = [0, 384], sizes = [8, 128], strides = [1, 1]} : vector<8x512xf32> to vector<8x128xf32>
    %cst_59 = arith.constant 5.000000e-01 : f32
    %185 = vector.broadcast %cst_59 : f32 to vector<8x128xf32>
    %186 = arith.mulf %185, %184 : vector<8x128xf32>
    %187 = math.tanh %186 : vector<8x128xf32>
    %cst_60 = arith.constant 5.000000e-01 : f32
    %188 = vector.broadcast %cst_60 : f32 to vector<8x128xf32>
    %189 = arith.mulf %188, %187 : vector<8x128xf32>
    %cst_61 = arith.constant 5.000000e-01 : f32
    %190 = vector.broadcast %cst_61 : f32 to vector<8x128xf32>
    %191 = arith.addf %189, %190 : vector<8x128xf32>
    %192 = arith.mulf %181, %120 : vector<8x128xf32>
    %193 = arith.mulf %173, %183 : vector<8x128xf32>
    %194 = arith.addf %192, %193 : vector<8x128xf32>
    %195 = math.tanh %194 : vector<8x128xf32>
    %196 = arith.mulf %191, %195 : vector<8x128xf32>
    %197 = vector.extract_strided_slice %161 {offsets = [8, 0], sizes = [8, 512], strides = [1, 1]} : vector<16x512xf32> to vector<8x512xf32>
    %198 = arith.truncf %157 : vector<8x128xf32> to vector<8x128xbf16>
    %cst_62 = arith.constant dense<0.000000e+00> : vector<8x512xf32>
    %199 = tpu.matmul %198, %3, %cst_62 {dimension_numbers = #tpu.dot_dimension_numbers<[1], [0], [0], [1], [0, 0, 1, 1], [], []>} : vector<8x128xbf16>, vector<128x512xbf16>, vector<8x512xf32> -> vector<8x512xf32>
    %200 = arith.addf %197, %199 : vector<8x512xf32>
    %201 = vector.extract_strided_slice %200 {offsets = [0, 0], sizes = [8, 128], strides = [1, 1]} : vector<8x512xf32> to vector<8x128xf32>
    %cst_63 = arith.constant 5.000000e-01 : f32
    %202 = vector.broadcast %cst_63 : f32 to vector<8x128xf32>
    %203 = arith.mulf %202, %201 : vector<8x128xf32>
    %204 = math.tanh %203 : vector<8x128xf32>
    %cst_64 = arith.constant 5.000000e-01 : f32
    %205 = vector.broadcast %cst_64 : f32 to vector<8x128xf32>
    %206 = arith.mulf %205, %204 : vector<8x128xf32>
    %cst_65 = arith.constant 5.000000e-01 : f32
    %207 = vector.broadcast %cst_65 : f32 to vector<8x128xf32>
    %208 = arith.addf %206, %207 : vector<8x128xf32>
    %209 = vector.extract_strided_slice %200 {offsets = [0, 128], sizes = [8, 128], strides = [1, 1]} : vector<8x512xf32> to vector<8x128xf32>
    %cst_66 = arith.constant 5.000000e-01 : f32
    %210 = vector.broadcast %cst_66 : f32 to vector<8x128xf32>
    %211 = arith.mulf %210, %209 : vector<8x128xf32>
    %212 = math.tanh %211 : vector<8x128xf32>
    %cst_67 = arith.constant 5.000000e-01 : f32
    %213 = vector.broadcast %cst_67 : f32 to vector<8x128xf32>
    %214 = arith.mulf %213, %212 : vector<8x128xf32>
    %cst_68 = arith.constant 5.000000e-01 : f32
    %215 = vector.broadcast %cst_68 : f32 to vector<8x128xf32>
    %216 = arith.addf %214, %215 : vector<8x128xf32>
    %217 = vector.extract_strided_slice %200 {offsets = [0, 256], sizes = [8, 128], strides = [1, 1]} : vector<8x512xf32> to vector<8x128xf32>
    %218 = math.tanh %217 : vector<8x128xf32>
    %219 = vector.extract_strided_slice %200 {offsets = [0, 384], sizes = [8, 128], strides = [1, 1]} : vector<8x512xf32> to vector<8x128xf32>
    %cst_69 = arith.constant 5.000000e-01 : f32
    %220 = vector.broadcast %cst_69 : f32 to vector<8x128xf32>
    %221 = arith.mulf %220, %219 : vector<8x128xf32>
    %222 = math.tanh %221 : vector<8x128xf32>
    %cst_70 = arith.constant 5.000000e-01 : f32
    %223 = vector.broadcast %cst_70 : f32 to vector<8x128xf32>
    %224 = arith.mulf %223, %222 : vector<8x128xf32>
    %cst_71 = arith.constant 5.000000e-01 : f32
    %225 = vector.broadcast %cst_71 : f32 to vector<8x128xf32>
    %226 = arith.addf %224, %225 : vector<8x128xf32>
    %227 = arith.mulf %216, %155 : vector<8x128xf32>
    %228 = arith.mulf %208, %218 : vector<8x128xf32>
    %229 = arith.addf %227, %228 : vector<8x128xf32>
    %230 = math.tanh %229 : vector<8x128xf32>
    %231 = arith.mulf %226, %230 : vector<8x128xf32>
    %c3_i32 = arith.constant 3 : i32
    %232 = arith.index_cast %c3_i32 : i32 to index
    %c0_72 = arith.constant 0 : index
    %c0_73 = arith.constant 0 : index
    %233 = vector.load %arg2[%232, %c0_72, %c0_73] : memref<16x16x512xbf16, #tpu.memory_space<vmem>>, vector<1x16x512xbf16>
    %234 = vector.shape_cast %233 : vector<1x16x512xbf16> to vector<16x512xbf16>
    %235 = arith.extf %234 : vector<16x512xbf16> to vector<16x512xf32>
    %236 = vector.extract_strided_slice %235 {offsets = [0, 0], sizes = [8, 512], strides = [1, 1]} : vector<16x512xf32> to vector<8x512xf32>
    %237 = arith.truncf %196 : vector<8x128xf32> to vector<8x128xbf16>
    %cst_74 = arith.constant dense<0.000000e+00> : vector<8x512xf32>
    %238 = tpu.matmul %237, %3, %cst_74 {dimension_numbers = #tpu.dot_dimension_numbers<[1], [0], [0], [1], [0, 0, 1, 1], [], []>} : vector<8x128xbf16>, vector<128x512xbf16>, vector<8x512xf32> -> vector<8x512xf32>
    %239 = arith.addf %236, %238 : vector<8x512xf32>
    %240 = vector.extract_strided_slice %239 {offsets = [0, 0], sizes = [8, 128], strides = [1, 1]} : vector<8x512xf32> to vector<8x128xf32>
    %cst_75 = arith.constant 5.000000e-01 : f32
    %241 = vector.broadcast %cst_75 : f32 to vector<8x128xf32>
    %242 = arith.mulf %241, %240 : vector<8x128xf32>
    %243 = math.tanh %242 : vector<8x128xf32>
    %cst_76 = arith.constant 5.000000e-01 : f32
    %244 = vector.broadcast %cst_76 : f32 to vector<8x128xf32>
    %245 = arith.mulf %244, %243 : vector<8x128xf32>
    %cst_77 = arith.constant 5.000000e-01 : f32
    %246 = vector.broadcast %cst_77 : f32 to vector<8x128xf32>
    %247 = arith.addf %245, %246 : vector<8x128xf32>
    %248 = vector.extract_strided_slice %239 {offsets = [0, 128], sizes = [8, 128], strides = [1, 1]} : vector<8x512xf32> to vector<8x128xf32>
    %cst_78 = arith.constant 5.000000e-01 : f32
    %249 = vector.broadcast %cst_78 : f32 to vector<8x128xf32>
    %250 = arith.mulf %249, %248 : vector<8x128xf32>
    %251 = math.tanh %250 : vector<8x128xf32>
    %cst_79 = arith.constant 5.000000e-01 : f32
    %252 = vector.broadcast %cst_79 : f32 to vector<8x128xf32>
    %253 = arith.mulf %252, %251 : vector<8x128xf32>
    %cst_80 = arith.constant 5.000000e-01 : f32
    %254 = vector.broadcast %cst_80 : f32 to vector<8x128xf32>
    %255 = arith.addf %253, %254 : vector<8x128xf32>
    %256 = vector.extract_strided_slice %239 {offsets = [0, 256], sizes = [8, 128], strides = [1, 1]} : vector<8x512xf32> to vector<8x128xf32>
    %257 = math.tanh %256 : vector<8x128xf32>
    %258 = vector.extract_strided_slice %239 {offsets = [0, 384], sizes = [8, 128], strides = [1, 1]} : vector<8x512xf32> to vector<8x128xf32>
    %cst_81 = arith.constant 5.000000e-01 : f32
    %259 = vector.broadcast %cst_81 : f32 to vector<8x128xf32>
    %260 = arith.mulf %259, %258 : vector<8x128xf32>
    %261 = math.tanh %260 : vector<8x128xf32>
    %cst_82 = arith.constant 5.000000e-01 : f32
    %262 = vector.broadcast %cst_82 : f32 to vector<8x128xf32>
    %263 = arith.mulf %262, %261 : vector<8x128xf32>
    %cst_83 = arith.constant 5.000000e-01 : f32
    %264 = vector.broadcast %cst_83 : f32 to vector<8x128xf32>
    %265 = arith.addf %263, %264 : vector<8x128xf32>
    %266 = arith.mulf %255, %194 : vector<8x128xf32>
    %267 = arith.mulf %247, %257 : vector<8x128xf32>
    %268 = arith.addf %266, %267 : vector<8x128xf32>
    %269 = math.tanh %268 : vector<8x128xf32>
    %270 = arith.mulf %265, %269 : vector<8x128xf32>
    %271 = vector.extract_strided_slice %235 {offsets = [8, 0], sizes = [8, 512], strides = [1, 1]} : vector<16x512xf32> to vector<8x512xf32>
    %272 = arith.truncf %231 : vector<8x128xf32> to vector<8x128xbf16>
    %cst_84 = arith.constant dense<0.000000e+00> : vector<8x512xf32>
    %273 = tpu.matmul %272, %3, %cst_84 {dimension_numbers = #tpu.dot_dimension_numbers<[1], [0], [0], [1], [0, 0, 1, 1], [], []>} : vector<8x128xbf16>, vector<128x512xbf16>, vector<8x512xf32> -> vector<8x512xf32>
    %274 = arith.addf %271, %273 : vector<8x512xf32>
    %275 = vector.extract_strided_slice %274 {offsets = [0, 0], sizes = [8, 128], strides = [1, 1]} : vector<8x512xf32> to vector<8x128xf32>
    %cst_85 = arith.constant 5.000000e-01 : f32
    %276 = vector.broadcast %cst_85 : f32 to vector<8x128xf32>
    %277 = arith.mulf %276, %275 : vector<8x128xf32>
    %278 = math.tanh %277 : vector<8x128xf32>
    %cst_86 = arith.constant 5.000000e-01 : f32
    %279 = vector.broadcast %cst_86 : f32 to vector<8x128xf32>
    %280 = arith.mulf %279, %278 : vector<8x128xf32>
    %cst_87 = arith.constant 5.000000e-01 : f32
    %281 = vector.broadcast %cst_87 : f32 to vector<8x128xf32>
    %282 = arith.addf %280, %281 : vector<8x128xf32>
    %283 = vector.extract_strided_slice %274 {offsets = [0, 128], sizes = [8, 128], strides = [1, 1]} : vector<8x512xf32> to vector<8x128xf32>
    %cst_88 = arith.constant 5.000000e-01 : f32
    %284 = vector.broadcast %cst_88 : f32 to vector<8x128xf32>
    %285 = arith.mulf %284, %283 : vector<8x128xf32>
    %286 = math.tanh %285 : vector<8x128xf32>
    %cst_89 = arith.constant 5.000000e-01 : f32
    %287 = vector.broadcast %cst_89 : f32 to vector<8x128xf32>
    %288 = arith.mulf %287, %286 : vector<8x128xf32>
    %cst_90 = arith.constant 5.000000e-01 : f32
    %289 = vector.broadcast %cst_90 : f32 to vector<8x128xf32>
    %290 = arith.addf %288, %289 : vector<8x128xf32>
    %291 = vector.extract_strided_slice %274 {offsets = [0, 256], sizes = [8, 128], strides = [1, 1]} : vector<8x512xf32> to vector<8x128xf32>
    %292 = math.tanh %291 : vector<8x128xf32>
    %293 = vector.extract_strided_slice %274 {offsets = [0, 384], sizes = [8, 128], strides = [1, 1]} : vector<8x512xf32> to vector<8x128xf32>
    %cst_91 = arith.constant 5.000000e-01 : f32
    %294 = vector.broadcast %cst_91 : f32 to vector<8x128xf32>
    %295 = arith.mulf %294, %293 : vector<8x128xf32>
    %296 = math.tanh %295 : vector<8x128xf32>
    %cst_92 = arith.constant 5.000000e-01 : f32
    %297 = vector.broadcast %cst_92 : f32 to vector<8x128xf32>
    %298 = arith.mulf %297, %296 : vector<8x128xf32>
    %cst_93 = arith.constant 5.000000e-01 : f32
    %299 = vector.broadcast %cst_93 : f32 to vector<8x128xf32>
    %300 = arith.addf %298, %299 : vector<8x128xf32>
    %301 = arith.mulf %290, %229 : vector<8x128xf32>
    %302 = arith.mulf %282, %292 : vector<8x128xf32>
    %303 = arith.addf %301, %302 : vector<8x128xf32>
    %304 = math.tanh %303 : vector<8x128xf32>
    %305 = arith.mulf %300, %304 : vector<8x128xf32>
    %c4_i32 = arith.constant 4 : i32
    %306 = arith.index_cast %c4_i32 : i32 to index
    %c0_94 = arith.constant 0 : index
    %c0_95 = arith.constant 0 : index
    %307 = vector.load %arg2[%306, %c0_94, %c0_95] : memref<16x16x512xbf16, #tpu.memory_space<vmem>>, vector<1x16x512xbf16>
    %308 = vector.shape_cast %307 : vector<1x16x512xbf16> to vector<16x512xbf16>
    %309 = arith.extf %308 : vector<16x512xbf16> to vector<16x512xf32>
    %310 = vector.extract_strided_slice %309 {offsets = [0, 0], sizes = [8, 512], strides = [1, 1]} : vector<16x512xf32> to vector<8x512xf32>
    %311 = arith.truncf %270 : vector<8x128xf32> to vector<8x128xbf16>
    %cst_96 = arith.constant dense<0.000000e+00> : vector<8x512xf32>
    %312 = tpu.matmul %311, %3, %cst_96 {dimension_numbers = #tpu.dot_dimension_numbers<[1], [0], [0], [1], [0, 0, 1, 1], [], []>} : vector<8x128xbf16>, vector<128x512xbf16>, vector<8x512xf32> -> vector<8x512xf32>
    %313 = arith.addf %310, %312 : vector<8x512xf32>
    %314 = vector.extract_strided_slice %313 {offsets = [0, 0], sizes = [8, 128], strides = [1, 1]} : vector<8x512xf32> to vector<8x128xf32>
    %cst_97 = arith.constant 5.000000e-01 : f32
    %315 = vector.broadcast %cst_97 : f32 to vector<8x128xf32>
    %316 = arith.mulf %315, %314 : vector<8x128xf32>
    %317 = math.tanh %316 : vector<8x128xf32>
    %cst_98 = arith.constant 5.000000e-01 : f32
    %318 = vector.broadcast %cst_98 : f32 to vector<8x128xf32>
    %319 = arith.mulf %318, %317 : vector<8x128xf32>
    %cst_99 = arith.constant 5.000000e-01 : f32
    %320 = vector.broadcast %cst_99 : f32 to vector<8x128xf32>
    %321 = arith.addf %319, %320 : vector<8x128xf32>
    %322 = vector.extract_strided_slice %313 {offsets = [0, 128], sizes = [8, 128], strides = [1, 1]} : vector<8x512xf32> to vector<8x128xf32>
    %cst_100 = arith.constant 5.000000e-01 : f32
    %323 = vector.broadcast %cst_100 : f32 to vector<8x128xf32>
    %324 = arith.mulf %323, %322 : vector<8x128xf32>
    %325 = math.tanh %324 : vector<8x128xf32>
    %cst_101 = arith.constant 5.000000e-01 : f32
    %326 = vector.broadcast %cst_101 : f32 to vector<8x128xf32>
    %327 = arith.mulf %326, %325 : vector<8x128xf32>
    %cst_102 = arith.constant 5.000000e-01 : f32
    %328 = vector.broadcast %cst_102 : f32 to vector<8x128xf32>
    %329 = arith.addf %327, %328 : vector<8x128xf32>
    %330 = vector.extract_strided_slice %313 {offsets = [0, 256], sizes = [8, 128], strides = [1, 1]} : vector<8x512xf32> to vector<8x128xf32>
    %331 = math.tanh %330 : vector<8x128xf32>
    %332 = vector.extract_strided_slice %313 {offsets = [0, 384], sizes = [8, 128], strides = [1, 1]} : vector<8x512xf32> to vector<8x128xf32>
    %cst_103 = arith.constant 5.000000e-01 : f32
    %333 = vector.broadcast %cst_103 : f32 to vector<8x128xf32>
    %334 = arith.mulf %333, %332 : vector<8x128xf32>
    %335 = math.tanh %334 : vector<8x128xf32>
    %cst_104 = arith.constant 5.000000e-01 : f32
    %336 = vector.broadcast %cst_104 : f32 to vector<8x128xf32>
    %337 = arith.mulf %336, %335 : vector<8x128xf32>
    %cst_105 = arith.constant 5.000000e-01 : f32
    %338 = vector.broadcast %cst_105 : f32 to vector<8x128xf32>
    %339 = arith.addf %337, %338 : vector<8x128xf32>
    %340 = arith.mulf %329, %268 : vector<8x128xf32>
    %341 = arith.mulf %321, %331 : vector<8x128xf32>
    %342 = arith.addf %340, %341 : vector<8x128xf32>
    %343 = math.tanh %342 : vector<8x128xf32>
    %344 = arith.mulf %339, %343 : vector<8x128xf32>
    %345 = vector.extract_strided_slice %309 {offsets = [8, 0], sizes = [8, 512], strides = [1, 1]} : vector<16x512xf32> to vector<8x512xf32>
    %346 = arith.truncf %305 : vector<8x128xf32> to vector<8x128xbf16>
    %cst_106 = arith.constant dense<0.000000e+00> : vector<8x512xf32>
    %347 = tpu.matmul %346, %3, %cst_106 {dimension_numbers = #tpu.dot_dimension_numbers<[1], [0], [0], [1], [0, 0, 1, 1], [], []>} : vector<8x128xbf16>, vector<128x512xbf16>, vector<8x512xf32> -> vector<8x512xf32>
    %348 = arith.addf %345, %347 : vector<8x512xf32>
    %349 = vector.extract_strided_slice %348 {offsets = [0, 0], sizes = [8, 128], strides = [1, 1]} : vector<8x512xf32> to vector<8x128xf32>
    %cst_107 = arith.constant 5.000000e-01 : f32
    %350 = vector.broadcast %cst_107 : f32 to vector<8x128xf32>
    %351 = arith.mulf %350, %349 : vector<8x128xf32>
    %352 = math.tanh %351 : vector<8x128xf32>
    %cst_108 = arith.constant 5.000000e-01 : f32
    %353 = vector.broadcast %cst_108 : f32 to vector<8x128xf32>
    %354 = arith.mulf %353, %352 : vector<8x128xf32>
    %cst_109 = arith.constant 5.000000e-01 : f32
    %355 = vector.broadcast %cst_109 : f32 to vector<8x128xf32>
    %356 = arith.addf %354, %355 : vector<8x128xf32>
    %357 = vector.extract_strided_slice %348 {offsets = [0, 128], sizes = [8, 128], strides = [1, 1]} : vector<8x512xf32> to vector<8x128xf32>
    %cst_110 = arith.constant 5.000000e-01 : f32
    %358 = vector.broadcast %cst_110 : f32 to vector<8x128xf32>
    %359 = arith.mulf %358, %357 : vector<8x128xf32>
    %360 = math.tanh %359 : vector<8x128xf32>
    %cst_111 = arith.constant 5.000000e-01 : f32
    %361 = vector.broadcast %cst_111 : f32 to vector<8x128xf32>
    %362 = arith.mulf %361, %360 : vector<8x128xf32>
    %cst_112 = arith.constant 5.000000e-01 : f32
    %363 = vector.broadcast %cst_112 : f32 to vector<8x128xf32>
    %364 = arith.addf %362, %363 : vector<8x128xf32>
    %365 = vector.extract_strided_slice %348 {offsets = [0, 256], sizes = [8, 128], strides = [1, 1]} : vector<8x512xf32> to vector<8x128xf32>
    %366 = math.tanh %365 : vector<8x128xf32>
    %367 = vector.extract_strided_slice %348 {offsets = [0, 384], sizes = [8, 128], strides = [1, 1]} : vector<8x512xf32> to vector<8x128xf32>
    %cst_113 = arith.constant 5.000000e-01 : f32
    %368 = vector.broadcast %cst_113 : f32 to vector<8x128xf32>
    %369 = arith.mulf %368, %367 : vector<8x128xf32>
    %370 = math.tanh %369 : vector<8x128xf32>
    %cst_114 = arith.constant 5.000000e-01 : f32
    %371 = vector.broadcast %cst_114 : f32 to vector<8x128xf32>
    %372 = arith.mulf %371, %370 : vector<8x128xf32>
    %cst_115 = arith.constant 5.000000e-01 : f32
    %373 = vector.broadcast %cst_115 : f32 to vector<8x128xf32>
    %374 = arith.addf %372, %373 : vector<8x128xf32>
    %375 = arith.mulf %364, %303 : vector<8x128xf32>
    %376 = arith.mulf %356, %366 : vector<8x128xf32>
    %377 = arith.addf %375, %376 : vector<8x128xf32>
    %378 = math.tanh %377 : vector<8x128xf32>
    %379 = arith.mulf %374, %378 : vector<8x128xf32>
    %c5_i32 = arith.constant 5 : i32
    %380 = arith.index_cast %c5_i32 : i32 to index
    %c0_116 = arith.constant 0 : index
    %c0_117 = arith.constant 0 : index
    %381 = vector.load %arg2[%380, %c0_116, %c0_117] : memref<16x16x512xbf16, #tpu.memory_space<vmem>>, vector<1x16x512xbf16>
    %382 = vector.shape_cast %381 : vector<1x16x512xbf16> to vector<16x512xbf16>
    %383 = arith.extf %382 : vector<16x512xbf16> to vector<16x512xf32>
    %384 = vector.extract_strided_slice %383 {offsets = [0, 0], sizes = [8, 512], strides = [1, 1]} : vector<16x512xf32> to vector<8x512xf32>
    %385 = arith.truncf %344 : vector<8x128xf32> to vector<8x128xbf16>
    %cst_118 = arith.constant dense<0.000000e+00> : vector<8x512xf32>
    %386 = tpu.matmul %385, %3, %cst_118 {dimension_numbers = #tpu.dot_dimension_numbers<[1], [0], [0], [1], [0, 0, 1, 1], [], []>} : vector<8x128xbf16>, vector<128x512xbf16>, vector<8x512xf32> -> vector<8x512xf32>
    %387 = arith.addf %384, %386 : vector<8x512xf32>
    %388 = vector.extract_strided_slice %387 {offsets = [0, 0], sizes = [8, 128], strides = [1, 1]} : vector<8x512xf32> to vector<8x128xf32>
    %cst_119 = arith.constant 5.000000e-01 : f32
    %389 = vector.broadcast %cst_119 : f32 to vector<8x128xf32>
    %390 = arith.mulf %389, %388 : vector<8x128xf32>
    %391 = math.tanh %390 : vector<8x128xf32>
    %cst_120 = arith.constant 5.000000e-01 : f32
    %392 = vector.broadcast %cst_120 : f32 to vector<8x128xf32>
    %393 = arith.mulf %392, %391 : vector<8x128xf32>
    %cst_121 = arith.constant 5.000000e-01 : f32
    %394 = vector.broadcast %cst_121 : f32 to vector<8x128xf32>
    %395 = arith.addf %393, %394 : vector<8x128xf32>
    %396 = vector.extract_strided_slice %387 {offsets = [0, 128], sizes = [8, 128], strides = [1, 1]} : vector<8x512xf32> to vector<8x128xf32>
    %cst_122 = arith.constant 5.000000e-01 : f32
    %397 = vector.broadcast %cst_122 : f32 to vector<8x128xf32>
    %398 = arith.mulf %397, %396 : vector<8x128xf32>
    %399 = math.tanh %398 : vector<8x128xf32>
    %cst_123 = arith.constant 5.000000e-01 : f32
    %400 = vector.broadcast %cst_123 : f32 to vector<8x128xf32>
    %401 = arith.mulf %400, %399 : vector<8x128xf32>
    %cst_124 = arith.constant 5.000000e-01 : f32
    %402 = vector.broadcast %cst_124 : f32 to vector<8x128xf32>
    %403 = arith.addf %401, %402 : vector<8x128xf32>
    %404 = vector.extract_strided_slice %387 {offsets = [0, 256], sizes = [8, 128], strides = [1, 1]} : vector<8x512xf32> to vector<8x128xf32>
    %405 = math.tanh %404 : vector<8x128xf32>
    %406 = vector.extract_strided_slice %387 {offsets = [0, 384], sizes = [8, 128], strides = [1, 1]} : vector<8x512xf32> to vector<8x128xf32>
    %cst_125 = arith.constant 5.000000e-01 : f32
    %407 = vector.broadcast %cst_125 : f32 to vector<8x128xf32>
    %408 = arith.mulf %407, %406 : vector<8x128xf32>
    %409 = math.tanh %408 : vector<8x128xf32>
    %cst_126 = arith.constant 5.000000e-01 : f32
    %410 = vector.broadcast %cst_126 : f32 to vector<8x128xf32>
    %411 = arith.mulf %410, %409 : vector<8x128xf32>
    %cst_127 = arith.constant 5.000000e-01 : f32
    %412 = vector.broadcast %cst_127 : f32 to vector<8x128xf32>
    %413 = arith.addf %411, %412 : vector<8x128xf32>
    %414 = arith.mulf %403, %342 : vector<8x128xf32>
    %415 = arith.mulf %395, %405 : vector<8x128xf32>
    %416 = arith.addf %414, %415 : vector<8x128xf32>
    %417 = math.tanh %416 : vector<8x128xf32>
    %418 = arith.mulf %413, %417 : vector<8x128xf32>
    %419 = vector.extract_strided_slice %383 {offsets = [8, 0], sizes = [8, 512], strides = [1, 1]} : vector<16x512xf32> to vector<8x512xf32>
    %420 = arith.truncf %379 : vector<8x128xf32> to vector<8x128xbf16>
    %cst_128 = arith.constant dense<0.000000e+00> : vector<8x512xf32>
    %421 = tpu.matmul %420, %3, %cst_128 {dimension_numbers = #tpu.dot_dimension_numbers<[1], [0], [0], [1], [0, 0, 1, 1], [], []>} : vector<8x128xbf16>, vector<128x512xbf16>, vector<8x512xf32> -> vector<8x512xf32>
    %422 = arith.addf %419, %421 : vector<8x512xf32>
    %423 = vector.extract_strided_slice %422 {offsets = [0, 0], sizes = [8, 128], strides = [1, 1]} : vector<8x512xf32> to vector<8x128xf32>
    %cst_129 = arith.constant 5.000000e-01 : f32
    %424 = vector.broadcast %cst_129 : f32 to vector<8x128xf32>
    %425 = arith.mulf %424, %423 : vector<8x128xf32>
    %426 = math.tanh %425 : vector<8x128xf32>
    %cst_130 = arith.constant 5.000000e-01 : f32
    %427 = vector.broadcast %cst_130 : f32 to vector<8x128xf32>
    %428 = arith.mulf %427, %426 : vector<8x128xf32>
    %cst_131 = arith.constant 5.000000e-01 : f32
    %429 = vector.broadcast %cst_131 : f32 to vector<8x128xf32>
    %430 = arith.addf %428, %429 : vector<8x128xf32>
    %431 = vector.extract_strided_slice %422 {offsets = [0, 128], sizes = [8, 128], strides = [1, 1]} : vector<8x512xf32> to vector<8x128xf32>
    %cst_132 = arith.constant 5.000000e-01 : f32
    %432 = vector.broadcast %cst_132 : f32 to vector<8x128xf32>
    %433 = arith.mulf %432, %431 : vector<8x128xf32>
    %434 = math.tanh %433 : vector<8x128xf32>
    %cst_133 = arith.constant 5.000000e-01 : f32
    %435 = vector.broadcast %cst_133 : f32 to vector<8x128xf32>
    %436 = arith.mulf %435, %434 : vector<8x128xf32>
    %cst_134 = arith.constant 5.000000e-01 : f32
    %437 = vector.broadcast %cst_134 : f32 to vector<8x128xf32>
    %438 = arith.addf %436, %437 : vector<8x128xf32>
    %439 = vector.extract_strided_slice %422 {offsets = [0, 256], sizes = [8, 128], strides = [1, 1]} : vector<8x512xf32> to vector<8x128xf32>
    %440 = math.tanh %439 : vector<8x128xf32>
    %441 = vector.extract_strided_slice %422 {offsets = [0, 384], sizes = [8, 128], strides = [1, 1]} : vector<8x512xf32> to vector<8x128xf32>
    %cst_135 = arith.constant 5.000000e-01 : f32
    %442 = vector.broadcast %cst_135 : f32 to vector<8x128xf32>
    %443 = arith.mulf %442, %441 : vector<8x128xf32>
    %444 = math.tanh %443 : vector<8x128xf32>
    %cst_136 = arith.constant 5.000000e-01 : f32
    %445 = vector.broadcast %cst_136 : f32 to vector<8x128xf32>
    %446 = arith.mulf %445, %444 : vector<8x128xf32>
    %cst_137 = arith.constant 5.000000e-01 : f32
    %447 = vector.broadcast %cst_137 : f32 to vector<8x128xf32>
    %448 = arith.addf %446, %447 : vector<8x128xf32>
    %449 = arith.mulf %438, %377 : vector<8x128xf32>
    %450 = arith.mulf %430, %440 : vector<8x128xf32>
    %451 = arith.addf %449, %450 : vector<8x128xf32>
    %452 = math.tanh %451 : vector<8x128xf32>
    %453 = arith.mulf %448, %452 : vector<8x128xf32>
    %c6_i32 = arith.constant 6 : i32
    %454 = arith.index_cast %c6_i32 : i32 to index
    %c0_138 = arith.constant 0 : index
    %c0_139 = arith.constant 0 : index
    %455 = vector.load %arg2[%454, %c0_138, %c0_139] : memref<16x16x512xbf16, #tpu.memory_space<vmem>>, vector<1x16x512xbf16>
    %456 = vector.shape_cast %455 : vector<1x16x512xbf16> to vector<16x512xbf16>
    %457 = arith.extf %456 : vector<16x512xbf16> to vector<16x512xf32>
    %458 = vector.extract_strided_slice %457 {offsets = [0, 0], sizes = [8, 512], strides = [1, 1]} : vector<16x512xf32> to vector<8x512xf32>
    %459 = arith.truncf %418 : vector<8x128xf32> to vector<8x128xbf16>
    %cst_140 = arith.constant dense<0.000000e+00> : vector<8x512xf32>
    %460 = tpu.matmul %459, %3, %cst_140 {dimension_numbers = #tpu.dot_dimension_numbers<[1], [0], [0], [1], [0, 0, 1, 1], [], []>} : vector<8x128xbf16>, vector<128x512xbf16>, vector<8x512xf32> -> vector<8x512xf32>
    %461 = arith.addf %458, %460 : vector<8x512xf32>
    %462 = vector.extract_strided_slice %461 {offsets = [0, 0], sizes = [8, 128], strides = [1, 1]} : vector<8x512xf32> to vector<8x128xf32>
    %cst_141 = arith.constant 5.000000e-01 : f32
    %463 = vector.broadcast %cst_141 : f32 to vector<8x128xf32>
    %464 = arith.mulf %463, %462 : vector<8x128xf32>
    %465 = math.tanh %464 : vector<8x128xf32>
    %cst_142 = arith.constant 5.000000e-01 : f32
    %466 = vector.broadcast %cst_142 : f32 to vector<8x128xf32>
    %467 = arith.mulf %466, %465 : vector<8x128xf32>
    %cst_143 = arith.constant 5.000000e-01 : f32
    %468 = vector.broadcast %cst_143 : f32 to vector<8x128xf32>
    %469 = arith.addf %467, %468 : vector<8x128xf32>
    %470 = vector.extract_strided_slice %461 {offsets = [0, 128], sizes = [8, 128], strides = [1, 1]} : vector<8x512xf32> to vector<8x128xf32>
    %cst_144 = arith.constant 5.000000e-01 : f32
    %471 = vector.broadcast %cst_144 : f32 to vector<8x128xf32>
    %472 = arith.mulf %471, %470 : vector<8x128xf32>
    %473 = math.tanh %472 : vector<8x128xf32>
    %cst_145 = arith.constant 5.000000e-01 : f32
    %474 = vector.broadcast %cst_145 : f32 to vector<8x128xf32>
    %475 = arith.mulf %474, %473 : vector<8x128xf32>
    %cst_146 = arith.constant 5.000000e-01 : f32
    %476 = vector.broadcast %cst_146 : f32 to vector<8x128xf32>
    %477 = arith.addf %475, %476 : vector<8x128xf32>
    %478 = vector.extract_strided_slice %461 {offsets = [0, 256], sizes = [8, 128], strides = [1, 1]} : vector<8x512xf32> to vector<8x128xf32>
    %479 = math.tanh %478 : vector<8x128xf32>
    %480 = vector.extract_strided_slice %461 {offsets = [0, 384], sizes = [8, 128], strides = [1, 1]} : vector<8x512xf32> to vector<8x128xf32>
    %cst_147 = arith.constant 5.000000e-01 : f32
    %481 = vector.broadcast %cst_147 : f32 to vector<8x128xf32>
    %482 = arith.mulf %481, %480 : vector<8x128xf32>
    %483 = math.tanh %482 : vector<8x128xf32>
    %cst_148 = arith.constant 5.000000e-01 : f32
    %484 = vector.broadcast %cst_148 : f32 to vector<8x128xf32>
    %485 = arith.mulf %484, %483 : vector<8x128xf32>
    %cst_149 = arith.constant 5.000000e-01 : f32
    %486 = vector.broadcast %cst_149 : f32 to vector<8x128xf32>
    %487 = arith.addf %485, %486 : vector<8x128xf32>
    %488 = arith.mulf %477, %416 : vector<8x128xf32>
    %489 = arith.mulf %469, %479 : vector<8x128xf32>
    %490 = arith.addf %488, %489 : vector<8x128xf32>
    %491 = math.tanh %490 : vector<8x128xf32>
    %492 = arith.mulf %487, %491 : vector<8x128xf32>
    %493 = vector.extract_strided_slice %457 {offsets = [8, 0], sizes = [8, 512], strides = [1, 1]} : vector<16x512xf32> to vector<8x512xf32>
    %494 = arith.truncf %453 : vector<8x128xf32> to vector<8x128xbf16>
    %cst_150 = arith.constant dense<0.000000e+00> : vector<8x512xf32>
    %495 = tpu.matmul %494, %3, %cst_150 {dimension_numbers = #tpu.dot_dimension_numbers<[1], [0], [0], [1], [0, 0, 1, 1], [], []>} : vector<8x128xbf16>, vector<128x512xbf16>, vector<8x512xf32> -> vector<8x512xf32>
    %496 = arith.addf %493, %495 : vector<8x512xf32>
    %497 = vector.extract_strided_slice %496 {offsets = [0, 0], sizes = [8, 128], strides = [1, 1]} : vector<8x512xf32> to vector<8x128xf32>
    %cst_151 = arith.constant 5.000000e-01 : f32
    %498 = vector.broadcast %cst_151 : f32 to vector<8x128xf32>
    %499 = arith.mulf %498, %497 : vector<8x128xf32>
    %500 = math.tanh %499 : vector<8x128xf32>
    %cst_152 = arith.constant 5.000000e-01 : f32
    %501 = vector.broadcast %cst_152 : f32 to vector<8x128xf32>
    %502 = arith.mulf %501, %500 : vector<8x128xf32>
    %cst_153 = arith.constant 5.000000e-01 : f32
    %503 = vector.broadcast %cst_153 : f32 to vector<8x128xf32>
    %504 = arith.addf %502, %503 : vector<8x128xf32>
    %505 = vector.extract_strided_slice %496 {offsets = [0, 128], sizes = [8, 128], strides = [1, 1]} : vector<8x512xf32> to vector<8x128xf32>
    %cst_154 = arith.constant 5.000000e-01 : f32
    %506 = vector.broadcast %cst_154 : f32 to vector<8x128xf32>
    %507 = arith.mulf %506, %505 : vector<8x128xf32>
    %508 = math.tanh %507 : vector<8x128xf32>
    %cst_155 = arith.constant 5.000000e-01 : f32
    %509 = vector.broadcast %cst_155 : f32 to vector<8x128xf32>
    %510 = arith.mulf %509, %508 : vector<8x128xf32>
    %cst_156 = arith.constant 5.000000e-01 : f32
    %511 = vector.broadcast %cst_156 : f32 to vector<8x128xf32>
    %512 = arith.addf %510, %511 : vector<8x128xf32>
    %513 = vector.extract_strided_slice %496 {offsets = [0, 256], sizes = [8, 128], strides = [1, 1]} : vector<8x512xf32> to vector<8x128xf32>
    %514 = math.tanh %513 : vector<8x128xf32>
    %515 = vector.extract_strided_slice %496 {offsets = [0, 384], sizes = [8, 128], strides = [1, 1]} : vector<8x512xf32> to vector<8x128xf32>
    %cst_157 = arith.constant 5.000000e-01 : f32
    %516 = vector.broadcast %cst_157 : f32 to vector<8x128xf32>
    %517 = arith.mulf %516, %515 : vector<8x128xf32>
    %518 = math.tanh %517 : vector<8x128xf32>
    %cst_158 = arith.constant 5.000000e-01 : f32
    %519 = vector.broadcast %cst_158 : f32 to vector<8x128xf32>
    %520 = arith.mulf %519, %518 : vector<8x128xf32>
    %cst_159 = arith.constant 5.000000e-01 : f32
    %521 = vector.broadcast %cst_159 : f32 to vector<8x128xf32>
    %522 = arith.addf %520, %521 : vector<8x128xf32>
    %523 = arith.mulf %512, %451 : vector<8x128xf32>
    %524 = arith.mulf %504, %514 : vector<8x128xf32>
    %525 = arith.addf %523, %524 : vector<8x128xf32>
    %526 = math.tanh %525 : vector<8x128xf32>
    %527 = arith.mulf %522, %526 : vector<8x128xf32>
    %c7_i32 = arith.constant 7 : i32
    %528 = arith.index_cast %c7_i32 : i32 to index
    %c0_160 = arith.constant 0 : index
    %c0_161 = arith.constant 0 : index
    %529 = vector.load %arg2[%528, %c0_160, %c0_161] : memref<16x16x512xbf16, #tpu.memory_space<vmem>>, vector<1x16x512xbf16>
    %530 = vector.shape_cast %529 : vector<1x16x512xbf16> to vector<16x512xbf16>
    %531 = arith.extf %530 : vector<16x512xbf16> to vector<16x512xf32>
    %532 = vector.extract_strided_slice %531 {offsets = [0, 0], sizes = [8, 512], strides = [1, 1]} : vector<16x512xf32> to vector<8x512xf32>
    %533 = arith.truncf %492 : vector<8x128xf32> to vector<8x128xbf16>
    %cst_162 = arith.constant dense<0.000000e+00> : vector<8x512xf32>
    %534 = tpu.matmul %533, %3, %cst_162 {dimension_numbers = #tpu.dot_dimension_numbers<[1], [0], [0], [1], [0, 0, 1, 1], [], []>} : vector<8x128xbf16>, vector<128x512xbf16>, vector<8x512xf32> -> vector<8x512xf32>
    %535 = arith.addf %532, %534 : vector<8x512xf32>
    %536 = vector.extract_strided_slice %535 {offsets = [0, 0], sizes = [8, 128], strides = [1, 1]} : vector<8x512xf32> to vector<8x128xf32>
    %cst_163 = arith.constant 5.000000e-01 : f32
    %537 = vector.broadcast %cst_163 : f32 to vector<8x128xf32>
    %538 = arith.mulf %537, %536 : vector<8x128xf32>
    %539 = math.tanh %538 : vector<8x128xf32>
    %cst_164 = arith.constant 5.000000e-01 : f32
    %540 = vector.broadcast %cst_164 : f32 to vector<8x128xf32>
    %541 = arith.mulf %540, %539 : vector<8x128xf32>
    %cst_165 = arith.constant 5.000000e-01 : f32
    %542 = vector.broadcast %cst_165 : f32 to vector<8x128xf32>
    %543 = arith.addf %541, %542 : vector<8x128xf32>
    %544 = vector.extract_strided_slice %535 {offsets = [0, 128], sizes = [8, 128], strides = [1, 1]} : vector<8x512xf32> to vector<8x128xf32>
    %cst_166 = arith.constant 5.000000e-01 : f32
    %545 = vector.broadcast %cst_166 : f32 to vector<8x128xf32>
    %546 = arith.mulf %545, %544 : vector<8x128xf32>
    %547 = math.tanh %546 : vector<8x128xf32>
    %cst_167 = arith.constant 5.000000e-01 : f32
    %548 = vector.broadcast %cst_167 : f32 to vector<8x128xf32>
    %549 = arith.mulf %548, %547 : vector<8x128xf32>
    %cst_168 = arith.constant 5.000000e-01 : f32
    %550 = vector.broadcast %cst_168 : f32 to vector<8x128xf32>
    %551 = arith.addf %549, %550 : vector<8x128xf32>
    %552 = vector.extract_strided_slice %535 {offsets = [0, 256], sizes = [8, 128], strides = [1, 1]} : vector<8x512xf32> to vector<8x128xf32>
    %553 = math.tanh %552 : vector<8x128xf32>
    %554 = vector.extract_strided_slice %535 {offsets = [0, 384], sizes = [8, 128], strides = [1, 1]} : vector<8x512xf32> to vector<8x128xf32>
    %cst_169 = arith.constant 5.000000e-01 : f32
    %555 = vector.broadcast %cst_169 : f32 to vector<8x128xf32>
    %556 = arith.mulf %555, %554 : vector<8x128xf32>
    %557 = math.tanh %556 : vector<8x128xf32>
    %cst_170 = arith.constant 5.000000e-01 : f32
    %558 = vector.broadcast %cst_170 : f32 to vector<8x128xf32>
    %559 = arith.mulf %558, %557 : vector<8x128xf32>
    %cst_171 = arith.constant 5.000000e-01 : f32
    %560 = vector.broadcast %cst_171 : f32 to vector<8x128xf32>
    %561 = arith.addf %559, %560 : vector<8x128xf32>
    %562 = arith.mulf %551, %490 : vector<8x128xf32>
    %563 = arith.mulf %543, %553 : vector<8x128xf32>
    %564 = arith.addf %562, %563 : vector<8x128xf32>
    %565 = math.tanh %564 : vector<8x128xf32>
    %566 = arith.mulf %561, %565 : vector<8x128xf32>
    %567 = vector.extract_strided_slice %531 {offsets = [8, 0], sizes = [8, 512], strides = [1, 1]} : vector<16x512xf32> to vector<8x512xf32>
    %568 = arith.truncf %527 : vector<8x128xf32> to vector<8x128xbf16>
    %cst_172 = arith.constant dense<0.000000e+00> : vector<8x512xf32>
    %569 = tpu.matmul %568, %3, %cst_172 {dimension_numbers = #tpu.dot_dimension_numbers<[1], [0], [0], [1], [0, 0, 1, 1], [], []>} : vector<8x128xbf16>, vector<128x512xbf16>, vector<8x512xf32> -> vector<8x512xf32>
    %570 = arith.addf %567, %569 : vector<8x512xf32>
    %571 = vector.extract_strided_slice %570 {offsets = [0, 0], sizes = [8, 128], strides = [1, 1]} : vector<8x512xf32> to vector<8x128xf32>
    %cst_173 = arith.constant 5.000000e-01 : f32
    %572 = vector.broadcast %cst_173 : f32 to vector<8x128xf32>
    %573 = arith.mulf %572, %571 : vector<8x128xf32>
    %574 = math.tanh %573 : vector<8x128xf32>
    %cst_174 = arith.constant 5.000000e-01 : f32
    %575 = vector.broadcast %cst_174 : f32 to vector<8x128xf32>
    %576 = arith.mulf %575, %574 : vector<8x128xf32>
    %cst_175 = arith.constant 5.000000e-01 : f32
    %577 = vector.broadcast %cst_175 : f32 to vector<8x128xf32>
    %578 = arith.addf %576, %577 : vector<8x128xf32>
    %579 = vector.extract_strided_slice %570 {offsets = [0, 128], sizes = [8, 128], strides = [1, 1]} : vector<8x512xf32> to vector<8x128xf32>
    %cst_176 = arith.constant 5.000000e-01 : f32
    %580 = vector.broadcast %cst_176 : f32 to vector<8x128xf32>
    %581 = arith.mulf %580, %579 : vector<8x128xf32>
    %582 = math.tanh %581 : vector<8x128xf32>
    %cst_177 = arith.constant 5.000000e-01 : f32
    %583 = vector.broadcast %cst_177 : f32 to vector<8x128xf32>
    %584 = arith.mulf %583, %582 : vector<8x128xf32>
    %cst_178 = arith.constant 5.000000e-01 : f32
    %585 = vector.broadcast %cst_178 : f32 to vector<8x128xf32>
    %586 = arith.addf %584, %585 : vector<8x128xf32>
    %587 = vector.extract_strided_slice %570 {offsets = [0, 256], sizes = [8, 128], strides = [1, 1]} : vector<8x512xf32> to vector<8x128xf32>
    %588 = math.tanh %587 : vector<8x128xf32>
    %589 = vector.extract_strided_slice %570 {offsets = [0, 384], sizes = [8, 128], strides = [1, 1]} : vector<8x512xf32> to vector<8x128xf32>
    %cst_179 = arith.constant 5.000000e-01 : f32
    %590 = vector.broadcast %cst_179 : f32 to vector<8x128xf32>
    %591 = arith.mulf %590, %589 : vector<8x128xf32>
    %592 = math.tanh %591 : vector<8x128xf32>
    %cst_180 = arith.constant 5.000000e-01 : f32
    %593 = vector.broadcast %cst_180 : f32 to vector<8x128xf32>
    %594 = arith.mulf %593, %592 : vector<8x128xf32>
    %cst_181 = arith.constant 5.000000e-01 : f32
    %595 = vector.broadcast %cst_181 : f32 to vector<8x128xf32>
    %596 = arith.addf %594, %595 : vector<8x128xf32>
    %597 = arith.mulf %586, %525 : vector<8x128xf32>
    %598 = arith.mulf %578, %588 : vector<8x128xf32>
    %599 = arith.addf %597, %598 : vector<8x128xf32>
    %600 = math.tanh %599 : vector<8x128xf32>
    %601 = arith.mulf %596, %600 : vector<8x128xf32>
    %c8_i32 = arith.constant 8 : i32
    %602 = arith.index_cast %c8_i32 : i32 to index
    %c0_182 = arith.constant 0 : index
    %c0_183 = arith.constant 0 : index
    %603 = vector.load %arg2[%602, %c0_182, %c0_183] : memref<16x16x512xbf16, #tpu.memory_space<vmem>>, vector<1x16x512xbf16>
    %604 = vector.shape_cast %603 : vector<1x16x512xbf16> to vector<16x512xbf16>
    %605 = arith.extf %604 : vector<16x512xbf16> to vector<16x512xf32>
    %606 = vector.extract_strided_slice %605 {offsets = [0, 0], sizes = [8, 512], strides = [1, 1]} : vector<16x512xf32> to vector<8x512xf32>
    %607 = arith.truncf %566 : vector<8x128xf32> to vector<8x128xbf16>
    %cst_184 = arith.constant dense<0.000000e+00> : vector<8x512xf32>
    %608 = tpu.matmul %607, %3, %cst_184 {dimension_numbers = #tpu.dot_dimension_numbers<[1], [0], [0], [1], [0, 0, 1, 1], [], []>} : vector<8x128xbf16>, vector<128x512xbf16>, vector<8x512xf32> -> vector<8x512xf32>
    %609 = arith.addf %606, %608 : vector<8x512xf32>
    %610 = vector.extract_strided_slice %609 {offsets = [0, 0], sizes = [8, 128], strides = [1, 1]} : vector<8x512xf32> to vector<8x128xf32>
    %cst_185 = arith.constant 5.000000e-01 : f32
    %611 = vector.broadcast %cst_185 : f32 to vector<8x128xf32>
    %612 = arith.mulf %611, %610 : vector<8x128xf32>
    %613 = math.tanh %612 : vector<8x128xf32>
    %cst_186 = arith.constant 5.000000e-01 : f32
    %614 = vector.broadcast %cst_186 : f32 to vector<8x128xf32>
    %615 = arith.mulf %614, %613 : vector<8x128xf32>
    %cst_187 = arith.constant 5.000000e-01 : f32
    %616 = vector.broadcast %cst_187 : f32 to vector<8x128xf32>
    %617 = arith.addf %615, %616 : vector<8x128xf32>
    %618 = vector.extract_strided_slice %609 {offsets = [0, 128], sizes = [8, 128], strides = [1, 1]} : vector<8x512xf32> to vector<8x128xf32>
    %cst_188 = arith.constant 5.000000e-01 : f32
    %619 = vector.broadcast %cst_188 : f32 to vector<8x128xf32>
    %620 = arith.mulf %619, %618 : vector<8x128xf32>
    %621 = math.tanh %620 : vector<8x128xf32>
    %cst_189 = arith.constant 5.000000e-01 : f32
    %622 = vector.broadcast %cst_189 : f32 to vector<8x128xf32>
    %623 = arith.mulf %622, %621 : vector<8x128xf32>
    %cst_190 = arith.constant 5.000000e-01 : f32
    %624 = vector.broadcast %cst_190 : f32 to vector<8x128xf32>
    %625 = arith.addf %623, %624 : vector<8x128xf32>
    %626 = vector.extract_strided_slice %609 {offsets = [0, 256], sizes = [8, 128], strides = [1, 1]} : vector<8x512xf32> to vector<8x128xf32>
    %627 = math.tanh %626 : vector<8x128xf32>
    %628 = vector.extract_strided_slice %609 {offsets = [0, 384], sizes = [8, 128], strides = [1, 1]} : vector<8x512xf32> to vector<8x128xf32>
    %cst_191 = arith.constant 5.000000e-01 : f32
    %629 = vector.broadcast %cst_191 : f32 to vector<8x128xf32>
    %630 = arith.mulf %629, %628 : vector<8x128xf32>
    %631 = math.tanh %630 : vector<8x128xf32>
    %cst_192 = arith.constant 5.000000e-01 : f32
    %632 = vector.broadcast %cst_192 : f32 to vector<8x128xf32>
    %633 = arith.mulf %632, %631 : vector<8x128xf32>
    %cst_193 = arith.constant 5.000000e-01 : f32
    %634 = vector.broadcast %cst_193 : f32 to vector<8x128xf32>
    %635 = arith.addf %633, %634 : vector<8x128xf32>
    %636 = arith.mulf %625, %564 : vector<8x128xf32>
    %637 = arith.mulf %617, %627 : vector<8x128xf32>
    %638 = arith.addf %636, %637 : vector<8x128xf32>
    %639 = math.tanh %638 : vector<8x128xf32>
    %640 = arith.mulf %635, %639 : vector<8x128xf32>
    %641 = vector.extract_strided_slice %605 {offsets = [8, 0], sizes = [8, 512], strides = [1, 1]} : vector<16x512xf32> to vector<8x512xf32>
    %642 = arith.truncf %601 : vector<8x128xf32> to vector<8x128xbf16>
    %cst_194 = arith.constant dense<0.000000e+00> : vector<8x512xf32>
    %643 = tpu.matmul %642, %3, %cst_194 {dimension_numbers = #tpu.dot_dimension_numbers<[1], [0], [0], [1], [0, 0, 1, 1], [], []>} : vector<8x128xbf16>, vector<128x512xbf16>, vector<8x512xf32> -> vector<8x512xf32>
    %644 = arith.addf %641, %643 : vector<8x512xf32>
    %645 = vector.extract_strided_slice %644 {offsets = [0, 0], sizes = [8, 128], strides = [1, 1]} : vector<8x512xf32> to vector<8x128xf32>
    %cst_195 = arith.constant 5.000000e-01 : f32
    %646 = vector.broadcast %cst_195 : f32 to vector<8x128xf32>
    %647 = arith.mulf %646, %645 : vector<8x128xf32>
    %648 = math.tanh %647 : vector<8x128xf32>
    %cst_196 = arith.constant 5.000000e-01 : f32
    %649 = vector.broadcast %cst_196 : f32 to vector<8x128xf32>
    %650 = arith.mulf %649, %648 : vector<8x128xf32>
    %cst_197 = arith.constant 5.000000e-01 : f32
    %651 = vector.broadcast %cst_197 : f32 to vector<8x128xf32>
    %652 = arith.addf %650, %651 : vector<8x128xf32>
    %653 = vector.extract_strided_slice %644 {offsets = [0, 128], sizes = [8, 128], strides = [1, 1]} : vector<8x512xf32> to vector<8x128xf32>
    %cst_198 = arith.constant 5.000000e-01 : f32
    %654 = vector.broadcast %cst_198 : f32 to vector<8x128xf32>
    %655 = arith.mulf %654, %653 : vector<8x128xf32>
    %656 = math.tanh %655 : vector<8x128xf32>
    %cst_199 = arith.constant 5.000000e-01 : f32
    %657 = vector.broadcast %cst_199 : f32 to vector<8x128xf32>
    %658 = arith.mulf %657, %656 : vector<8x128xf32>
    %cst_200 = arith.constant 5.000000e-01 : f32
    %659 = vector.broadcast %cst_200 : f32 to vector<8x128xf32>
    %660 = arith.addf %658, %659 : vector<8x128xf32>
    %661 = vector.extract_strided_slice %644 {offsets = [0, 256], sizes = [8, 128], strides = [1, 1]} : vector<8x512xf32> to vector<8x128xf32>
    %662 = math.tanh %661 : vector<8x128xf32>
    %663 = vector.extract_strided_slice %644 {offsets = [0, 384], sizes = [8, 128], strides = [1, 1]} : vector<8x512xf32> to vector<8x128xf32>
    %cst_201 = arith.constant 5.000000e-01 : f32
    %664 = vector.broadcast %cst_201 : f32 to vector<8x128xf32>
    %665 = arith.mulf %664, %663 : vector<8x128xf32>
    %666 = math.tanh %665 : vector<8x128xf32>
    %cst_202 = arith.constant 5.000000e-01 : f32
    %667 = vector.broadcast %cst_202 : f32 to vector<8x128xf32>
    %668 = arith.mulf %667, %666 : vector<8x128xf32>
    %cst_203 = arith.constant 5.000000e-01 : f32
    %669 = vector.broadcast %cst_203 : f32 to vector<8x128xf32>
    %670 = arith.addf %668, %669 : vector<8x128xf32>
    %671 = arith.mulf %660, %599 : vector<8x128xf32>
    %672 = arith.mulf %652, %662 : vector<8x128xf32>
    %673 = arith.addf %671, %672 : vector<8x128xf32>
    %674 = math.tanh %673 : vector<8x128xf32>
    %675 = arith.mulf %670, %674 : vector<8x128xf32>
    %c9_i32 = arith.constant 9 : i32
    %676 = arith.index_cast %c9_i32 : i32 to index
    %c0_204 = arith.constant 0 : index
    %c0_205 = arith.constant 0 : index
    %677 = vector.load %arg2[%676, %c0_204, %c0_205] : memref<16x16x512xbf16, #tpu.memory_space<vmem>>, vector<1x16x512xbf16>
    %678 = vector.shape_cast %677 : vector<1x16x512xbf16> to vector<16x512xbf16>
    %679 = arith.extf %678 : vector<16x512xbf16> to vector<16x512xf32>
    %680 = vector.extract_strided_slice %679 {offsets = [0, 0], sizes = [8, 512], strides = [1, 1]} : vector<16x512xf32> to vector<8x512xf32>
    %681 = arith.truncf %640 : vector<8x128xf32> to vector<8x128xbf16>
    %cst_206 = arith.constant dense<0.000000e+00> : vector<8x512xf32>
    %682 = tpu.matmul %681, %3, %cst_206 {dimension_numbers = #tpu.dot_dimension_numbers<[1], [0], [0], [1], [0, 0, 1, 1], [], []>} : vector<8x128xbf16>, vector<128x512xbf16>, vector<8x512xf32> -> vector<8x512xf32>
    %683 = arith.addf %680, %682 : vector<8x512xf32>
    %684 = vector.extract_strided_slice %683 {offsets = [0, 0], sizes = [8, 128], strides = [1, 1]} : vector<8x512xf32> to vector<8x128xf32>
    %cst_207 = arith.constant 5.000000e-01 : f32
    %685 = vector.broadcast %cst_207 : f32 to vector<8x128xf32>
    %686 = arith.mulf %685, %684 : vector<8x128xf32>
    %687 = math.tanh %686 : vector<8x128xf32>
    %cst_208 = arith.constant 5.000000e-01 : f32
    %688 = vector.broadcast %cst_208 : f32 to vector<8x128xf32>
    %689 = arith.mulf %688, %687 : vector<8x128xf32>
    %cst_209 = arith.constant 5.000000e-01 : f32
    %690 = vector.broadcast %cst_209 : f32 to vector<8x128xf32>
    %691 = arith.addf %689, %690 : vector<8x128xf32>
    %692 = vector.extract_strided_slice %683 {offsets = [0, 128], sizes = [8, 128], strides = [1, 1]} : vector<8x512xf32> to vector<8x128xf32>
    %cst_210 = arith.constant 5.000000e-01 : f32
    %693 = vector.broadcast %cst_210 : f32 to vector<8x128xf32>
    %694 = arith.mulf %693, %692 : vector<8x128xf32>
    %695 = math.tanh %694 : vector<8x128xf32>
    %cst_211 = arith.constant 5.000000e-01 : f32
    %696 = vector.broadcast %cst_211 : f32 to vector<8x128xf32>
    %697 = arith.mulf %696, %695 : vector<8x128xf32>
    %cst_212 = arith.constant 5.000000e-01 : f32
    %698 = vector.broadcast %cst_212 : f32 to vector<8x128xf32>
    %699 = arith.addf %697, %698 : vector<8x128xf32>
    %700 = vector.extract_strided_slice %683 {offsets = [0, 256], sizes = [8, 128], strides = [1, 1]} : vector<8x512xf32> to vector<8x128xf32>
    %701 = math.tanh %700 : vector<8x128xf32>
    %702 = vector.extract_strided_slice %683 {offsets = [0, 384], sizes = [8, 128], strides = [1, 1]} : vector<8x512xf32> to vector<8x128xf32>
    %cst_213 = arith.constant 5.000000e-01 : f32
    %703 = vector.broadcast %cst_213 : f32 to vector<8x128xf32>
    %704 = arith.mulf %703, %702 : vector<8x128xf32>
    %705 = math.tanh %704 : vector<8x128xf32>
    %cst_214 = arith.constant 5.000000e-01 : f32
    %706 = vector.broadcast %cst_214 : f32 to vector<8x128xf32>
    %707 = arith.mulf %706, %705 : vector<8x128xf32>
    %cst_215 = arith.constant 5.000000e-01 : f32
    %708 = vector.broadcast %cst_215 : f32 to vector<8x128xf32>
    %709 = arith.addf %707, %708 : vector<8x128xf32>
    %710 = arith.mulf %699, %638 : vector<8x128xf32>
    %711 = arith.mulf %691, %701 : vector<8x128xf32>
    %712 = arith.addf %710, %711 : vector<8x128xf32>
    %713 = math.tanh %712 : vector<8x128xf32>
    %714 = arith.mulf %709, %713 : vector<8x128xf32>
    %715 = vector.extract_strided_slice %679 {offsets = [8, 0], sizes = [8, 512], strides = [1, 1]} : vector<16x512xf32> to vector<8x512xf32>
    %716 = arith.truncf %675 : vector<8x128xf32> to vector<8x128xbf16>
    %cst_216 = arith.constant dense<0.000000e+00> : vector<8x512xf32>
    %717 = tpu.matmul %716, %3, %cst_216 {dimension_numbers = #tpu.dot_dimension_numbers<[1], [0], [0], [1], [0, 0, 1, 1], [], []>} : vector<8x128xbf16>, vector<128x512xbf16>, vector<8x512xf32> -> vector<8x512xf32>
    %718 = arith.addf %715, %717 : vector<8x512xf32>
    %719 = vector.extract_strided_slice %718 {offsets = [0, 0], sizes = [8, 128], strides = [1, 1]} : vector<8x512xf32> to vector<8x128xf32>
    %cst_217 = arith.constant 5.000000e-01 : f32
    %720 = vector.broadcast %cst_217 : f32 to vector<8x128xf32>
    %721 = arith.mulf %720, %719 : vector<8x128xf32>
    %722 = math.tanh %721 : vector<8x128xf32>
    %cst_218 = arith.constant 5.000000e-01 : f32
    %723 = vector.broadcast %cst_218 : f32 to vector<8x128xf32>
    %724 = arith.mulf %723, %722 : vector<8x128xf32>
    %cst_219 = arith.constant 5.000000e-01 : f32
    %725 = vector.broadcast %cst_219 : f32 to vector<8x128xf32>
    %726 = arith.addf %724, %725 : vector<8x128xf32>
    %727 = vector.extract_strided_slice %718 {offsets = [0, 128], sizes = [8, 128], strides = [1, 1]} : vector<8x512xf32> to vector<8x128xf32>
    %cst_220 = arith.constant 5.000000e-01 : f32
    %728 = vector.broadcast %cst_220 : f32 to vector<8x128xf32>
    %729 = arith.mulf %728, %727 : vector<8x128xf32>
    %730 = math.tanh %729 : vector<8x128xf32>
    %cst_221 = arith.constant 5.000000e-01 : f32
    %731 = vector.broadcast %cst_221 : f32 to vector<8x128xf32>
    %732 = arith.mulf %731, %730 : vector<8x128xf32>
    %cst_222 = arith.constant 5.000000e-01 : f32
    %733 = vector.broadcast %cst_222 : f32 to vector<8x128xf32>
    %734 = arith.addf %732, %733 : vector<8x128xf32>
    %735 = vector.extract_strided_slice %718 {offsets = [0, 256], sizes = [8, 128], strides = [1, 1]} : vector<8x512xf32> to vector<8x128xf32>
    %736 = math.tanh %735 : vector<8x128xf32>
    %737 = vector.extract_strided_slice %718 {offsets = [0, 384], sizes = [8, 128], strides = [1, 1]} : vector<8x512xf32> to vector<8x128xf32>
    %cst_223 = arith.constant 5.000000e-01 : f32
    %738 = vector.broadcast %cst_223 : f32 to vector<8x128xf32>
    %739 = arith.mulf %738, %737 : vector<8x128xf32>
    %740 = math.tanh %739 : vector<8x128xf32>
    %cst_224 = arith.constant 5.000000e-01 : f32
    %741 = vector.broadcast %cst_224 : f32 to vector<8x128xf32>
    %742 = arith.mulf %741, %740 : vector<8x128xf32>
    %cst_225 = arith.constant 5.000000e-01 : f32
    %743 = vector.broadcast %cst_225 : f32 to vector<8x128xf32>
    %744 = arith.addf %742, %743 : vector<8x128xf32>
    %745 = arith.mulf %734, %673 : vector<8x128xf32>
    %746 = arith.mulf %726, %736 : vector<8x128xf32>
    %747 = arith.addf %745, %746 : vector<8x128xf32>
    %748 = math.tanh %747 : vector<8x128xf32>
    %749 = arith.mulf %744, %748 : vector<8x128xf32>
    %c10_i32 = arith.constant 10 : i32
    %750 = arith.index_cast %c10_i32 : i32 to index
    %c0_226 = arith.constant 0 : index
    %c0_227 = arith.constant 0 : index
    %751 = vector.load %arg2[%750, %c0_226, %c0_227] : memref<16x16x512xbf16, #tpu.memory_space<vmem>>, vector<1x16x512xbf16>
    %752 = vector.shape_cast %751 : vector<1x16x512xbf16> to vector<16x512xbf16>
    %753 = arith.extf %752 : vector<16x512xbf16> to vector<16x512xf32>
    %754 = vector.extract_strided_slice %753 {offsets = [0, 0], sizes = [8, 512], strides = [1, 1]} : vector<16x512xf32> to vector<8x512xf32>
    %755 = arith.truncf %714 : vector<8x128xf32> to vector<8x128xbf16>
    %cst_228 = arith.constant dense<0.000000e+00> : vector<8x512xf32>
    %756 = tpu.matmul %755, %3, %cst_228 {dimension_numbers = #tpu.dot_dimension_numbers<[1], [0], [0], [1], [0, 0, 1, 1], [], []>} : vector<8x128xbf16>, vector<128x512xbf16>, vector<8x512xf32> -> vector<8x512xf32>
    %757 = arith.addf %754, %756 : vector<8x512xf32>
    %758 = vector.extract_strided_slice %757 {offsets = [0, 0], sizes = [8, 128], strides = [1, 1]} : vector<8x512xf32> to vector<8x128xf32>
    %cst_229 = arith.constant 5.000000e-01 : f32
    %759 = vector.broadcast %cst_229 : f32 to vector<8x128xf32>
    %760 = arith.mulf %759, %758 : vector<8x128xf32>
    %761 = math.tanh %760 : vector<8x128xf32>
    %cst_230 = arith.constant 5.000000e-01 : f32
    %762 = vector.broadcast %cst_230 : f32 to vector<8x128xf32>
    %763 = arith.mulf %762, %761 : vector<8x128xf32>
    %cst_231 = arith.constant 5.000000e-01 : f32
    %764 = vector.broadcast %cst_231 : f32 to vector<8x128xf32>
    %765 = arith.addf %763, %764 : vector<8x128xf32>
    %766 = vector.extract_strided_slice %757 {offsets = [0, 128], sizes = [8, 128], strides = [1, 1]} : vector<8x512xf32> to vector<8x128xf32>
    %cst_232 = arith.constant 5.000000e-01 : f32
    %767 = vector.broadcast %cst_232 : f32 to vector<8x128xf32>
    %768 = arith.mulf %767, %766 : vector<8x128xf32>
    %769 = math.tanh %768 : vector<8x128xf32>
    %cst_233 = arith.constant 5.000000e-01 : f32
    %770 = vector.broadcast %cst_233 : f32 to vector<8x128xf32>
    %771 = arith.mulf %770, %769 : vector<8x128xf32>
    %cst_234 = arith.constant 5.000000e-01 : f32
    %772 = vector.broadcast %cst_234 : f32 to vector<8x128xf32>
    %773 = arith.addf %771, %772 : vector<8x128xf32>
    %774 = vector.extract_strided_slice %757 {offsets = [0, 256], sizes = [8, 128], strides = [1, 1]} : vector<8x512xf32> to vector<8x128xf32>
    %775 = math.tanh %774 : vector<8x128xf32>
    %776 = vector.extract_strided_slice %757 {offsets = [0, 384], sizes = [8, 128], strides = [1, 1]} : vector<8x512xf32> to vector<8x128xf32>
    %cst_235 = arith.constant 5.000000e-01 : f32
    %777 = vector.broadcast %cst_235 : f32 to vector<8x128xf32>
    %778 = arith.mulf %777, %776 : vector<8x128xf32>
    %779 = math.tanh %778 : vector<8x128xf32>
    %cst_236 = arith.constant 5.000000e-01 : f32
    %780 = vector.broadcast %cst_236 : f32 to vector<8x128xf32>
    %781 = arith.mulf %780, %779 : vector<8x128xf32>
    %cst_237 = arith.constant 5.000000e-01 : f32
    %782 = vector.broadcast %cst_237 : f32 to vector<8x128xf32>
    %783 = arith.addf %781, %782 : vector<8x128xf32>
    %784 = arith.mulf %773, %712 : vector<8x128xf32>
    %785 = arith.mulf %765, %775 : vector<8x128xf32>
    %786 = arith.addf %784, %785 : vector<8x128xf32>
    %787 = math.tanh %786 : vector<8x128xf32>
    %788 = arith.mulf %783, %787 : vector<8x128xf32>
    %789 = vector.extract_strided_slice %753 {offsets = [8, 0], sizes = [8, 512], strides = [1, 1]} : vector<16x512xf32> to vector<8x512xf32>
    %790 = arith.truncf %749 : vector<8x128xf32> to vector<8x128xbf16>
    %cst_238 = arith.constant dense<0.000000e+00> : vector<8x512xf32>
    %791 = tpu.matmul %790, %3, %cst_238 {dimension_numbers = #tpu.dot_dimension_numbers<[1], [0], [0], [1], [0, 0, 1, 1], [], []>} : vector<8x128xbf16>, vector<128x512xbf16>, vector<8x512xf32> -> vector<8x512xf32>
    %792 = arith.addf %789, %791 : vector<8x512xf32>
    %793 = vector.extract_strided_slice %792 {offsets = [0, 0], sizes = [8, 128], strides = [1, 1]} : vector<8x512xf32> to vector<8x128xf32>
    %cst_239 = arith.constant 5.000000e-01 : f32
    %794 = vector.broadcast %cst_239 : f32 to vector<8x128xf32>
    %795 = arith.mulf %794, %793 : vector<8x128xf32>
    %796 = math.tanh %795 : vector<8x128xf32>
    %cst_240 = arith.constant 5.000000e-01 : f32
    %797 = vector.broadcast %cst_240 : f32 to vector<8x128xf32>
    %798 = arith.mulf %797, %796 : vector<8x128xf32>
    %cst_241 = arith.constant 5.000000e-01 : f32
    %799 = vector.broadcast %cst_241 : f32 to vector<8x128xf32>
    %800 = arith.addf %798, %799 : vector<8x128xf32>
    %801 = vector.extract_strided_slice %792 {offsets = [0, 128], sizes = [8, 128], strides = [1, 1]} : vector<8x512xf32> to vector<8x128xf32>
    %cst_242 = arith.constant 5.000000e-01 : f32
    %802 = vector.broadcast %cst_242 : f32 to vector<8x128xf32>
    %803 = arith.mulf %802, %801 : vector<8x128xf32>
    %804 = math.tanh %803 : vector<8x128xf32>
    %cst_243 = arith.constant 5.000000e-01 : f32
    %805 = vector.broadcast %cst_243 : f32 to vector<8x128xf32>
    %806 = arith.mulf %805, %804 : vector<8x128xf32>
    %cst_244 = arith.constant 5.000000e-01 : f32
    %807 = vector.broadcast %cst_244 : f32 to vector<8x128xf32>
    %808 = arith.addf %806, %807 : vector<8x128xf32>
    %809 = vector.extract_strided_slice %792 {offsets = [0, 256], sizes = [8, 128], strides = [1, 1]} : vector<8x512xf32> to vector<8x128xf32>
    %810 = math.tanh %809 : vector<8x128xf32>
    %811 = vector.extract_strided_slice %792 {offsets = [0, 384], sizes = [8, 128], strides = [1, 1]} : vector<8x512xf32> to vector<8x128xf32>
    %cst_245 = arith.constant 5.000000e-01 : f32
    %812 = vector.broadcast %cst_245 : f32 to vector<8x128xf32>
    %813 = arith.mulf %812, %811 : vector<8x128xf32>
    %814 = math.tanh %813 : vector<8x128xf32>
    %cst_246 = arith.constant 5.000000e-01 : f32
    %815 = vector.broadcast %cst_246 : f32 to vector<8x128xf32>
    %816 = arith.mulf %815, %814 : vector<8x128xf32>
    %cst_247 = arith.constant 5.000000e-01 : f32
    %817 = vector.broadcast %cst_247 : f32 to vector<8x128xf32>
    %818 = arith.addf %816, %817 : vector<8x128xf32>
    %819 = arith.mulf %808, %747 : vector<8x128xf32>
    %820 = arith.mulf %800, %810 : vector<8x128xf32>
    %821 = arith.addf %819, %820 : vector<8x128xf32>
    %822 = math.tanh %821 : vector<8x128xf32>
    %823 = arith.mulf %818, %822 : vector<8x128xf32>
    %c11_i32 = arith.constant 11 : i32
    %824 = arith.index_cast %c11_i32 : i32 to index
    %c0_248 = arith.constant 0 : index
    %c0_249 = arith.constant 0 : index
    %825 = vector.load %arg2[%824, %c0_248, %c0_249] : memref<16x16x512xbf16, #tpu.memory_space<vmem>>, vector<1x16x512xbf16>
    %826 = vector.shape_cast %825 : vector<1x16x512xbf16> to vector<16x512xbf16>
    %827 = arith.extf %826 : vector<16x512xbf16> to vector<16x512xf32>
    %828 = vector.extract_strided_slice %827 {offsets = [0, 0], sizes = [8, 512], strides = [1, 1]} : vector<16x512xf32> to vector<8x512xf32>
    %829 = arith.truncf %788 : vector<8x128xf32> to vector<8x128xbf16>
    %cst_250 = arith.constant dense<0.000000e+00> : vector<8x512xf32>
    %830 = tpu.matmul %829, %3, %cst_250 {dimension_numbers = #tpu.dot_dimension_numbers<[1], [0], [0], [1], [0, 0, 1, 1], [], []>} : vector<8x128xbf16>, vector<128x512xbf16>, vector<8x512xf32> -> vector<8x512xf32>
    %831 = arith.addf %828, %830 : vector<8x512xf32>
    %832 = vector.extract_strided_slice %831 {offsets = [0, 0], sizes = [8, 128], strides = [1, 1]} : vector<8x512xf32> to vector<8x128xf32>
    %cst_251 = arith.constant 5.000000e-01 : f32
    %833 = vector.broadcast %cst_251 : f32 to vector<8x128xf32>
    %834 = arith.mulf %833, %832 : vector<8x128xf32>
    %835 = math.tanh %834 : vector<8x128xf32>
    %cst_252 = arith.constant 5.000000e-01 : f32
    %836 = vector.broadcast %cst_252 : f32 to vector<8x128xf32>
    %837 = arith.mulf %836, %835 : vector<8x128xf32>
    %cst_253 = arith.constant 5.000000e-01 : f32
    %838 = vector.broadcast %cst_253 : f32 to vector<8x128xf32>
    %839 = arith.addf %837, %838 : vector<8x128xf32>
    %840 = vector.extract_strided_slice %831 {offsets = [0, 128], sizes = [8, 128], strides = [1, 1]} : vector<8x512xf32> to vector<8x128xf32>
    %cst_254 = arith.constant 5.000000e-01 : f32
    %841 = vector.broadcast %cst_254 : f32 to vector<8x128xf32>
    %842 = arith.mulf %841, %840 : vector<8x128xf32>
    %843 = math.tanh %842 : vector<8x128xf32>
    %cst_255 = arith.constant 5.000000e-01 : f32
    %844 = vector.broadcast %cst_255 : f32 to vector<8x128xf32>
    %845 = arith.mulf %844, %843 : vector<8x128xf32>
    %cst_256 = arith.constant 5.000000e-01 : f32
    %846 = vector.broadcast %cst_256 : f32 to vector<8x128xf32>
    %847 = arith.addf %845, %846 : vector<8x128xf32>
    %848 = vector.extract_strided_slice %831 {offsets = [0, 256], sizes = [8, 128], strides = [1, 1]} : vector<8x512xf32> to vector<8x128xf32>
    %849 = math.tanh %848 : vector<8x128xf32>
    %850 = vector.extract_strided_slice %831 {offsets = [0, 384], sizes = [8, 128], strides = [1, 1]} : vector<8x512xf32> to vector<8x128xf32>
    %cst_257 = arith.constant 5.000000e-01 : f32
    %851 = vector.broadcast %cst_257 : f32 to vector<8x128xf32>
    %852 = arith.mulf %851, %850 : vector<8x128xf32>
    %853 = math.tanh %852 : vector<8x128xf32>
    %cst_258 = arith.constant 5.000000e-01 : f32
    %854 = vector.broadcast %cst_258 : f32 to vector<8x128xf32>
    %855 = arith.mulf %854, %853 : vector<8x128xf32>
    %cst_259 = arith.constant 5.000000e-01 : f32
    %856 = vector.broadcast %cst_259 : f32 to vector<8x128xf32>
    %857 = arith.addf %855, %856 : vector<8x128xf32>
    %858 = arith.mulf %847, %786 : vector<8x128xf32>
    %859 = arith.mulf %839, %849 : vector<8x128xf32>
    %860 = arith.addf %858, %859 : vector<8x128xf32>
    %861 = math.tanh %860 : vector<8x128xf32>
    %862 = arith.mulf %857, %861 : vector<8x128xf32>
    %863 = vector.extract_strided_slice %827 {offsets = [8, 0], sizes = [8, 512], strides = [1, 1]} : vector<16x512xf32> to vector<8x512xf32>
    %864 = arith.truncf %823 : vector<8x128xf32> to vector<8x128xbf16>
    %cst_260 = arith.constant dense<0.000000e+00> : vector<8x512xf32>
    %865 = tpu.matmul %864, %3, %cst_260 {dimension_numbers = #tpu.dot_dimension_numbers<[1], [0], [0], [1], [0, 0, 1, 1], [], []>} : vector<8x128xbf16>, vector<128x512xbf16>, vector<8x512xf32> -> vector<8x512xf32>
    %866 = arith.addf %863, %865 : vector<8x512xf32>
    %867 = vector.extract_strided_slice %866 {offsets = [0, 0], sizes = [8, 128], strides = [1, 1]} : vector<8x512xf32> to vector<8x128xf32>
    %cst_261 = arith.constant 5.000000e-01 : f32
    %868 = vector.broadcast %cst_261 : f32 to vector<8x128xf32>
    %869 = arith.mulf %868, %867 : vector<8x128xf32>
    %870 = math.tanh %869 : vector<8x128xf32>
    %cst_262 = arith.constant 5.000000e-01 : f32
    %871 = vector.broadcast %cst_262 : f32 to vector<8x128xf32>
    %872 = arith.mulf %871, %870 : vector<8x128xf32>
    %cst_263 = arith.constant 5.000000e-01 : f32
    %873 = vector.broadcast %cst_263 : f32 to vector<8x128xf32>
    %874 = arith.addf %872, %873 : vector<8x128xf32>
    %875 = vector.extract_strided_slice %866 {offsets = [0, 128], sizes = [8, 128], strides = [1, 1]} : vector<8x512xf32> to vector<8x128xf32>
    %cst_264 = arith.constant 5.000000e-01 : f32
    %876 = vector.broadcast %cst_264 : f32 to vector<8x128xf32>
    %877 = arith.mulf %876, %875 : vector<8x128xf32>
    %878 = math.tanh %877 : vector<8x128xf32>
    %cst_265 = arith.constant 5.000000e-01 : f32
    %879 = vector.broadcast %cst_265 : f32 to vector<8x128xf32>
    %880 = arith.mulf %879, %878 : vector<8x128xf32>
    %cst_266 = arith.constant 5.000000e-01 : f32
    %881 = vector.broadcast %cst_266 : f32 to vector<8x128xf32>
    %882 = arith.addf %880, %881 : vector<8x128xf32>
    %883 = vector.extract_strided_slice %866 {offsets = [0, 256], sizes = [8, 128], strides = [1, 1]} : vector<8x512xf32> to vector<8x128xf32>
    %884 = math.tanh %883 : vector<8x128xf32>
    %885 = vector.extract_strided_slice %866 {offsets = [0, 384], sizes = [8, 128], strides = [1, 1]} : vector<8x512xf32> to vector<8x128xf32>
    %cst_267 = arith.constant 5.000000e-01 : f32
    %886 = vector.broadcast %cst_267 : f32 to vector<8x128xf32>
    %887 = arith.mulf %886, %885 : vector<8x128xf32>
    %888 = math.tanh %887 : vector<8x128xf32>
    %cst_268 = arith.constant 5.000000e-01 : f32
    %889 = vector.broadcast %cst_268 : f32 to vector<8x128xf32>
    %890 = arith.mulf %889, %888 : vector<8x128xf32>
    %cst_269 = arith.constant 5.000000e-01 : f32
    %891 = vector.broadcast %cst_269 : f32 to vector<8x128xf32>
    %892 = arith.addf %890, %891 : vector<8x128xf32>
    %893 = arith.mulf %882, %821 : vector<8x128xf32>
    %894 = arith.mulf %874, %884 : vector<8x128xf32>
    %895 = arith.addf %893, %894 : vector<8x128xf32>
    %896 = math.tanh %895 : vector<8x128xf32>
    %897 = arith.mulf %892, %896 : vector<8x128xf32>
    %c12_i32 = arith.constant 12 : i32
    %898 = arith.index_cast %c12_i32 : i32 to index
    %c0_270 = arith.constant 0 : index
    %c0_271 = arith.constant 0 : index
    %899 = vector.load %arg2[%898, %c0_270, %c0_271] : memref<16x16x512xbf16, #tpu.memory_space<vmem>>, vector<1x16x512xbf16>
    %900 = vector.shape_cast %899 : vector<1x16x512xbf16> to vector<16x512xbf16>
    %901 = arith.extf %900 : vector<16x512xbf16> to vector<16x512xf32>
    %902 = vector.extract_strided_slice %901 {offsets = [0, 0], sizes = [8, 512], strides = [1, 1]} : vector<16x512xf32> to vector<8x512xf32>
    %903 = arith.truncf %862 : vector<8x128xf32> to vector<8x128xbf16>
    %cst_272 = arith.constant dense<0.000000e+00> : vector<8x512xf32>
    %904 = tpu.matmul %903, %3, %cst_272 {dimension_numbers = #tpu.dot_dimension_numbers<[1], [0], [0], [1], [0, 0, 1, 1], [], []>} : vector<8x128xbf16>, vector<128x512xbf16>, vector<8x512xf32> -> vector<8x512xf32>
    %905 = arith.addf %902, %904 : vector<8x512xf32>
    %906 = vector.extract_strided_slice %905 {offsets = [0, 0], sizes = [8, 128], strides = [1, 1]} : vector<8x512xf32> to vector<8x128xf32>
    %cst_273 = arith.constant 5.000000e-01 : f32
    %907 = vector.broadcast %cst_273 : f32 to vector<8x128xf32>
    %908 = arith.mulf %907, %906 : vector<8x128xf32>
    %909 = math.tanh %908 : vector<8x128xf32>
    %cst_274 = arith.constant 5.000000e-01 : f32
    %910 = vector.broadcast %cst_274 : f32 to vector<8x128xf32>
    %911 = arith.mulf %910, %909 : vector<8x128xf32>
    %cst_275 = arith.constant 5.000000e-01 : f32
    %912 = vector.broadcast %cst_275 : f32 to vector<8x128xf32>
    %913 = arith.addf %911, %912 : vector<8x128xf32>
    %914 = vector.extract_strided_slice %905 {offsets = [0, 128], sizes = [8, 128], strides = [1, 1]} : vector<8x512xf32> to vector<8x128xf32>
    %cst_276 = arith.constant 5.000000e-01 : f32
    %915 = vector.broadcast %cst_276 : f32 to vector<8x128xf32>
    %916 = arith.mulf %915, %914 : vector<8x128xf32>
    %917 = math.tanh %916 : vector<8x128xf32>
    %cst_277 = arith.constant 5.000000e-01 : f32
    %918 = vector.broadcast %cst_277 : f32 to vector<8x128xf32>
    %919 = arith.mulf %918, %917 : vector<8x128xf32>
    %cst_278 = arith.constant 5.000000e-01 : f32
    %920 = vector.broadcast %cst_278 : f32 to vector<8x128xf32>
    %921 = arith.addf %919, %920 : vector<8x128xf32>
    %922 = vector.extract_strided_slice %905 {offsets = [0, 256], sizes = [8, 128], strides = [1, 1]} : vector<8x512xf32> to vector<8x128xf32>
    %923 = math.tanh %922 : vector<8x128xf32>
    %924 = vector.extract_strided_slice %905 {offsets = [0, 384], sizes = [8, 128], strides = [1, 1]} : vector<8x512xf32> to vector<8x128xf32>
    %cst_279 = arith.constant 5.000000e-01 : f32
    %925 = vector.broadcast %cst_279 : f32 to vector<8x128xf32>
    %926 = arith.mulf %925, %924 : vector<8x128xf32>
    %927 = math.tanh %926 : vector<8x128xf32>
    %cst_280 = arith.constant 5.000000e-01 : f32
    %928 = vector.broadcast %cst_280 : f32 to vector<8x128xf32>
    %929 = arith.mulf %928, %927 : vector<8x128xf32>
    %cst_281 = arith.constant 5.000000e-01 : f32
    %930 = vector.broadcast %cst_281 : f32 to vector<8x128xf32>
    %931 = arith.addf %929, %930 : vector<8x128xf32>
    %932 = arith.mulf %921, %860 : vector<8x128xf32>
    %933 = arith.mulf %913, %923 : vector<8x128xf32>
    %934 = arith.addf %932, %933 : vector<8x128xf32>
    %935 = math.tanh %934 : vector<8x128xf32>
    %936 = arith.mulf %931, %935 : vector<8x128xf32>
    %937 = vector.extract_strided_slice %901 {offsets = [8, 0], sizes = [8, 512], strides = [1, 1]} : vector<16x512xf32> to vector<8x512xf32>
    %938 = arith.truncf %897 : vector<8x128xf32> to vector<8x128xbf16>
    %cst_282 = arith.constant dense<0.000000e+00> : vector<8x512xf32>
    %939 = tpu.matmul %938, %3, %cst_282 {dimension_numbers = #tpu.dot_dimension_numbers<[1], [0], [0], [1], [0, 0, 1, 1], [], []>} : vector<8x128xbf16>, vector<128x512xbf16>, vector<8x512xf32> -> vector<8x512xf32>
    %940 = arith.addf %937, %939 : vector<8x512xf32>
    %941 = vector.extract_strided_slice %940 {offsets = [0, 0], sizes = [8, 128], strides = [1, 1]} : vector<8x512xf32> to vector<8x128xf32>
    %cst_283 = arith.constant 5.000000e-01 : f32
    %942 = vector.broadcast %cst_283 : f32 to vector<8x128xf32>
    %943 = arith.mulf %942, %941 : vector<8x128xf32>
    %944 = math.tanh %943 : vector<8x128xf32>
    %cst_284 = arith.constant 5.000000e-01 : f32
    %945 = vector.broadcast %cst_284 : f32 to vector<8x128xf32>
    %946 = arith.mulf %945, %944 : vector<8x128xf32>
    %cst_285 = arith.constant 5.000000e-01 : f32
    %947 = vector.broadcast %cst_285 : f32 to vector<8x128xf32>
    %948 = arith.addf %946, %947 : vector<8x128xf32>
    %949 = vector.extract_strided_slice %940 {offsets = [0, 128], sizes = [8, 128], strides = [1, 1]} : vector<8x512xf32> to vector<8x128xf32>
    %cst_286 = arith.constant 5.000000e-01 : f32
    %950 = vector.broadcast %cst_286 : f32 to vector<8x128xf32>
    %951 = arith.mulf %950, %949 : vector<8x128xf32>
    %952 = math.tanh %951 : vector<8x128xf32>
    %cst_287 = arith.constant 5.000000e-01 : f32
    %953 = vector.broadcast %cst_287 : f32 to vector<8x128xf32>
    %954 = arith.mulf %953, %952 : vector<8x128xf32>
    %cst_288 = arith.constant 5.000000e-01 : f32
    %955 = vector.broadcast %cst_288 : f32 to vector<8x128xf32>
    %956 = arith.addf %954, %955 : vector<8x128xf32>
    %957 = vector.extract_strided_slice %940 {offsets = [0, 256], sizes = [8, 128], strides = [1, 1]} : vector<8x512xf32> to vector<8x128xf32>
    %958 = math.tanh %957 : vector<8x128xf32>
    %959 = vector.extract_strided_slice %940 {offsets = [0, 384], sizes = [8, 128], strides = [1, 1]} : vector<8x512xf32> to vector<8x128xf32>
    %cst_289 = arith.constant 5.000000e-01 : f32
    %960 = vector.broadcast %cst_289 : f32 to vector<8x128xf32>
    %961 = arith.mulf %960, %959 : vector<8x128xf32>
    %962 = math.tanh %961 : vector<8x128xf32>
    %cst_290 = arith.constant 5.000000e-01 : f32
    %963 = vector.broadcast %cst_290 : f32 to vector<8x128xf32>
    %964 = arith.mulf %963, %962 : vector<8x128xf32>
    %cst_291 = arith.constant 5.000000e-01 : f32
    %965 = vector.broadcast %cst_291 : f32 to vector<8x128xf32>
    %966 = arith.addf %964, %965 : vector<8x128xf32>
    %967 = arith.mulf %956, %895 : vector<8x128xf32>
    %968 = arith.mulf %948, %958 : vector<8x128xf32>
    %969 = arith.addf %967, %968 : vector<8x128xf32>
    %970 = math.tanh %969 : vector<8x128xf32>
    %971 = arith.mulf %966, %970 : vector<8x128xf32>
    %c13_i32 = arith.constant 13 : i32
    %972 = arith.index_cast %c13_i32 : i32 to index
    %c0_292 = arith.constant 0 : index
    %c0_293 = arith.constant 0 : index
    %973 = vector.load %arg2[%972, %c0_292, %c0_293] : memref<16x16x512xbf16, #tpu.memory_space<vmem>>, vector<1x16x512xbf16>
    %974 = vector.shape_cast %973 : vector<1x16x512xbf16> to vector<16x512xbf16>
    %975 = arith.extf %974 : vector<16x512xbf16> to vector<16x512xf32>
    %976 = vector.extract_strided_slice %975 {offsets = [0, 0], sizes = [8, 512], strides = [1, 1]} : vector<16x512xf32> to vector<8x512xf32>
    %977 = arith.truncf %936 : vector<8x128xf32> to vector<8x128xbf16>
    %cst_294 = arith.constant dense<0.000000e+00> : vector<8x512xf32>
    %978 = tpu.matmul %977, %3, %cst_294 {dimension_numbers = #tpu.dot_dimension_numbers<[1], [0], [0], [1], [0, 0, 1, 1], [], []>} : vector<8x128xbf16>, vector<128x512xbf16>, vector<8x512xf32> -> vector<8x512xf32>
    %979 = arith.addf %976, %978 : vector<8x512xf32>
    %980 = vector.extract_strided_slice %979 {offsets = [0, 0], sizes = [8, 128], strides = [1, 1]} : vector<8x512xf32> to vector<8x128xf32>
    %cst_295 = arith.constant 5.000000e-01 : f32
    %981 = vector.broadcast %cst_295 : f32 to vector<8x128xf32>
    %982 = arith.mulf %981, %980 : vector<8x128xf32>
    %983 = math.tanh %982 : vector<8x128xf32>
    %cst_296 = arith.constant 5.000000e-01 : f32
    %984 = vector.broadcast %cst_296 : f32 to vector<8x128xf32>
    %985 = arith.mulf %984, %983 : vector<8x128xf32>
    %cst_297 = arith.constant 5.000000e-01 : f32
    %986 = vector.broadcast %cst_297 : f32 to vector<8x128xf32>
    %987 = arith.addf %985, %986 : vector<8x128xf32>
    %988 = vector.extract_strided_slice %979 {offsets = [0, 128], sizes = [8, 128], strides = [1, 1]} : vector<8x512xf32> to vector<8x128xf32>
    %cst_298 = arith.constant 5.000000e-01 : f32
    %989 = vector.broadcast %cst_298 : f32 to vector<8x128xf32>
    %990 = arith.mulf %989, %988 : vector<8x128xf32>
    %991 = math.tanh %990 : vector<8x128xf32>
    %cst_299 = arith.constant 5.000000e-01 : f32
    %992 = vector.broadcast %cst_299 : f32 to vector<8x128xf32>
    %993 = arith.mulf %992, %991 : vector<8x128xf32>
    %cst_300 = arith.constant 5.000000e-01 : f32
    %994 = vector.broadcast %cst_300 : f32 to vector<8x128xf32>
    %995 = arith.addf %993, %994 : vector<8x128xf32>
    %996 = vector.extract_strided_slice %979 {offsets = [0, 256], sizes = [8, 128], strides = [1, 1]} : vector<8x512xf32> to vector<8x128xf32>
    %997 = math.tanh %996 : vector<8x128xf32>
    %998 = vector.extract_strided_slice %979 {offsets = [0, 384], sizes = [8, 128], strides = [1, 1]} : vector<8x512xf32> to vector<8x128xf32>
    %cst_301 = arith.constant 5.000000e-01 : f32
    %999 = vector.broadcast %cst_301 : f32 to vector<8x128xf32>
    %1000 = arith.mulf %999, %998 : vector<8x128xf32>
    %1001 = math.tanh %1000 : vector<8x128xf32>
    %cst_302 = arith.constant 5.000000e-01 : f32
    %1002 = vector.broadcast %cst_302 : f32 to vector<8x128xf32>
    %1003 = arith.mulf %1002, %1001 : vector<8x128xf32>
    %cst_303 = arith.constant 5.000000e-01 : f32
    %1004 = vector.broadcast %cst_303 : f32 to vector<8x128xf32>
    %1005 = arith.addf %1003, %1004 : vector<8x128xf32>
    %1006 = arith.mulf %995, %934 : vector<8x128xf32>
    %1007 = arith.mulf %987, %997 : vector<8x128xf32>
    %1008 = arith.addf %1006, %1007 : vector<8x128xf32>
    %1009 = math.tanh %1008 : vector<8x128xf32>
    %1010 = arith.mulf %1005, %1009 : vector<8x128xf32>
    %1011 = vector.extract_strided_slice %975 {offsets = [8, 0], sizes = [8, 512], strides = [1, 1]} : vector<16x512xf32> to vector<8x512xf32>
    %1012 = arith.truncf %971 : vector<8x128xf32> to vector<8x128xbf16>
    %cst_304 = arith.constant dense<0.000000e+00> : vector<8x512xf32>
    %1013 = tpu.matmul %1012, %3, %cst_304 {dimension_numbers = #tpu.dot_dimension_numbers<[1], [0], [0], [1], [0, 0, 1, 1], [], []>} : vector<8x128xbf16>, vector<128x512xbf16>, vector<8x512xf32> -> vector<8x512xf32>
    %1014 = arith.addf %1011, %1013 : vector<8x512xf32>
    %1015 = vector.extract_strided_slice %1014 {offsets = [0, 0], sizes = [8, 128], strides = [1, 1]} : vector<8x512xf32> to vector<8x128xf32>
    %cst_305 = arith.constant 5.000000e-01 : f32
    %1016 = vector.broadcast %cst_305 : f32 to vector<8x128xf32>
    %1017 = arith.mulf %1016, %1015 : vector<8x128xf32>
    %1018 = math.tanh %1017 : vector<8x128xf32>
    %cst_306 = arith.constant 5.000000e-01 : f32
    %1019 = vector.broadcast %cst_306 : f32 to vector<8x128xf32>
    %1020 = arith.mulf %1019, %1018 : vector<8x128xf32>
    %cst_307 = arith.constant 5.000000e-01 : f32
    %1021 = vector.broadcast %cst_307 : f32 to vector<8x128xf32>
    %1022 = arith.addf %1020, %1021 : vector<8x128xf32>
    %1023 = vector.extract_strided_slice %1014 {offsets = [0, 128], sizes = [8, 128], strides = [1, 1]} : vector<8x512xf32> to vector<8x128xf32>
    %cst_308 = arith.constant 5.000000e-01 : f32
    %1024 = vector.broadcast %cst_308 : f32 to vector<8x128xf32>
    %1025 = arith.mulf %1024, %1023 : vector<8x128xf32>
    %1026 = math.tanh %1025 : vector<8x128xf32>
    %cst_309 = arith.constant 5.000000e-01 : f32
    %1027 = vector.broadcast %cst_309 : f32 to vector<8x128xf32>
    %1028 = arith.mulf %1027, %1026 : vector<8x128xf32>
    %cst_310 = arith.constant 5.000000e-01 : f32
    %1029 = vector.broadcast %cst_310 : f32 to vector<8x128xf32>
    %1030 = arith.addf %1028, %1029 : vector<8x128xf32>
    %1031 = vector.extract_strided_slice %1014 {offsets = [0, 256], sizes = [8, 128], strides = [1, 1]} : vector<8x512xf32> to vector<8x128xf32>
    %1032 = math.tanh %1031 : vector<8x128xf32>
    %1033 = vector.extract_strided_slice %1014 {offsets = [0, 384], sizes = [8, 128], strides = [1, 1]} : vector<8x512xf32> to vector<8x128xf32>
    %cst_311 = arith.constant 5.000000e-01 : f32
    %1034 = vector.broadcast %cst_311 : f32 to vector<8x128xf32>
    %1035 = arith.mulf %1034, %1033 : vector<8x128xf32>
    %1036 = math.tanh %1035 : vector<8x128xf32>
    %cst_312 = arith.constant 5.000000e-01 : f32
    %1037 = vector.broadcast %cst_312 : f32 to vector<8x128xf32>
    %1038 = arith.mulf %1037, %1036 : vector<8x128xf32>
    %cst_313 = arith.constant 5.000000e-01 : f32
    %1039 = vector.broadcast %cst_313 : f32 to vector<8x128xf32>
    %1040 = arith.addf %1038, %1039 : vector<8x128xf32>
    %1041 = arith.mulf %1030, %969 : vector<8x128xf32>
    %1042 = arith.mulf %1022, %1032 : vector<8x128xf32>
    %1043 = arith.addf %1041, %1042 : vector<8x128xf32>
    %1044 = math.tanh %1043 : vector<8x128xf32>
    %1045 = arith.mulf %1040, %1044 : vector<8x128xf32>
    %c14_i32 = arith.constant 14 : i32
    %1046 = arith.index_cast %c14_i32 : i32 to index
    %c0_314 = arith.constant 0 : index
    %c0_315 = arith.constant 0 : index
    %1047 = vector.load %arg2[%1046, %c0_314, %c0_315] : memref<16x16x512xbf16, #tpu.memory_space<vmem>>, vector<1x16x512xbf16>
    %1048 = vector.shape_cast %1047 : vector<1x16x512xbf16> to vector<16x512xbf16>
    %1049 = arith.extf %1048 : vector<16x512xbf16> to vector<16x512xf32>
    %1050 = vector.extract_strided_slice %1049 {offsets = [0, 0], sizes = [8, 512], strides = [1, 1]} : vector<16x512xf32> to vector<8x512xf32>
    %1051 = arith.truncf %1010 : vector<8x128xf32> to vector<8x128xbf16>
    %cst_316 = arith.constant dense<0.000000e+00> : vector<8x512xf32>
    %1052 = tpu.matmul %1051, %3, %cst_316 {dimension_numbers = #tpu.dot_dimension_numbers<[1], [0], [0], [1], [0, 0, 1, 1], [], []>} : vector<8x128xbf16>, vector<128x512xbf16>, vector<8x512xf32> -> vector<8x512xf32>
    %1053 = arith.addf %1050, %1052 : vector<8x512xf32>
    %1054 = vector.extract_strided_slice %1053 {offsets = [0, 0], sizes = [8, 128], strides = [1, 1]} : vector<8x512xf32> to vector<8x128xf32>
    %cst_317 = arith.constant 5.000000e-01 : f32
    %1055 = vector.broadcast %cst_317 : f32 to vector<8x128xf32>
    %1056 = arith.mulf %1055, %1054 : vector<8x128xf32>
    %1057 = math.tanh %1056 : vector<8x128xf32>
    %cst_318 = arith.constant 5.000000e-01 : f32
    %1058 = vector.broadcast %cst_318 : f32 to vector<8x128xf32>
    %1059 = arith.mulf %1058, %1057 : vector<8x128xf32>
    %cst_319 = arith.constant 5.000000e-01 : f32
    %1060 = vector.broadcast %cst_319 : f32 to vector<8x128xf32>
    %1061 = arith.addf %1059, %1060 : vector<8x128xf32>
    %1062 = vector.extract_strided_slice %1053 {offsets = [0, 128], sizes = [8, 128], strides = [1, 1]} : vector<8x512xf32> to vector<8x128xf32>
    %cst_320 = arith.constant 5.000000e-01 : f32
    %1063 = vector.broadcast %cst_320 : f32 to vector<8x128xf32>
    %1064 = arith.mulf %1063, %1062 : vector<8x128xf32>
    %1065 = math.tanh %1064 : vector<8x128xf32>
    %cst_321 = arith.constant 5.000000e-01 : f32
    %1066 = vector.broadcast %cst_321 : f32 to vector<8x128xf32>
    %1067 = arith.mulf %1066, %1065 : vector<8x128xf32>
    %cst_322 = arith.constant 5.000000e-01 : f32
    %1068 = vector.broadcast %cst_322 : f32 to vector<8x128xf32>
    %1069 = arith.addf %1067, %1068 : vector<8x128xf32>
    %1070 = vector.extract_strided_slice %1053 {offsets = [0, 256], sizes = [8, 128], strides = [1, 1]} : vector<8x512xf32> to vector<8x128xf32>
    %1071 = math.tanh %1070 : vector<8x128xf32>
    %1072 = vector.extract_strided_slice %1053 {offsets = [0, 384], sizes = [8, 128], strides = [1, 1]} : vector<8x512xf32> to vector<8x128xf32>
    %cst_323 = arith.constant 5.000000e-01 : f32
    %1073 = vector.broadcast %cst_323 : f32 to vector<8x128xf32>
    %1074 = arith.mulf %1073, %1072 : vector<8x128xf32>
    %1075 = math.tanh %1074 : vector<8x128xf32>
    %cst_324 = arith.constant 5.000000e-01 : f32
    %1076 = vector.broadcast %cst_324 : f32 to vector<8x128xf32>
    %1077 = arith.mulf %1076, %1075 : vector<8x128xf32>
    %cst_325 = arith.constant 5.000000e-01 : f32
    %1078 = vector.broadcast %cst_325 : f32 to vector<8x128xf32>
    %1079 = arith.addf %1077, %1078 : vector<8x128xf32>
    %1080 = arith.mulf %1069, %1008 : vector<8x128xf32>
    %1081 = arith.mulf %1061, %1071 : vector<8x128xf32>
    %1082 = arith.addf %1080, %1081 : vector<8x128xf32>
    %1083 = math.tanh %1082 : vector<8x128xf32>
    %1084 = arith.mulf %1079, %1083 : vector<8x128xf32>
    %1085 = vector.extract_strided_slice %1049 {offsets = [8, 0], sizes = [8, 512], strides = [1, 1]} : vector<16x512xf32> to vector<8x512xf32>
    %1086 = arith.truncf %1045 : vector<8x128xf32> to vector<8x128xbf16>
    %cst_326 = arith.constant dense<0.000000e+00> : vector<8x512xf32>
    %1087 = tpu.matmul %1086, %3, %cst_326 {dimension_numbers = #tpu.dot_dimension_numbers<[1], [0], [0], [1], [0, 0, 1, 1], [], []>} : vector<8x128xbf16>, vector<128x512xbf16>, vector<8x512xf32> -> vector<8x512xf32>
    %1088 = arith.addf %1085, %1087 : vector<8x512xf32>
    %1089 = vector.extract_strided_slice %1088 {offsets = [0, 0], sizes = [8, 128], strides = [1, 1]} : vector<8x512xf32> to vector<8x128xf32>
    %cst_327 = arith.constant 5.000000e-01 : f32
    %1090 = vector.broadcast %cst_327 : f32 to vector<8x128xf32>
    %1091 = arith.mulf %1090, %1089 : vector<8x128xf32>
    %1092 = math.tanh %1091 : vector<8x128xf32>
    %cst_328 = arith.constant 5.000000e-01 : f32
    %1093 = vector.broadcast %cst_328 : f32 to vector<8x128xf32>
    %1094 = arith.mulf %1093, %1092 : vector<8x128xf32>
    %cst_329 = arith.constant 5.000000e-01 : f32
    %1095 = vector.broadcast %cst_329 : f32 to vector<8x128xf32>
    %1096 = arith.addf %1094, %1095 : vector<8x128xf32>
    %1097 = vector.extract_strided_slice %1088 {offsets = [0, 128], sizes = [8, 128], strides = [1, 1]} : vector<8x512xf32> to vector<8x128xf32>
    %cst_330 = arith.constant 5.000000e-01 : f32
    %1098 = vector.broadcast %cst_330 : f32 to vector<8x128xf32>
    %1099 = arith.mulf %1098, %1097 : vector<8x128xf32>
    %1100 = math.tanh %1099 : vector<8x128xf32>
    %cst_331 = arith.constant 5.000000e-01 : f32
    %1101 = vector.broadcast %cst_331 : f32 to vector<8x128xf32>
    %1102 = arith.mulf %1101, %1100 : vector<8x128xf32>
    %cst_332 = arith.constant 5.000000e-01 : f32
    %1103 = vector.broadcast %cst_332 : f32 to vector<8x128xf32>
    %1104 = arith.addf %1102, %1103 : vector<8x128xf32>
    %1105 = vector.extract_strided_slice %1088 {offsets = [0, 256], sizes = [8, 128], strides = [1, 1]} : vector<8x512xf32> to vector<8x128xf32>
    %1106 = math.tanh %1105 : vector<8x128xf32>
    %1107 = vector.extract_strided_slice %1088 {offsets = [0, 384], sizes = [8, 128], strides = [1, 1]} : vector<8x512xf32> to vector<8x128xf32>
    %cst_333 = arith.constant 5.000000e-01 : f32
    %1108 = vector.broadcast %cst_333 : f32 to vector<8x128xf32>
    %1109 = arith.mulf %1108, %1107 : vector<8x128xf32>
    %1110 = math.tanh %1109 : vector<8x128xf32>
    %cst_334 = arith.constant 5.000000e-01 : f32
    %1111 = vector.broadcast %cst_334 : f32 to vector<8x128xf32>
    %1112 = arith.mulf %1111, %1110 : vector<8x128xf32>
    %cst_335 = arith.constant 5.000000e-01 : f32
    %1113 = vector.broadcast %cst_335 : f32 to vector<8x128xf32>
    %1114 = arith.addf %1112, %1113 : vector<8x128xf32>
    %1115 = arith.mulf %1104, %1043 : vector<8x128xf32>
    %1116 = arith.mulf %1096, %1106 : vector<8x128xf32>
    %1117 = arith.addf %1115, %1116 : vector<8x128xf32>
    %1118 = math.tanh %1117 : vector<8x128xf32>
    %1119 = arith.mulf %1114, %1118 : vector<8x128xf32>
    %c15_i32 = arith.constant 15 : i32
    %1120 = arith.index_cast %c15_i32 : i32 to index
    %c0_336 = arith.constant 0 : index
    %c0_337 = arith.constant 0 : index
    %1121 = vector.load %arg2[%1120, %c0_336, %c0_337] : memref<16x16x512xbf16, #tpu.memory_space<vmem>>, vector<1x16x512xbf16>
    %1122 = vector.shape_cast %1121 : vector<1x16x512xbf16> to vector<16x512xbf16>
    %1123 = arith.extf %1122 : vector<16x512xbf16> to vector<16x512xf32>
    %1124 = vector.extract_strided_slice %1123 {offsets = [0, 0], sizes = [8, 512], strides = [1, 1]} : vector<16x512xf32> to vector<8x512xf32>
    %1125 = arith.truncf %1084 : vector<8x128xf32> to vector<8x128xbf16>
    %cst_338 = arith.constant dense<0.000000e+00> : vector<8x512xf32>
    %1126 = tpu.matmul %1125, %3, %cst_338 {dimension_numbers = #tpu.dot_dimension_numbers<[1], [0], [0], [1], [0, 0, 1, 1], [], []>} : vector<8x128xbf16>, vector<128x512xbf16>, vector<8x512xf32> -> vector<8x512xf32>
    %1127 = arith.addf %1124, %1126 : vector<8x512xf32>
    %1128 = vector.extract_strided_slice %1127 {offsets = [0, 0], sizes = [8, 128], strides = [1, 1]} : vector<8x512xf32> to vector<8x128xf32>
    %cst_339 = arith.constant 5.000000e-01 : f32
    %1129 = vector.broadcast %cst_339 : f32 to vector<8x128xf32>
    %1130 = arith.mulf %1129, %1128 : vector<8x128xf32>
    %1131 = math.tanh %1130 : vector<8x128xf32>
    %cst_340 = arith.constant 5.000000e-01 : f32
    %1132 = vector.broadcast %cst_340 : f32 to vector<8x128xf32>
    %1133 = arith.mulf %1132, %1131 : vector<8x128xf32>
    %cst_341 = arith.constant 5.000000e-01 : f32
    %1134 = vector.broadcast %cst_341 : f32 to vector<8x128xf32>
    %1135 = arith.addf %1133, %1134 : vector<8x128xf32>
    %1136 = vector.extract_strided_slice %1127 {offsets = [0, 128], sizes = [8, 128], strides = [1, 1]} : vector<8x512xf32> to vector<8x128xf32>
    %cst_342 = arith.constant 5.000000e-01 : f32
    %1137 = vector.broadcast %cst_342 : f32 to vector<8x128xf32>
    %1138 = arith.mulf %1137, %1136 : vector<8x128xf32>
    %1139 = math.tanh %1138 : vector<8x128xf32>
    %cst_343 = arith.constant 5.000000e-01 : f32
    %1140 = vector.broadcast %cst_343 : f32 to vector<8x128xf32>
    %1141 = arith.mulf %1140, %1139 : vector<8x128xf32>
    %cst_344 = arith.constant 5.000000e-01 : f32
    %1142 = vector.broadcast %cst_344 : f32 to vector<8x128xf32>
    %1143 = arith.addf %1141, %1142 : vector<8x128xf32>
    %1144 = vector.extract_strided_slice %1127 {offsets = [0, 256], sizes = [8, 128], strides = [1, 1]} : vector<8x512xf32> to vector<8x128xf32>
    %1145 = math.tanh %1144 : vector<8x128xf32>
    %1146 = vector.extract_strided_slice %1127 {offsets = [0, 384], sizes = [8, 128], strides = [1, 1]} : vector<8x512xf32> to vector<8x128xf32>
    %cst_345 = arith.constant 5.000000e-01 : f32
    %1147 = vector.broadcast %cst_345 : f32 to vector<8x128xf32>
    %1148 = arith.mulf %1147, %1146 : vector<8x128xf32>
    %1149 = math.tanh %1148 : vector<8x128xf32>
    %cst_346 = arith.constant 5.000000e-01 : f32
    %1150 = vector.broadcast %cst_346 : f32 to vector<8x128xf32>
    %1151 = arith.mulf %1150, %1149 : vector<8x128xf32>
    %cst_347 = arith.constant 5.000000e-01 : f32
    %1152 = vector.broadcast %cst_347 : f32 to vector<8x128xf32>
    %1153 = arith.addf %1151, %1152 : vector<8x128xf32>
    %1154 = arith.mulf %1143, %1082 : vector<8x128xf32>
    %1155 = arith.mulf %1135, %1145 : vector<8x128xf32>
    %1156 = arith.addf %1154, %1155 : vector<8x128xf32>
    %1157 = math.tanh %1156 : vector<8x128xf32>
    %1158 = arith.mulf %1153, %1157 : vector<8x128xf32>
    %1159 = vector.extract_strided_slice %1123 {offsets = [8, 0], sizes = [8, 512], strides = [1, 1]} : vector<16x512xf32> to vector<8x512xf32>
    %1160 = arith.truncf %1119 : vector<8x128xf32> to vector<8x128xbf16>
    %cst_348 = arith.constant dense<0.000000e+00> : vector<8x512xf32>
    %1161 = tpu.matmul %1160, %3, %cst_348 {dimension_numbers = #tpu.dot_dimension_numbers<[1], [0], [0], [1], [0, 0, 1, 1], [], []>} : vector<8x128xbf16>, vector<128x512xbf16>, vector<8x512xf32> -> vector<8x512xf32>
    %1162 = arith.addf %1159, %1161 : vector<8x512xf32>
    %1163 = vector.extract_strided_slice %1162 {offsets = [0, 0], sizes = [8, 128], strides = [1, 1]} : vector<8x512xf32> to vector<8x128xf32>
    %cst_349 = arith.constant 5.000000e-01 : f32
    %1164 = vector.broadcast %cst_349 : f32 to vector<8x128xf32>
    %1165 = arith.mulf %1164, %1163 : vector<8x128xf32>
    %1166 = math.tanh %1165 : vector<8x128xf32>
    %cst_350 = arith.constant 5.000000e-01 : f32
    %1167 = vector.broadcast %cst_350 : f32 to vector<8x128xf32>
    %1168 = arith.mulf %1167, %1166 : vector<8x128xf32>
    %cst_351 = arith.constant 5.000000e-01 : f32
    %1169 = vector.broadcast %cst_351 : f32 to vector<8x128xf32>
    %1170 = arith.addf %1168, %1169 : vector<8x128xf32>
    %1171 = vector.extract_strided_slice %1162 {offsets = [0, 128], sizes = [8, 128], strides = [1, 1]} : vector<8x512xf32> to vector<8x128xf32>
    %cst_352 = arith.constant 5.000000e-01 : f32
    %1172 = vector.broadcast %cst_352 : f32 to vector<8x128xf32>
    %1173 = arith.mulf %1172, %1171 : vector<8x128xf32>
    %1174 = math.tanh %1173 : vector<8x128xf32>
    %cst_353 = arith.constant 5.000000e-01 : f32
    %1175 = vector.broadcast %cst_353 : f32 to vector<8x128xf32>
    %1176 = arith.mulf %1175, %1174 : vector<8x128xf32>
    %cst_354 = arith.constant 5.000000e-01 : f32
    %1177 = vector.broadcast %cst_354 : f32 to vector<8x128xf32>
    %1178 = arith.addf %1176, %1177 : vector<8x128xf32>
    %1179 = vector.extract_strided_slice %1162 {offsets = [0, 256], sizes = [8, 128], strides = [1, 1]} : vector<8x512xf32> to vector<8x128xf32>
    %1180 = math.tanh %1179 : vector<8x128xf32>
    %1181 = vector.extract_strided_slice %1162 {offsets = [0, 384], sizes = [8, 128], strides = [1, 1]} : vector<8x512xf32> to vector<8x128xf32>
    %cst_355 = arith.constant 5.000000e-01 : f32
    %1182 = vector.broadcast %cst_355 : f32 to vector<8x128xf32>
    %1183 = arith.mulf %1182, %1181 : vector<8x128xf32>
    %1184 = math.tanh %1183 : vector<8x128xf32>
    %cst_356 = arith.constant 5.000000e-01 : f32
    %1185 = vector.broadcast %cst_356 : f32 to vector<8x128xf32>
    %1186 = arith.mulf %1185, %1184 : vector<8x128xf32>
    %cst_357 = arith.constant 5.000000e-01 : f32
    %1187 = vector.broadcast %cst_357 : f32 to vector<8x128xf32>
    %1188 = arith.addf %1186, %1187 : vector<8x128xf32>
    %1189 = arith.mulf %1178, %1117 : vector<8x128xf32>
    %1190 = arith.mulf %1170, %1180 : vector<8x128xf32>
    %1191 = arith.addf %1189, %1190 : vector<8x128xf32>
    %1192 = math.tanh %1191 : vector<8x128xf32>
    %1193 = arith.mulf %1188, %1192 : vector<8x128xf32>
    %c16_i32 = arith.constant 16 : i32
    %c0_358 = arith.constant 0 : index
    %c0_359 = arith.constant 0 : index
    %1194 = vector.load %arg4[%c0_358, %c0_359] : memref<16x128xf32, #tpu.memory_space<vmem>>, vector<8x128xf32>
    tpu.vector_store %arg4[%c0_358, %c0_359], %1158 {strides = array<i32>} : memref<16x128xf32, #tpu.memory_space<vmem>>, vector<8x128xf32>,
    %c8 = arith.constant 8 : index
    %c0_360 = arith.constant 0 : index
    %1195 = vector.load %arg4[%c8, %c0_360] : memref<16x128xf32, #tpu.memory_space<vmem>>, vector<8x128xf32>
    tpu.vector_store %arg4[%c8, %c0_360], %1193 {strides = array<i32>} : memref<16x128xf32, #tpu.memory_space<vmem>>, vector<8x128xf32>,
    %c0_361 = arith.constant 0 : index
    %c0_362 = arith.constant 0 : index
    %1196 = vector.load %arg5[%c0_361, %c0_362] : memref<16x128xf32, #tpu.memory_space<vmem>>, vector<8x128xf32>
    tpu.vector_store %arg5[%c0_361, %c0_362], %1156 {strides = array<i32>} : memref<16x128xf32, #tpu.memory_space<vmem>>, vector<8x128xf32>,
    %c8_363 = arith.constant 8 : index
    %c0_364 = arith.constant 0 : index
    %1197 = vector.load %arg5[%c8_363, %c0_364] : memref<16x128xf32, #tpu.memory_space<vmem>>, vector<8x128xf32>
    tpu.vector_store %arg5[%c8_363, %c0_364], %1191 {strides = array<i32>} : memref<16x128xf32, #tpu.memory_space<vmem>>, vector<8x128xf32>,
    return
  }
  func.func @transform_0(%arg0: i32, %arg1: i32) -> (i32, i32, i32) {
    %c0_i32 = arith.constant 0 : i32
    %c0_i32_0 = arith.constant 0 : i32
    return %arg1, %arg0, %c0_i32 : i32, i32, i32
  }
  func.func @transform_1(%arg0: i32, %arg1: i32) -> (i32, i32) {
    %c0_i32 = arith.constant 0 : i32
    %c0_i32_0 = arith.constant 0 : i32
    %c0_i32_1 = arith.constant 0 : i32
    return %c0_i32, %c0_i32_0 : i32, i32
  }
  func.func @transform_2(%arg0: i32, %arg1: i32) -> (i32, i32) {
    %c0_i32 = arith.constant 0 : i32
    %c0_i32_0 = arith.constant 0 : i32
    return %arg0, %c0_i32 : i32, i32
  }
}

</mosaic_0001>

<bundles_post_ra>
// kernel: lstm_last_hidden.1
= control target key start
LH: loop header
LB: loop body
LE: loop exit
PB: predicated region body
PF: predicated region fallthrough
CT: control target
= control target key end

     0   :  { %7 = vsyncpa [#allocation4], 0  ;;  %s5983_s0 = inlined_call_operand.hbm [shape: bf16[16,16,512], index: 0, kind: input, shape index: {}]   ;;  %s5984_s1 = inlined_call_operand.hbm [shape: bf16[128,512], index: 1, kind: input, shape index: {}]   ;;  %s5985_s2 = inlined_call_operand.hbm [shape: f32[16,128], index: 2, kind: output, shape index: {}]  }
   0x1   :  { %8 = vsyncpa [#allocation7], 0 }
   0x2   :  { %9 = vsyncpa [#allocation5], 0  ;;  %s4441_s9 = smov [#allocation3]   ;;  %s4369_s13 = scalar_lea.hbm %s5983_s0, 8192 }
   0x3   :  { %s15_s10 = sshll.u32 %s4441_s9, 4  ;;  %p4370_p0 = scmp.ne.s32.totalorder %s5983_s0, %s4369_s13  ;;  %s16_s10 = int_to_ptr.vmem [resolvable:$true] %s15_s10 }
   0x4   :  { %p4373_p1 = scmp.lt.u32.totalorder %s4369_s13, %s5983_s0 }
   0x6   :  { %p4375_p2 = pnand %p4373_p1, %p4370_p0 }
   0x8   :  { %4378 = shalt.err (!%p4375_p2)
}
   0x9   :  { %s4379_s18 = scalar_lea.vmem %s16_s10, 8192  ;;  %p4384_p4 = scmp.lt.s32.totalorder %s16_s10, %s16_s10 }
   0xa   :  { %p4380_p3 = scmp.ne.s32.totalorder %s16_s10, %s4379_s18  ;;  %p4385_p5 = scmp.lt.s32.totalorder %s4379_s18, %s4379_s18 }
   0xc   :  { %p4386_p6 = por %p4385_p5, %p4384_p4 }
   0xe   :  { %p4387_p7 = pnand %p4386_p6, %p4380_p3 }
  0x10   :  { %4390 = shalt.err (!%p4387_p7)
}
  0x11   :  { %s4442_s19 = smov 256   ;;  %s4443_s20 = smov 16  }
  0x12   :  { %21 = dma.hbm_to_vmem [thread:$0]  %s5983_s0, 8192, %s16_s10, [#allocation4], %s4442_s19, %s4442_s19, %s4443_s20  }
  0x13   :  { %s4444_s23 = smov [#allocation6]   ;;  %s4391_s27 = scalar_lea.hbm %s5984_s1, 4096 }
  0x14   :  { %s27_s24 = sshll.u32 %s4444_s23, 4  ;;  %p4392_p8 = scmp.ne.s32.totalorder %s5984_s1, %s4391_s27  ;;  %s28_s24 = int_to_ptr.vmem [resolvable:$true] %s27_s24 }
  0x15   :  { %p4395_p9 = scmp.lt.u32.totalorder %s4391_s27, %s5984_s1 }
  0x17   :  { %p4397_p10 = pnand %p4395_p9, %p4392_p8 }
  0x19   :  { %4400 = shalt.err (!%p4397_p10)
}
  0x1a   :  { %s4401_s4 = scalar_lea.vmem %s28_s24, 4096  ;;  %p4406_p12 = scmp.lt.s32.totalorder %s28_s24, %s28_s24 }
  0x1b   :  { %p4402_p11 = scmp.ne.s32.totalorder %s28_s24, %s4401_s4  ;;  %p4407_p13 = scmp.lt.s32.totalorder %s4401_s4, %s4401_s4 }
  0x1d   :  { %p4408_p0 = por %p4407_p13, %p4406_p12 }
  0x1f   :  { %p4409_p1 = pnand %p4408_p0, %p4402_p11 }
  0x21   :  { %4412 = shalt.err (!%p4409_p1)
}
  0x22   :  { %33 = dma.hbm_to_vmem [thread:$0]  %s5984_s1, 4096, %s28_s24, [#allocation7], %s4442_s19, %s4442_s19, %s4443_s20  }
  0x23   :  { %4435 = dma.done.wait [#allocation4], 8192  }
  0x24   :  { %4436 = vsyncadd [#allocation4], 4294959104 }
  0x25   :  { %4437 = dma.done.wait [#allocation7], 4096  }
  0x26   :  { %4438 = vsyncadd [#allocation7], 4294963200  ;;  %v4445_v0 = vmov 0   ;;  %v4491_v1 = vld [vmem:[#allocation6 + $0x4] ss:$16 sps:$4 sm:$0xff]   ;;  %v4446_v33 = vmov 0.0|0.0  }
  0x27   :  { %290 = vmatprep.mubr.bf16.mxu0 %v4445_v0  ;;  %331 = vmatprep.mubr.bf16.mxu1 %v4445_v0  ;;  %v4493_v2 = vld [vmem:[#allocation6] ss:$16 sps:$4 sm:$0xff]   ;;  %v4496_v3 = vld [vmem:[#allocation6 + $0x24] ss:$16 sps:$4 sm:$0xff]   ;;  %v4499_v4 = vld [vmem:[#allocation6 + $0xc] ss:$16 sps:$4 sm:$0xff]  }
  0x28   :  { %258 = vmatprep.subr.bf16.mxu0 %v4491_v1  ;;  %v4501_v5 = vld [vmem:[#allocation6 + $0x20] ss:$16 sps:$4 sm:$0xff]   ;;  %v4503_v6 = vld [vmem:[#allocation6 + $0x8] ss:$16 sps:$4 sm:$0xff]   ;;  %v4506_v7 = vld [vmem:[#allocation6 + $0x44] ss:$16 sps:$4 sm:$0xff]   ;;  %299 = vmatprep.subr.bf16.mxu1 %v4499_v4 }
  0x29   :  { %259 = vmatpush1.bf16.msra.mxu0 %v4493_v2  ;;  %v4509_v8 = vld [vmem:[#allocation6 + $0x2c] ss:$16 sps:$4 sm:$0xff]   ;;  %300 = vmatpush1.bf16.msra.mxu1 %v4503_v6  ;;  %v4512_v9 = vld [vmem:[#allocation6 + $0x28] ss:$16 sps:$4 sm:$0xff]   ;;  %v4516_v10 = vld [vmem:[#allocation6 + $0x40] ss:$16 sps:$4 sm:$0xff]  }
  0x2a   :  { %260 = vmatprep.subr.bf16.mxu0 %v4496_v3  ;;  %301 = vmatprep.subr.bf16.mxu1 %v4509_v8  ;;  %v4519_v11 = vld [vmem:[#allocation6 + $0x64] ss:$16 sps:$4 sm:$0xff]   ;;  %v4521_v12 = vld [vmem:[#allocation6 + $0x4c] ss:$16 sps:$4 sm:$0xff]   ;;  %v4524_v13 = vld [vmem:[#allocation6 + $0x48] ss:$16 sps:$4 sm:$0xff]  }
  0x2b   :  { %v4528_v14 = vld [vmem:[#allocation6 + $0x60] ss:$16 sps:$4 sm:$0xff]   ;;  %v4530_v15 = vld [vmem:[#allocation6 + $0x6c] ss:$16 sps:$4 sm:$0xff]   ;;  %v4533_v16 = vld [vmem:[#allocation6 + $0x84] ss:$16 sps:$4 sm:$0xff]  }
  0x2c   :  { %v4536_v17 = vld [vmem:[#allocation6 + $0x80] ss:$16 sps:$4 sm:$0xff]   ;;  %v4538_v18 = vld [vmem:[#allocation6 + $0x68] ss:$16 sps:$4 sm:$0xff]   ;;  %v4542_v19 = vld [vmem:[#allocation6 + $0x8c] ss:$16 sps:$4 sm:$0xff]  }
  0x2d   :  { %261 = vmatpush1.bf16.msra.mxu0 %v4501_v5  ;;  %302 = vmatpush1.bf16.msra.mxu1 %v4512_v9  ;;  %v4545_v20 = vld [vmem:[#allocation6 + $0xa4] ss:$16 sps:$4 sm:$0xff]   ;;  %v4548_v21 = vld [vmem:[#allocation6 + $0x88] ss:$16 sps:$4 sm:$0xff]   ;;  %v4552_v22 = vld [vmem:[#allocation6 + $0xa0] ss:$16 sps:$4 sm:$0xff]  }
  0x2e   :  { %262 = vmatprep.subr.bf16.mxu0 %v4506_v7  ;;  %303 = vmatprep.subr.bf16.mxu1 %v4521_v12  ;;  %v4554_v23 = vld [vmem:[#allocation6 + $0xac] ss:$16 sps:$4 sm:$0xff]   ;;  %v4557_v24 = vld [vmem:[#allocation6 + $0xc4] ss:$16 sps:$4 sm:$0xff]   ;;  %v4560_v25 = vld [vmem:[#allocation6 + $0xa8] ss:$16 sps:$4 sm:$0xff]  }
  0x2f   :  { %v4564_v26 = vld [vmem:[#allocation6 + $0xc0] ss:$16 sps:$4 sm:$0xff]   ;;  %v4566_v27 = vld [vmem:[#allocation6 + $0xcc] ss:$16 sps:$4 sm:$0xff]   ;;  %v4569_v28 = vld [vmem:[#allocation6 + $0xe4] ss:$16 sps:$4 sm:$0xff]  }
  0x30   :  { %v4572_v29 = vld [vmem:[#allocation6 + $0xc8] ss:$16 sps:$4 sm:$0xff]   ;;  %v4576_v30 = vld [vmem:[#allocation6 + $0xe0] ss:$16 sps:$4 sm:$0xff]   ;;  %v4578_v31 = vld [vmem:[#allocation6 + $0xec] ss:$16 sps:$4 sm:$0xff]  }
  0x31   :  { %263 = vmatpush1.bf16.msra.mxu0 %v4516_v10  ;;  %304 = vmatpush1.bf16.msra.mxu1 %v4524_v13  ;;  %v4582_v32 = vld [vmem:[#allocation6 + $0xe8] ss:$16 sps:$4 sm:$0xff]   ;;  %v85_v34 = vld [vmem:[#allocation3] sm:$0xff]  ;;  %s4447_s1 = smov [#allocation8]  }
  0x32   :  { %264 = vmatprep.subr.bf16.mxu0 %v4519_v11  ;;  %305 = vmatprep.subr.bf16.mxu1 %v4530_v15  ;;  %v89_v35 = vunpack.c.l.bf16 %v85_v34  ;;  %v86_v36 = vld [vmem:[#allocation3 + $0x8] sm:$0xff]  ;;  %v90_v37 = vunpack.c.h.bf16 %v85_v34  ;;  %v87_v34 = vld [vmem:[#allocation3 + $0x10] sm:$0xff]  ;;  %s3821_s6 = sshll.u32 %s4447_s1, 4  ;;  %s3822_s6 = int_to_ptr.vmem [resolvable:$true] %s3821_s6 }
  0x33   :  { %v91_v39 = vunpack.c.l.bf16 %v86_v36  ;;  %v92_v50 = vunpack.c.h.bf16 %v86_v36  ;;  %v93_v36 = vunpack.c.l.bf16 %v87_v34  ;;  %s4413_s7 = scalar_lea.vmem %s3822_s6, 256  ;;  %p4418_p3 = scmp.lt.s32.totalorder %s3822_s6, %s3822_s6 }
  0x34   :  { %p4414_p2 = scmp.ne.s32.totalorder %s3822_s6, %s4413_s7  ;;  %p4419_p4 = scmp.lt.s32.totalorder %s4413_s7, %s4413_s7 }
  0x35   :  { %265 = vmatpush1.bf16.msra.mxu0 %v4528_v14  ;;  %306 = vmatpush1.bf16.msra.mxu1 %v4538_v18 }
  0x36   :  { %266 = vmatprep.subr.bf16.mxu0 %v4533_v16  ;;  %307 = vmatprep.subr.bf16.mxu1 %v4542_v19  ;;  %p4420_p5 = por %p4419_p4, %p4418_p3 }
  0x38   :  { %p4421_p6 = pnand %p4420_p5, %p4414_p2 }
  0x39   :  { %267 = vmatpush1.bf16.msra.mxu0 %v4536_v17  ;;  %308 = vmatpush1.bf16.msra.mxu1 %v4548_v21 }
  0x3a   :  { %268 = vmatprep.subr.bf16.mxu0 %v4545_v20  ;;  %309 = vmatprep.subr.bf16.mxu1 %v4554_v23 }
  0x3d   :  { %269 = vmatpush1.bf16.msra.mxu0 %v4552_v22  ;;  %310 = vmatpush1.bf16.msra.mxu1 %v4560_v25 }
  0x3e   :  { %270 = vmatprep.subr.bf16.mxu0 %v4557_v24  ;;  %311 = vmatprep.subr.bf16.mxu1 %v4566_v27 }
  0x41   :  { %271 = vmatpush1.bf16.msra.mxu0 %v4564_v26  ;;  %312 = vmatpush1.bf16.msra.mxu1 %v4572_v29 }
  0x42   :  { %272 = vmatprep.subr.bf16.mxu0 %v4569_v28  ;;  %313 = vmatprep.subr.bf16.mxu1 %v4578_v31 }
  0x45   :  { %273 = vmatpush1.bf16.msra.mxu0 %v4576_v30  ;;  %314 = vmatpush1.bf16.msra.mxu1 %v4582_v32 }
  0x46   :  { %363 = vmatprep.subr.bf16.mxu0 %v4491_v1  ;;  %404 = vmatprep.subr.bf16.mxu1 %v4499_v4 }
  0x48   :  { %291 = vmatmul.mubr.bf16.vlgmr.msra.gmra.mrb[0].mxu0 %v4446_v33  ;;  %332 = vmatmul.mubr.bf16.vlgmr.msra.gmra.mrb[0].mxu1 %v4446_v33 }
  0x49   :  { %364 = vmatpush1.bf16.msra.mxu0 %v4493_v2  ;;  %395 = vmatprep.mubr.bf16.mxu0 %v4445_v0 }
  0x4a   :  { %365 = vmatprep.subr.bf16.mxu0 %v4496_v3  ;;  %405 = vmatpush1.bf16.msra.mxu1 %v4503_v6 }
  0x4b   :  { %436 = vmatprep.mubr.bf16.mxu1 %v4445_v0  ;;  %406 = vmatprep.subr.bf16.mxu1 %v4509_v8 }
  0x4d   :  { %366 = vmatpush1.bf16.msra.mxu0 %v4501_v5 }
  0x4e   :  { %367 = vmatprep.subr.bf16.mxu0 %v4506_v7  ;;  %407 = vmatpush1.bf16.msra.mxu1 %v4512_v9 }
  0x4f   :  { %408 = vmatprep.subr.bf16.mxu1 %v4521_v12 }
  0x51   :  { %368 = vmatpush1.bf16.msra.mxu0 %v4516_v10 }
  0x52   :  { %369 = vmatprep.subr.bf16.mxu0 %v4519_v11  ;;  %409 = vmatpush1.bf16.msra.mxu1 %v4524_v13 }
  0x53   :  { %410 = vmatprep.subr.bf16.mxu1 %v4530_v15 }
  0x55   :  { %370 = vmatpush1.bf16.msra.mxu0 %v4528_v14 }
  0x56   :  { %371 = vmatprep.subr.bf16.mxu0 %v4533_v16  ;;  %411 = vmatpush1.bf16.msra.mxu1 %v4538_v18 }
  0x57   :  { %412 = vmatprep.subr.bf16.mxu1 %v4542_v19 }
  0x59   :  { %372 = vmatpush1.bf16.msra.mxu0 %v4536_v17 }
  0x5a   :  { %373 = vmatprep.subr.bf16.mxu0 %v4545_v20  ;;  %413 = vmatpush1.bf16.msra.mxu1 %v4548_v21 }
  0x5b   :  { %414 = vmatprep.subr.bf16.mxu1 %v4554_v23 }
  0x5d   :  { %374 = vmatpush1.bf16.msra.mxu0 %v4552_v22 }
  0x5e   :  { %375 = vmatprep.subr.bf16.mxu0 %v4557_v24  ;;  %415 = vmatpush1.bf16.msra.mxu1 %v4560_v25 }
  0x5f   :  { %416 = vmatprep.subr.bf16.mxu1 %v4566_v27 }
  0x61   :  { %376 = vmatpush1.bf16.msra.mxu0 %v4564_v26 }
  0x62   :  { %377 = vmatprep.subr.bf16.mxu0 %v4569_v28  ;;  %417 = vmatpush1.bf16.msra.mxu1 %v4572_v29 }
  0x63   :  { %418 = vmatprep.subr.bf16.mxu1 %v4578_v31 }
  0x65   :  { %378 = vmatpush1.bf16.msra.mxu0 %v4576_v30 }
  0x66   :  { %481 = vmatprep.subr.bf16.mxu0 %v4491_v1  ;;  %419 = vmatpush1.bf16.msra.mxu1 %v4582_v32 }
  0x67   :  { %522 = vmatprep.subr.bf16.mxu1 %v4499_v4 }
  0x68   :  { %396 = vmatmul.mubr.bf16.vlgmr.msra.gmra.mrb[4].mxu0 %v4446_v33 }
  0x69   :  { %482 = vmatpush1.bf16.msra.mxu0 %v4493_v2  ;;  %513 = vmatprep.mubr.bf16.mxu0 %v4445_v0 }
  0x6a   :  { %483 = vmatprep.subr.bf16.mxu0 %v4496_v3  ;;  %437 = vmatmul.mubr.bf16.vlgmr.msra.gmra.mrb[4].mxu1 %v4446_v33 }
  0x6b   :  { %523 = vmatpush1.bf16.msra.mxu1 %v4503_v6  ;;  %554 = vmatprep.mubr.bf16.mxu1 %v4445_v0 }
  0x6c   :  { %524 = vmatprep.subr.bf16.mxu1 %v4509_v8 }
  0x6d   :  { %484 = vmatpush1.bf16.msra.mxu0 %v4501_v5 }
  0x6e   :  { %485 = vmatprep.subr.bf16.mxu0 %v4506_v7 }
  0x6f   :  { %525 = vmatpush1.bf16.msra.mxu1 %v4512_v9 }
  0x70   :  { %526 = vmatprep.subr.bf16.mxu1 %v4521_v12 }
  0x71   :  { %486 = vmatpush1.bf16.msra.mxu0 %v4516_v10 }
  0x72   :  { %487 = vmatprep.subr.bf16.mxu0 %v4519_v11 }
  0x73   :  { %527 = vmatpush1.bf16.msra.mxu1 %v4524_v13 }
  0x74   :  { %528 = vmatprep.subr.bf16.mxu1 %v4530_v15 }
  0x75   :  { %488 = vmatpush1.bf16.msra.mxu0 %v4528_v14 }
  0x76   :  { %489 = vmatprep.subr.bf16.mxu0 %v4533_v16 }
  0x77   :  { %529 = vmatpush1.bf16.msra.mxu1 %v4538_v18 }
  0x78   :  { %530 = vmatprep.subr.bf16.mxu1 %v4542_v19 }
  0x79   :  { %490 = vmatpush1.bf16.msra.mxu0 %v4536_v17 }
  0x7a   :  { %491 = vmatprep.subr.bf16.mxu0 %v4545_v20 }
  0x7b   :  { %531 = vmatpush1.bf16.msra.mxu1 %v4548_v21 }
  0x7c   :  { %532 = vmatprep.subr.bf16.mxu1 %v4554_v23 }
  0x7d   :  { %492 = vmatpush1.bf16.msra.mxu0 %v4552_v22 }
  0x7e   :  { %493 = vmatprep.subr.bf16.mxu0 %v4557_v24 }
  0x7f   :  { %533 = vmatpush1.bf16.msra.mxu1 %v4560_v25 }
  0x80   :  { %534 = vmatprep.subr.bf16.mxu1 %v4566_v27 }
  0x81   :  { %494 = vmatpush1.bf16.msra.mxu0 %v4564_v26 }
  0x82   :  { %495 = vmatprep.subr.bf16.mxu0 %v4569_v28 }
  0x83   :  { %535 = vmatpush1.bf16.msra.mxu1 %v4572_v29 }
  0x84   :  { %536 = vmatprep.subr.bf16.mxu1 %v4578_v31 }
  0x85   :  { %496 = vmatpush1.bf16.msra.mxu0 %v4576_v30 }
  0x86   :  { %586 = vmatprep.subr.bf16.mxu0 %v4491_v1 }
  0x87   :  { %537 = vmatpush1.bf16.msra.mxu1 %v4582_v32 }
  0x88   :  { %627 = vmatprep.subr.bf16.mxu1 %v4499_v4 }
 0x11b   :  { %v292_v38 = vpop.f32.mrb[0].mxu0  ;;  %v333_v46 = vpop.f32.mrb[0].mxu1 }
 0x11c   :  { %v340_v40 = vadd.f32 %v292_v38, %v89_v35  ;;  %v294_v41 = vpop.f32.mrb[1].mxu0  ;;  %v342_v48 = vadd.f32 %v333_v46, %v91_v39  ;;  %v335_v49 = vpop.f32.mrb[1].mxu1  ;;  %v94_v39 = vunpack.c.h.bf16 %v87_v34 }
 0x11d   :  { %v341_v42 = vadd.f32 %v294_v41, %v90_v37  ;;  %v296_v43 = vpop.f32.mrb[2].mxu0  ;;  %v337_v51 = vpop.f32.mrb[2].mxu1  ;;  %v343_v53 = vadd.f32 %v335_v49, %v92_v50  ;;  %v88_v37 = vld [vmem:[#allocation3 + $0x18] sm:$0xff] }
 0x11e   :  { %v344_v44 = vmul.f32 0.5, %v340_v40  ;;  %v297_v45 = vpop.f32.mrb[3].mxu0  ;;  %v338_v52 = vpop.f32.mrb[3].mxu1  ;;  %v95_v41 = vunpack.c.l.bf16 %v88_v37 }
 0x11f   :  { %v348_v47 = vmul.f32 0.5, %v341_v42  ;;  %v353_v54 = vmul.f32 0.5, %v343_v53 }
 0x120   :  { %3923 = vtanh.f32 %v344_v44 }
 0x121   :  { %3925 = vtanh.f32 %v348_v47 }
 0x122   :  { %3927 = vtanh.f32 %v342_v48 }
 0x123   :  { %3929 = vtanh.f32 %v353_v54 }
 0x12a   :  { %v3924_v55 = vpop.eup %3923 }
 0x12b   :  { %v3926_v56 = vpop.eup %3925  ;;  %v346_v57 = vmul.f32 0.5, %v3924_v55  ;;  %v96_v55 = vunpack.c.h.bf16 %v88_v37 }
 0x12c   :  { %v3928_v58 = vpop.eup %3927  ;;  %v350_v59 = vmul.f32 0.5, %v3926_v56 }
 0x12d   :  { %v347_v60 = vadd.f32 0.5, %v346_v57  ;;  %v3930_v35 = vpop.eup %3929 }
 0x12e   :  { %v351_v61 = vadd.f32 0.5, %v350_v59  ;;  %v355_v38 = vmul.f32 0.5, %v3930_v35 }
 0x12f   :  { %v358_v62 = vmul.f32 %v3928_v58, %v347_v60 }
 0x130   :  { %v357_v63 = vmul.f32 0.0, %v351_v61  ;;  %v356_v44 = vadd.f32 0.5, %v355_v38 }
 0x132   :  { %v4657_v33 = vadd.f32 %v358_v62, %v357_v63 }
 0x134   :  { %3931 = vtanh.f32 %v4657_v33 }
 0x13b   :  { %v397_v40 = vpop.f32.mrb[4].mxu0 }
 0x13c   :  { %v445_v42 = vadd.f32 %v397_v40, %v93_v36  ;;  %v399_v43 = vpop.f32.mrb[5].mxu0 }
 0x13d   :  { %v446_v45 = vadd.f32 %v399_v43, %v94_v39  ;;  %v401_v46 = vpop.f32.mrb[6].mxu0  ;;  %v438_v50 = vpop.f32.mrb[4].mxu1 }
 0x13e   :  { %v3932_v47 = vpop.eup %3931  ;;  %v449_v48 = vmul.f32 0.5, %v445_v42  ;;  %v402_v49 = vpop.f32.mrb[7].mxu0  ;;  %v447_v53 = vadd.f32 %v438_v50, %v95_v41 }
 0x13f   :  { %v361_v51 = vmul.f32 %v3932_v47, %v356_v44  ;;  %v453_v52 = vmul.f32 0.5, %v446_v45  ;;  %v440_v54 = vpop.f32.mrb[5].mxu1  ;;  %v468_v47 = vld [vmem:[#allocation3 + $0x20] sm:$0xff]  ;;  %v469_v49 = vld [vmem:[#allocation3 + $0x28] sm:$0xff] }
 0x140   :  { %3933 = vtanh.f32 %v449_v48  ;;  %v442_v56 = vpop.f32.mrb[6].mxu1  ;;  %v448_v59 = vadd.f32 %v440_v54, %v96_v55  ;;  %v472_v48 = vunpack.c.l.bf16 %v468_v47  ;;  %v473_v50 = vunpack.c.h.bf16 %v468_v47 }
 0x141   :  { %v480_v57 = vpack.c.bf16 %v361_v51, %v361_v51  ;;  %3935 = vtanh.f32 %v453_v52  ;;  %v443_v58 = vpop.f32.mrb[7].mxu1  ;;  %v474_v54 = vunpack.c.l.bf16 %v469_v49 }
 0x142   :  { %3937 = vtanh.f32 %v447_v53  ;;  %v458_v60 = vmul.f32 0.5, %v448_v59 }
 0x143   :  { %514 = vmatmul.mubr.bf16.vlgmr.msra.gmra.mrb[8].mxu0 %v480_v57  ;;  %555 = vmatmul.mubr.bf16.vlgmr.msra.gmra.mrb[8].mxu1 %v480_v57 }
 0x144   :  { %587 = vmatpush1.bf16.msra.mxu0 %v4493_v2  ;;  %628 = vmatpush1.bf16.msra.mxu1 %v4503_v6  ;;  %3939 = vtanh.f32 %v458_v60 }
 0x145   :  { %588 = vmatprep.subr.bf16.mxu0 %v4496_v3  ;;  %629 = vmatprep.subr.bf16.mxu1 %v4509_v8 }
 0x146   :  { %618 = vmatprep.mubr.bf16.mxu0 %v4445_v0  ;;  %659 = vmatprep.mubr.bf16.mxu1 %v4445_v0 }
 0x148   :  { %589 = vmatpush1.bf16.msra.mxu0 %v4501_v5  ;;  %630 = vmatpush1.bf16.msra.mxu1 %v4512_v9 }
 0x149   :  { %590 = vmatprep.subr.bf16.mxu0 %v4506_v7  ;;  %631 = vmatprep.subr.bf16.mxu1 %v4521_v12 }
 0x14a   :  { %v3934_v61 = vpop.eup %3933 }
 0x14b   :  { %v3936_v62 = vpop.eup %3935  ;;  %v451_v63 = vmul.f32 0.5, %v3934_v61 }
 0x14c   :  { %v3938_v34 = vpop.eup %3937  ;;  %v455_v35 = vmul.f32 0.5, %v3936_v62  ;;  %591 = vmatpush1.bf16.msra.mxu0 %v4516_v10  ;;  %632 = vmatpush1.bf16.msra.mxu1 %v4524_v13 }
 0x14d   :  { %v452_v36 = vadd.f32 0.5, %v451_v63  ;;  %592 = vmatprep.subr.bf16.mxu0 %v4519_v11  ;;  %633 = vmatprep.subr.bf16.mxu1 %v4530_v15 }
 0x14e   :  { %v456_v37 = vadd.f32 0.5, %v455_v35  ;;  %v3940_v41 = vpop.eup %3939  ;;  %v475_v35 = vunpack.c.h.bf16 %v469_v49  ;;  %v470_v49 = vld [vmem:[#allocation3 + $0x30] sm:$0xff] }
 0x14f   :  { %v463_v38 = vmul.f32 %v3938_v34, %v452_v36  ;;  %v460_v42 = vmul.f32 0.5, %v3940_v41 }
 0x150   :  { %v462_v39 = vmul.f32 0.0, %v456_v37  ;;  %593 = vmatpush1.bf16.msra.mxu0 %v4528_v14  ;;  %634 = vmatpush1.bf16.msra.mxu1 %v4538_v18 }
 0x151   :  { %594 = vmatprep.subr.bf16.mxu0 %v4533_v16  ;;  %635 = vmatprep.subr.bf16.mxu1 %v4542_v19  ;;  %v461_v43 = vadd.f32 0.5, %v460_v42 }
 0x152   :  { %v4678_v40 = vadd.f32 %v463_v38, %v462_v39 }
 0x154   :  { %3941 = vtanh.f32 %v4678_v40  ;;  %595 = vmatpush1.bf16.msra.mxu0 %v4536_v17  ;;  %636 = vmatpush1.bf16.msra.mxu1 %v4548_v21 }
 0x155   :  { %596 = vmatprep.subr.bf16.mxu0 %v4545_v20  ;;  %637 = vmatprep.subr.bf16.mxu1 %v4554_v23 }
 0x158   :  { %597 = vmatpush1.bf16.msra.mxu0 %v4552_v22  ;;  %638 = vmatpush1.bf16.msra.mxu1 %v4560_v25 }
 0x159   :  { %598 = vmatprep.subr.bf16.mxu0 %v4557_v24  ;;  %639 = vmatprep.subr.bf16.mxu1 %v4566_v27 }
 0x15c   :  { %599 = vmatpush1.bf16.msra.mxu0 %v4564_v26  ;;  %640 = vmatpush1.bf16.msra.mxu1 %v4572_v29 }
 0x15d   :  { %600 = vmatprep.subr.bf16.mxu0 %v4569_v28  ;;  %641 = vmatprep.subr.bf16.mxu1 %v4578_v31 }
 0x15e   :  { %v3942_v44 = vpop.eup %3941 }
 0x15f   :  { %v466_v45 = vmul.f32 %v3942_v44, %v461_v43 }
 0x160   :  { %601 = vmatpush1.bf16.msra.mxu0 %v4576_v30  ;;  %642 = vmatpush1.bf16.msra.mxu1 %v4582_v32 }
 0x161   :  { %v585_v46 = vpack.c.bf16 %v466_v45, %v466_v45  ;;  %704 = vmatprep.subr.bf16.mxu0 %v4491_v1  ;;  %745 = vmatprep.subr.bf16.mxu1 %v4499_v4 }
 0x163   :  { %619 = vmatmul.mubr.bf16.vlgmr.msra.gmra.mrb[12].mxu0 %v585_v46  ;;  %660 = vmatmul.mubr.bf16.vlgmr.msra.gmra.mrb[12].mxu1 %v585_v46 }
 0x164   :  { %705 = vmatpush1.bf16.msra.mxu0 %v4493_v2  ;;  %746 = vmatpush1.bf16.msra.mxu1 %v4503_v6 }
 0x165   :  { %706 = vmatprep.subr.bf16.mxu0 %v4496_v3  ;;  %747 = vmatprep.subr.bf16.mxu1 %v4509_v8 }
 0x166   :  { %736 = vmatprep.mubr.bf16.mxu0 %v4445_v0  ;;  %777 = vmatprep.mubr.bf16.mxu1 %v4445_v0 }
 0x168   :  { %707 = vmatpush1.bf16.msra.mxu0 %v4501_v5  ;;  %748 = vmatpush1.bf16.msra.mxu1 %v4512_v9 }
 0x169   :  { %708 = vmatprep.subr.bf16.mxu0 %v4506_v7  ;;  %749 = vmatprep.subr.bf16.mxu1 %v4521_v12 }
 0x16c   :  { %709 = vmatpush1.bf16.msra.mxu0 %v4516_v10  ;;  %750 = vmatpush1.bf16.msra.mxu1 %v4524_v13 }
 0x16d   :  { %710 = vmatprep.subr.bf16.mxu0 %v4519_v11  ;;  %751 = vmatprep.subr.bf16.mxu1 %v4530_v15 }
 0x170   :  { %711 = vmatpush1.bf16.msra.mxu0 %v4528_v14  ;;  %752 = vmatpush1.bf16.msra.mxu1 %v4538_v18 }
 0x171   :  { %712 = vmatprep.subr.bf16.mxu0 %v4533_v16  ;;  %753 = vmatprep.subr.bf16.mxu1 %v4542_v19 }
 0x174   :  { %713 = vmatpush1.bf16.msra.mxu0 %v4536_v17  ;;  %754 = vmatpush1.bf16.msra.mxu1 %v4548_v21 }
 0x175   :  { %714 = vmatprep.subr.bf16.mxu0 %v4545_v20  ;;  %755 = vmatprep.subr.bf16.mxu1 %v4554_v23 }
 0x178   :  { %715 = vmatpush1.bf16.msra.mxu0 %v4552_v22  ;;  %756 = vmatpush1.bf16.msra.mxu1 %v4560_v25 }
 0x179   :  { %716 = vmatprep.subr.bf16.mxu0 %v4557_v24  ;;  %757 = vmatprep.subr.bf16.mxu1 %v4566_v27 }
 0x17c   :  { %717 = vmatpush1.bf16.msra.mxu0 %v4564_v26  ;;  %758 = vmatpush1.bf16.msra.mxu1 %v4572_v29 }
 0x17d   :  { %718 = vmatprep.subr.bf16.mxu0 %v4569_v28  ;;  %759 = vmatprep.subr.bf16.mxu1 %v4578_v31 }
 0x180   :  { %719 = vmatpush1.bf16.msra.mxu0 %v4576_v30  ;;  %760 = vmatpush1.bf16.msra.mxu1 %v4582_v32 }
 0x181   :  { %809 = vmatprep.subr.bf16.mxu0 %v4491_v1  ;;  %850 = vmatprep.subr.bf16.mxu1 %v4499_v4 }
 0x216   :  { %v515_v51 = vpop.f32.mrb[8].mxu0  ;;  %v556_v52 = vpop.f32.mrb[8].mxu1 }
 0x217   :  { %v563_v53 = vadd.f32 %v515_v51, %v472_v48  ;;  %v517_v55 = vpop.f32.mrb[9].mxu0  ;;  %v558_v56 = vpop.f32.mrb[9].mxu1  ;;  %v565_v34 = vadd.f32 %v556_v52, %v474_v54  ;;  %v476_v51 = vunpack.c.l.bf16 %v470_v49  ;;  %v477_v54 = vunpack.c.h.bf16 %v470_v49 }
 0x218   :  { %v564_v57 = vadd.f32 %v517_v55, %v473_v50  ;;  %v519_v58 = vpop.f32.mrb[10].mxu0  ;;  %v560_v59 = vpop.f32.mrb[10].mxu1  ;;  %v566_v36 = vadd.f32 %v558_v56, %v475_v35 }
 0x219   :  { %v567_v60 = vmul.f32 0.5, %v563_v53  ;;  %v520_v61 = vpop.f32.mrb[11].mxu0  ;;  %v561_v62 = vpop.f32.mrb[11].mxu1  ;;  %v471_v53 = vld [vmem:[#allocation3 + $0x38] sm:$0xff] }
 0x21a   :  { %v571_v63 = vmul.f32 0.5, %v564_v57  ;;  %v576_v37 = vmul.f32 0.5, %v566_v36  ;;  %v478_v58 = vunpack.c.l.bf16 %v471_v53 }
 0x21b   :  { %3943 = vtanh.f32 %v567_v60 }
 0x21c   :  { %3945 = vtanh.f32 %v571_v63 }
 0x21d   :  { %3947 = vtanh.f32 %v565_v34 }
 0x21e   :  { %3949 = vtanh.f32 %v576_v37 }
 0x225   :  { %v3944_v38 = vpop.eup %3943 }
 0x226   :  { %v3946_v39 = vpop.eup %3945  ;;  %v569_v41 = vmul.f32 0.5, %v3944_v38 }
 0x227   :  { %v573_v42 = vmul.f32 0.5, %v3946_v39  ;;  %v3948_v44 = vpop.eup %3947 }
 0x228   :  { %v570_v43 = vadd.f32 0.5, %v569_v41  ;;  %v3950_v50 = vpop.eup %3949 }
 0x229   :  { %v574_v45 = vadd.f32 0.5, %v573_v42  ;;  %v578_v52 = vmul.f32 0.5, %v3950_v50  ;;  %v479_v42 = vunpack.c.h.bf16 %v471_v53 }
 0x22a   :  { %v581_v46 = vmul.f32 %v3948_v44, %v570_v43 }
 0x22b   :  { %v580_v47 = vmul.f32 %v574_v45, %v4657_v33  ;;  %v579_v61 = vadd.f32 0.5, %v578_v52 }
 0x22d   :  { %v4732_v48 = vadd.f32 %v581_v46, %v580_v47 }
 0x22f   :  { %3951 = vtanh.f32 %v4732_v48 }
 0x236   :  { %v620_v55 = vpop.f32.mrb[12].mxu0  ;;  %v661_v56 = vpop.f32.mrb[12].mxu1 }
 0x237   :  { %v668_v57 = vadd.f32 %v620_v55, %v476_v51  ;;  %v622_v59 = vpop.f32.mrb[13].mxu0  ;;  %v663_v60 = vpop.f32.mrb[13].mxu1  ;;  %v670_v41 = vadd.f32 %v661_v56, %v478_v58 }
 0x238   :  { %v669_v62 = vadd.f32 %v622_v59, %v477_v54  ;;  %v624_v63 = vpop.f32.mrb[14].mxu0  ;;  %v665_v33 = vpop.f32.mrb[14].mxu1  ;;  %v671_v44 = vadd.f32 %v663_v60, %v479_v42 }
 0x239   :  { %v3952_v34 = vpop.eup %3951  ;;  %v672_v35 = vmul.f32 0.5, %v668_v57  ;;  %v625_v36 = vpop.f32.mrb[15].mxu0 }
 0x23a   :  { %v666_v37 = vpop.f32.mrb[15].mxu1  ;;  %v584_v38 = vmul.f32 %v3952_v34, %v579_v61  ;;  %v676_v39 = vmul.f32 0.5, %v669_v62  ;;  %v681_v45 = vmul.f32 0.5, %v671_v44  ;;  %v693_v36 = vld [vmem:[#allocation3 + $0x50] sm:$0xff] }
 0x23b   :  { %3953 = vtanh.f32 %v672_v35  ;;  %v700_v42 = vunpack.c.h.bf16 %v693_v36 }
 0x23c   :  { %v703_v43 = vpack.c.bf16 %v584_v38, %v584_v38  ;;  %3955 = vtanh.f32 %v676_v39  ;;  %v699_v38 = vunpack.c.l.bf16 %v693_v36  ;;  %v4874_v36 = vld [vmem:[#allocation6 + $0xac] ss:$16 sps:$4 sm:$0xff]  }
 0x23d   :  { %3957 = vtanh.f32 %v670_v41  ;;  %v694_v41 = vld [vmem:[#allocation3 + $0x58] sm:$0xff] }
 0x23e   :  { %737 = vmatmul.mubr.bf16.vlgmr.msra.gmra.mrb[16].mxu0 %v703_v43  ;;  %778 = vmatmul.mubr.bf16.vlgmr.msra.gmra.mrb[16].mxu1 %v703_v43  ;;  %3959 = vtanh.f32 %v681_v45 }
 0x23f   :  { %810 = vmatpush1.bf16.msra.mxu0 %v4493_v2  ;;  %851 = vmatpush1.bf16.msra.mxu1 %v4503_v6 }
 0x240   :  { %811 = vmatprep.subr.bf16.mxu0 %v4496_v3  ;;  %852 = vmatprep.subr.bf16.mxu1 %v4509_v8 }
 0x241   :  { %841 = vmatprep.mubr.bf16.mxu0 %v4445_v0  ;;  %882 = vmatprep.mubr.bf16.mxu1 %v4445_v0 }
 0x243   :  { %812 = vmatpush1.bf16.msra.mxu0 %v4501_v5  ;;  %853 = vmatpush1.bf16.msra.mxu1 %v4512_v9 }
 0x244   :  { %813 = vmatprep.subr.bf16.mxu0 %v4506_v7  ;;  %854 = vmatprep.subr.bf16.mxu1 %v4521_v12 }
 0x245   :  { %v3954_v46 = vpop.eup %3953 }
 0x246   :  { %v3956_v47 = vpop.eup %3955  ;;  %v674_v49 = vmul.f32 0.5, %v3954_v46  ;;  %v701_v46 = vunpack.c.l.bf16 %v694_v41 }
 0x247   :  { %v678_v50 = vmul.f32 0.5, %v3956_v47  ;;  %814 = vmatpush1.bf16.msra.mxu0 %v4516_v10  ;;  %855 = vmatpush1.bf16.msra.mxu1 %v4524_v13  ;;  %v3958_v52 = vpop.eup %3957 }
 0x248   :  { %v675_v51 = vadd.f32 0.5, %v674_v49  ;;  %815 = vmatprep.subr.bf16.mxu0 %v4519_v11  ;;  %856 = vmatprep.subr.bf16.mxu1 %v4530_v15 }
 0x249   :  { %v679_v53 = vadd.f32 0.5, %v678_v50 }
 0x24a   :  { %v686_v54 = vmul.f32 %v3958_v52, %v675_v51 }
 0x24b   :  { %v685_v55 = vmul.f32 %v679_v53, %v4678_v40  ;;  %816 = vmatpush1.bf16.msra.mxu0 %v4528_v14  ;;  %857 = vmatpush1.bf16.msra.mxu1 %v4538_v18  ;;  %v3960_v40 = vpop.eup %3959 }
 0x24c   :  { %817 = vmatprep.subr.bf16.mxu0 %v4533_v16  ;;  %858 = vmatprep.subr.bf16.mxu1 %v4542_v19  ;;  %v683_v57 = vmul.f32 0.5, %v3960_v40 }
 0x24d   :  { %v4754_v56 = vadd.f32 %v686_v54, %v685_v55 }
 0x24e   :  { %v684_v58 = vadd.f32 0.5, %v683_v57 }
 0x24f   :  { %3961 = vtanh.f32 %v4754_v56  ;;  %818 = vmatpush1.bf16.msra.mxu0 %v4536_v17  ;;  %859 = vmatpush1.bf16.msra.mxu1 %v4548_v21 }
 0x250   :  { %819 = vmatprep.subr.bf16.mxu0 %v4545_v20  ;;  %860 = vmatprep.subr.bf16.mxu1 %v4554_v23 }
 0x253   :  { %820 = vmatpush1.bf16.msra.mxu0 %v4552_v22  ;;  %861 = vmatpush1.bf16.msra.mxu1 %v4560_v25 }
 0x254   :  { %821 = vmatprep.subr.bf16.mxu0 %v4557_v24  ;;  %862 = vmatprep.subr.bf16.mxu1 %v4566_v27 }
 0x257   :  { %822 = vmatpush1.bf16.msra.mxu0 %v4564_v26  ;;  %863 = vmatpush1.bf16.msra.mxu1 %v4572_v29 }
 0x258   :  { %823 = vmatprep.subr.bf16.mxu0 %v4569_v28  ;;  %864 = vmatprep.subr.bf16.mxu1 %v4578_v31 }
 0x259   :  { %v3962_v59 = vpop.eup %3961 }
 0x25a   :  { %v689_v60 = vmul.f32 %v3962_v59, %v684_v58 }
 0x25b   :  { %824 = vmatpush1.bf16.msra.mxu0 %v4576_v30  ;;  %865 = vmatpush1.bf16.msra.mxu1 %v4582_v32 }
 0x25c   :  { %v808_v61 = vpack.c.bf16 %v689_v60, %v689_v60  ;;  %927 = vmatprep.subr.bf16.mxu0 %v4491_v1  ;;  %968 = vmatprep.subr.bf16.mxu1 %v4499_v4  ;;  %v702_v60 = vunpack.c.h.bf16 %v694_v41  ;;  %v4881_v41 = vld [vmem:[#allocation6 + $0xc4] ss:$16 sps:$4 sm:$0xff]  }
 0x25e   :  { %842 = vmatmul.mubr.bf16.vlgmr.msra.gmra.mrb[20].mxu0 %v808_v61  ;;  %883 = vmatmul.mubr.bf16.vlgmr.msra.gmra.mrb[20].mxu1 %v808_v61 }
 0x25f   :  { %928 = vmatpush1.bf16.msra.mxu0 %v4493_v2  ;;  %969 = vmatpush1.bf16.msra.mxu1 %v4503_v6  ;;  %v691_v2 = vld [vmem:[#allocation3 + $0x40] sm:$0xff] }
 0x260   :  { %929 = vmatprep.subr.bf16.mxu0 %v4496_v3  ;;  %970 = vmatprep.subr.bf16.mxu1 %v4509_v8  ;;  %v695_v3 = vunpack.c.l.bf16 %v691_v2  ;;  %v696_v6 = vunpack.c.h.bf16 %v691_v2 }
 0x261   :  { %959 = vmatprep.mubr.bf16.mxu0 %v4445_v0  ;;  %1000 = vmatprep.mubr.bf16.mxu1 %v4445_v0 }
 0x263   :  { %930 = vmatpush1.bf16.msra.mxu0 %v4501_v5  ;;  %971 = vmatpush1.bf16.msra.mxu1 %v4512_v9  ;;  %v692_v5 = vld [vmem:[#allocation3 + $0x48] sm:$0xff] }
 0x264   :  { %931 = vmatprep.subr.bf16.mxu0 %v4506_v7  ;;  %972 = vmatprep.subr.bf16.mxu1 %v4521_v12 }
 0x267   :  { %932 = vmatpush1.bf16.msra.mxu0 %v4516_v10  ;;  %973 = vmatpush1.bf16.msra.mxu1 %v4524_v13  ;;  %v697_v10 = vunpack.c.l.bf16 %v692_v5 }
 0x268   :  { %933 = vmatprep.subr.bf16.mxu0 %v4519_v11  ;;  %974 = vmatprep.subr.bf16.mxu1 %v4530_v15 }
 0x26b   :  { %934 = vmatpush1.bf16.msra.mxu0 %v4528_v14  ;;  %975 = vmatpush1.bf16.msra.mxu1 %v4538_v18 }
 0x26c   :  { %935 = vmatprep.subr.bf16.mxu0 %v4533_v16  ;;  %976 = vmatprep.subr.bf16.mxu1 %v4542_v19 }
 0x26f   :  { %936 = vmatpush1.bf16.msra.mxu0 %v4536_v17  ;;  %977 = vmatpush1.bf16.msra.mxu1 %v4548_v21 }
 0x270   :  { %937 = vmatprep.subr.bf16.mxu0 %v4545_v20  ;;  %978 = vmatprep.subr.bf16.mxu1 %v4554_v23 }
 0x273   :  { %938 = vmatpush1.bf16.msra.mxu0 %v4552_v22  ;;  %979 = vmatpush1.bf16.msra.mxu1 %v4560_v25 }
 0x274   :  { %939 = vmatprep.subr.bf16.mxu0 %v4557_v24  ;;  %980 = vmatprep.subr.bf16.mxu1 %v4566_v27 }
 0x277   :  { %940 = vmatpush1.bf16.msra.mxu0 %v4564_v26  ;;  %981 = vmatpush1.bf16.msra.mxu1 %v4572_v29 }
 0x278   :  { %941 = vmatprep.subr.bf16.mxu0 %v4569_v28  ;;  %982 = vmatprep.subr.bf16.mxu1 %v4578_v31 }
 0x27b   :  { %942 = vmatpush1.bf16.msra.mxu0 %v4576_v30  ;;  %983 = vmatpush1.bf16.msra.mxu1 %v4582_v32 }
 0x27c   :  { %1032 = vmatprep.subr.bf16.mxu0 %v4491_v1  ;;  %1073 = vmatprep.subr.bf16.mxu1 %v4499_v4  ;;  %v698_v4 = vunpack.c.h.bf16 %v692_v5  ;;  %v4814_v5 = vld [vmem:[#allocation6 + $0x8] ss:$16 sps:$4 sm:$0xff]  }
 0x311   :  { %v738_v7 = vpop.f32.mrb[16].mxu0  ;;  %v779_v8 = vpop.f32.mrb[16].mxu1 }
 0x312   :  { %v786_v9 = vadd.f32 %v738_v7, %v695_v3  ;;  %v740_v11 = vpop.f32.mrb[17].mxu0  ;;  %v781_v12 = vpop.f32.mrb[17].mxu1  ;;  %v788_v1 = vadd.f32 %v779_v8, %v697_v10  ;;  %v4811_v3 = vld [vmem:[#allocation6] ss:$16 sps:$4 sm:$0xff]   ;;  %v4820_v7 = vld [vmem:[#allocation6 + $0x2c] ss:$16 sps:$4 sm:$0xff]  }
 0x313   :  { %v787_v13 = vadd.f32 %v740_v11, %v696_v6  ;;  %v742_v14 = vpop.f32.mrb[18].mxu0  ;;  %v783_v15 = vpop.f32.mrb[18].mxu1  ;;  %v789_v20 = vadd.f32 %v781_v12, %v698_v4  ;;  %v4817_v6 = vld [vmem:[#allocation6 + $0x24] ss:$16 sps:$4 sm:$0xff]   ;;  %v4828_v10 = vld [vmem:[#allocation6 + $0x28] ss:$16 sps:$4 sm:$0xff]  }
 0x314   :  { %v790_v16 = vmul.f32 0.5, %v786_v9  ;;  %v743_v17 = vpop.f32.mrb[19].mxu0  ;;  %v784_v18 = vpop.f32.mrb[19].mxu1  ;;  %v4825_v9 = vld [vmem:[#allocation6 + $0x20] ss:$16 sps:$4 sm:$0xff]  }
 0x315   :  { %v794_v19 = vmul.f32 0.5, %v787_v13  ;;  %v799_v21 = vmul.f32 0.5, %v789_v20  ;;  %v4831_v11 = vld [vmem:[#allocation6 + $0x44] ss:$16 sps:$4 sm:$0xff]   ;;  %v4834_v12 = vld [vmem:[#allocation6 + $0x4c] ss:$16 sps:$4 sm:$0xff]  }
 0x316   :  { %3963 = vtanh.f32 %v790_v16  ;;  %v4837_v17 = vld [vmem:[#allocation6 + $0x40] ss:$16 sps:$4 sm:$0xff]   ;;  %v4840_v18 = vld [vmem:[#allocation6 + $0x48] ss:$16 sps:$4 sm:$0xff]   ;;  %v4846_v4 = vld [vmem:[#allocation6 + $0x6c] ss:$16 sps:$4 sm:$0xff]  }
 0x317   :  { %3965 = vtanh.f32 %v794_v19 }
 0x318   :  { %3967 = vtanh.f32 %v788_v1  ;;  %v4843_v1 = vld [vmem:[#allocation6 + $0x64] ss:$16 sps:$4 sm:$0xff]  }
 0x319   :  { %3969 = vtanh.f32 %v799_v21 }
 0x320   :  { %v3964_v22 = vpop.eup %3963 }
 0x321   :  { %v3966_v23 = vpop.eup %3965  ;;  %v792_v24 = vmul.f32 0.5, %v3964_v22 }
 0x322   :  { %v796_v26 = vmul.f32 0.5, %v3966_v23  ;;  %v3968_v62 = vpop.eup %3967 }
 0x323   :  { %v793_v28 = vadd.f32 0.5, %v792_v24  ;;  %v3970_v37 = vpop.eup %3969  ;;  %v4850_v24 = vld [vmem:[#allocation6 + $0x60] ss:$16 sps:$4 sm:$0xff]  }
 0x324   :  { %v797_v63 = vadd.f32 0.5, %v796_v26  ;;  %v801_v39 = vmul.f32 0.5, %v3970_v37  ;;  %v4853_v26 = vld [vmem:[#allocation6 + $0x68] ss:$16 sps:$4 sm:$0xff]  }
 0x325   :  { %v804_v33 = vmul.f32 %v3968_v62, %v793_v28  ;;  %v4856_v28 = vld [vmem:[#allocation6 + $0x84] ss:$16 sps:$4 sm:$0xff]   ;;  %v4859_v62 = vld [vmem:[#allocation6 + $0x8c] ss:$16 sps:$4 sm:$0xff]  }
 0x326   :  { %v803_v34 = vmul.f32 %v797_v63, %v4732_v48  ;;  %v802_v50 = vadd.f32 0.5, %v801_v39 }
 0x328   :  { %v4808_v35 = vadd.f32 %v804_v33, %v803_v34  ;;  %v4868_v33 = vld [vmem:[#allocation6 + $0x88] ss:$16 sps:$4 sm:$0xff]   ;;  %v4871_v34 = vld [vmem:[#allocation6 + $0xa4] ss:$16 sps:$4 sm:$0xff]  }
 0x32a   :  { %3971 = vtanh.f32 %v4808_v35 }
 0x331   :  { %v843_v43 = vpop.f32.mrb[20].mxu0  ;;  %v884_v44 = vpop.f32.mrb[20].mxu1 }
 0x332   :  { %v891_v45 = vadd.f32 %v843_v43, %v699_v38  ;;  %v845_v47 = vpop.f32.mrb[21].mxu0  ;;  %v886_v49 = vpop.f32.mrb[21].mxu1  ;;  %v893_v59 = vadd.f32 %v884_v44, %v701_v46  ;;  %v4877_v38 = vld [vmem:[#allocation6 + $0xa0] ss:$16 sps:$4 sm:$0xff]   ;;  %v4889_v44 = vld [vmem:[#allocation6 + $0xe4] ss:$16 sps:$4 sm:$0xff]  }
 0x333   :  { %v892_v51 = vadd.f32 %v845_v47, %v700_v42  ;;  %v847_v52 = vpop.f32.mrb[22].mxu0  ;;  %v888_v48 = vpop.f32.mrb[22].mxu1  ;;  %v894_v2 = vadd.f32 %v886_v49, %v702_v60  ;;  %v4885_v42 = vld [vmem:[#allocation6 + $0xc0] ss:$16 sps:$4 sm:$0xff]   ;;  %v4895_v46 = vld [vmem:[#allocation6 + $0x4] ss:$16 sps:$4 sm:$0xff]  }
 0x334   :  { %v3972_v53 = vpop.eup %3971  ;;  %v895_v54 = vmul.f32 0.5, %v891_v45  ;;  %v848_v55 = vpop.f32.mrb[23].mxu0  ;;  %v4898_v47 = vld [vmem:[#allocation6 + $0xc] ss:$16 sps:$4 sm:$0xff]   ;;  %v4939_v49 = vld [vmem:[#allocation6 + $0xe0] ss:$16 sps:$4 sm:$0xff]  }
 0x335   :  { %v889_v40 = vpop.f32.mrb[23].mxu1  ;;  %v807_v57 = vmul.f32 %v3972_v53, %v802_v50  ;;  %v899_v58 = vmul.f32 0.5, %v892_v51  ;;  %v904_v8 = vmul.f32 0.5, %v894_v2  ;;  %v4942_v50 = vld [vmem:[#allocation6 + $0xe8] ss:$16 sps:$4 sm:$0xff]   ;;  %v914_v51 = vld [vmem:[#allocation3 + $0x60] sm:$0xff] }
 0x336   :  { %3973 = vtanh.f32 %v895_v54  ;;  %v918_v52 = vunpack.c.l.bf16 %v914_v51  ;;  %v915_v48 = vld [vmem:[#allocation3 + $0x68] sm:$0xff]  ;;  %v919_v53 = vunpack.c.h.bf16 %v914_v51 }
 0x337   :  { %v926_v61 = vpack.c.bf16 %v807_v57, %v807_v57  ;;  %3975 = vtanh.f32 %v899_v58  ;;  %v920_v57 = vunpack.c.l.bf16 %v915_v48 }
 0x338   :  { %3977 = vtanh.f32 %v893_v59 }
 0x339   :  { %960 = vmatmul.mubr.bf16.vlgmr.msra.gmra.mrb[24].mxu0 %v926_v61  ;;  %1001 = vmatmul.mubr.bf16.vlgmr.msra.gmra.mrb[24].mxu1 %v926_v61  ;;  %3979 = vtanh.f32 %v904_v8 }
 0x33a   :  { %1033 = vmatpush1.bf16.msra.mxu0 %v4811_v3  ;;  %1074 = vmatpush1.bf16.msra.mxu1 %v4814_v5 }
 0x33b   :  { %1034 = vmatprep.subr.bf16.mxu0 %v4817_v6  ;;  %1075 = vmatprep.subr.bf16.mxu1 %v4820_v7 }
 0x33c   :  { %1064 = vmatprep.mubr.bf16.mxu0 %v4445_v0  ;;  %1105 = vmatprep.mubr.bf16.mxu1 %v4445_v0 }
 0x33e   :  { %1035 = vmatpush1.bf16.msra.mxu0 %v4825_v9  ;;  %1076 = vmatpush1.bf16.msra.mxu1 %v4828_v10 }
 0x33f   :  { %1036 = vmatprep.subr.bf16.mxu0 %v4831_v11  ;;  %1077 = vmatprep.subr.bf16.mxu1 %v4834_v12 }
 0x340   :  { %v3974_v13 = vpop.eup %3973 }
 0x341   :  { %v3976_v14 = vpop.eup %3975  ;;  %v897_v15 = vmul.f32 0.5, %v3974_v13 }
 0x342   :  { %v901_v16 = vmul.f32 0.5, %v3976_v14  ;;  %1037 = vmatpush1.bf16.msra.mxu0 %v4837_v17  ;;  %1078 = vmatpush1.bf16.msra.mxu1 %v4840_v18  ;;  %v3978_v20 = vpop.eup %3977 }
 0x343   :  { %v898_v19 = vadd.f32 0.5, %v897_v15  ;;  %1038 = vmatprep.subr.bf16.mxu0 %v4843_v1  ;;  %1079 = vmatprep.subr.bf16.mxu1 %v4846_v4  ;;  %v3980_v37 = vpop.eup %3979 }
 0x344   :  { %v902_v21 = vadd.f32 0.5, %v901_v16  ;;  %v906_v39 = vmul.f32 0.5, %v3980_v37 }
 0x345   :  { %v909_v22 = vmul.f32 %v3978_v20, %v898_v19  ;;  %v921_v19 = vunpack.c.h.bf16 %v915_v48  ;;  %v916_v48 = vld [vmem:[#allocation3 + $0x70] sm:$0xff] }
 0x346   :  { %v908_v23 = vmul.f32 %v902_v21, %v4754_v56  ;;  %1039 = vmatpush1.bf16.msra.mxu0 %v4850_v24  ;;  %1080 = vmatpush1.bf16.msra.mxu1 %v4853_v26  ;;  %v4865_v56 = vld [vmem:[#allocation6 + $0x80] ss:$16 sps:$4 sm:$0xff]   ;;  %v907_v43 = vadd.f32 0.5, %v906_v39 }
 0x347   :  { %1040 = vmatprep.subr.bf16.mxu0 %v4856_v28  ;;  %1081 = vmatprep.subr.bf16.mxu1 %v4859_v62 }
 0x348   :  { %v4862_v63 = vadd.f32 %v909_v22, %v908_v23 }
 0x34a   :  { %3981 = vtanh.f32 %v4862_v63  ;;  %1041 = vmatpush1.bf16.msra.mxu0 %v4865_v56  ;;  %1082 = vmatpush1.bf16.msra.mxu1 %v4868_v33 }
 0x34b   :  { %1042 = vmatprep.subr.bf16.mxu0 %v4871_v34  ;;  %1083 = vmatprep.subr.bf16.mxu1 %v4874_v36 }
 0x34e   :  { %1043 = vmatpush1.bf16.msra.mxu0 %v4877_v38  ;;  %1084 = vmatpush1.bf16.msra.mxu1 %v4560_v25 }
 0x34f   :  { %1044 = vmatprep.subr.bf16.mxu0 %v4881_v41  ;;  %1085 = vmatprep.subr.bf16.mxu1 %v4566_v27 }
 0x352   :  { %1045 = vmatpush1.bf16.msra.mxu0 %v4885_v42  ;;  %1086 = vmatpush1.bf16.msra.mxu1 %v4572_v29  ;;  %v4924_v29 = vld [vmem:[#allocation6 + $0xa8] ss:$16 sps:$4 sm:$0xff]  }
 0x353   :  { %1046 = vmatprep.subr.bf16.mxu0 %v4889_v44  ;;  %1087 = vmatprep.subr.bf16.mxu1 %v4578_v31  ;;  %v4932_v31 = vld [vmem:[#allocation6 + $0xc8] ss:$16 sps:$4 sm:$0xff]  }
 0x354   :  { %v3982_v25 = vpop.eup %3981 }
 0x355   :  { %v912_v45 = vmul.f32 %v3982_v25, %v907_v43 }
 0x356   :  { %1047 = vmatpush1.bf16.msra.mxu0 %v4576_v30  ;;  %1088 = vmatpush1.bf16.msra.mxu1 %v4582_v32  ;;  %v4928_v30 = vld [vmem:[#allocation6 + $0xcc] ss:$16 sps:$4 sm:$0xff]  }
 0x357   :  { %v1031_v27 = vpack.c.bf16 %v912_v45, %v912_v45  ;;  %1150 = vmatprep.subr.bf16.mxu0 %v4895_v46  ;;  %1191 = vmatprep.subr.bf16.mxu1 %v4898_v47  ;;  %v4936_v32 = vld [vmem:[#allocation6 + $0xec] ss:$16 sps:$4 sm:$0xff]  }
 0x359   :  { %1065 = vmatmul.mubr.bf16.vlgmr.msra.gmra.mrb[28].mxu0 %v1031_v27  ;;  %1106 = vmatmul.mubr.bf16.vlgmr.msra.gmra.mrb[28].mxu1 %v1031_v27 }
 0x35a   :  { %1151 = vmatpush1.bf16.msra.mxu0 %v4811_v3  ;;  %1192 = vmatpush1.bf16.msra.mxu1 %v4814_v5 }
 0x35b   :  { %1152 = vmatprep.subr.bf16.mxu0 %v4817_v6  ;;  %1193 = vmatprep.subr.bf16.mxu1 %v4820_v7 }
 0x35c   :  { %1182 = vmatprep.mubr.bf16.mxu0 %v4445_v0  ;;  %1223 = vmatprep.mubr.bf16.mxu1 %v4445_v0 }
 0x35e   :  { %1153 = vmatpush1.bf16.msra.mxu0 %v4825_v9  ;;  %1194 = vmatpush1.bf16.msra.mxu1 %v4828_v10 }
 0x35f   :  { %1154 = vmatprep.subr.bf16.mxu0 %v4831_v11  ;;  %1195 = vmatprep.subr.bf16.mxu1 %v4834_v12 }
 0x362   :  { %1155 = vmatpush1.bf16.msra.mxu0 %v4837_v17  ;;  %1196 = vmatpush1.bf16.msra.mxu1 %v4840_v18 }
 0x363   :  { %1156 = vmatprep.subr.bf16.mxu0 %v4843_v1  ;;  %1197 = vmatprep.subr.bf16.mxu1 %v4846_v4 }
 0x366   :  { %1157 = vmatpush1.bf16.msra.mxu0 %v4850_v24  ;;  %1198 = vmatpush1.bf16.msra.mxu1 %v4853_v26 }
 0x367   :  { %1158 = vmatprep.subr.bf16.mxu0 %v4856_v28  ;;  %1199 = vmatprep.subr.bf16.mxu1 %v4859_v62 }
 0x36a   :  { %1159 = vmatpush1.bf16.msra.mxu0 %v4865_v56  ;;  %1200 = vmatpush1.bf16.msra.mxu1 %v4868_v33 }
 0x36b   :  { %1160 = vmatprep.subr.bf16.mxu0 %v4871_v34  ;;  %1201 = vmatprep.subr.bf16.mxu1 %v4874_v36 }
 0x36e   :  { %1161 = vmatpush1.bf16.msra.mxu0 %v4877_v38  ;;  %1202 = vmatpush1.bf16.msra.mxu1 %v4924_v29 }
 0x36f   :  { %1162 = vmatprep.subr.bf16.mxu0 %v4881_v41  ;;  %1203 = vmatprep.subr.bf16.mxu1 %v4928_v30 }
 0x372   :  { %1163 = vmatpush1.bf16.msra.mxu0 %v4885_v42  ;;  %1204 = vmatpush1.bf16.msra.mxu1 %v4932_v31 }
 0x373   :  { %1164 = vmatprep.subr.bf16.mxu0 %v4889_v44  ;;  %1205 = vmatprep.subr.bf16.mxu1 %v4936_v32 }
 0x376   :  { %1165 = vmatpush1.bf16.msra.mxu0 %v4939_v49  ;;  %1206 = vmatpush1.bf16.msra.mxu1 %v4942_v50 }
 0x377   :  { %1255 = vmatprep.subr.bf16.mxu0 %v4895_v46  ;;  %1296 = vmatprep.subr.bf16.mxu1 %v4898_v47 }
 0x40c   :  { %v961_v54 = vpop.f32.mrb[24].mxu0  ;;  %v1002_v55 = vpop.f32.mrb[24].mxu1 }
 0x40d   :  { %v1009_v40 = vadd.f32 %v961_v54, %v918_v52  ;;  %v963_v58 = vpop.f32.mrb[25].mxu0  ;;  %v1004_v59 = vpop.f32.mrb[25].mxu1  ;;  %v1011_v16 = vadd.f32 %v1002_v55, %v920_v57  ;;  %v922_v54 = vunpack.c.l.bf16 %v916_v48  ;;  %v923_v57 = vunpack.c.h.bf16 %v916_v48 }
 0x40e   :  { %v1010_v60 = vadd.f32 %v963_v58, %v919_v53  ;;  %v965_v61 = vpop.f32.mrb[26].mxu0  ;;  %v1006_v2 = vpop.f32.mrb[26].mxu1  ;;  %v1012_v20 = vadd.f32 %v1004_v59, %v921_v19 }
 0x40f   :  { %v1013_v8 = vmul.f32 0.5, %v1009_v40  ;;  %v966_v13 = vpop.f32.mrb[27].mxu0  ;;  %v1007_v14 = vpop.f32.mrb[27].mxu1  ;;  %v917_v40 = vld [vmem:[#allocation3 + $0x78] sm:$0xff] }
 0x410   :  { %v1017_v15 = vmul.f32 0.5, %v1010_v60  ;;  %v1022_v21 = vmul.f32 0.5, %v1012_v20  ;;  %v924_v61 = vunpack.c.l.bf16 %v917_v40 }
 0x411   :  { %3983 = vtanh.f32 %v1013_v8 }
 0x412   :  { %3985 = vtanh.f32 %v1017_v15 }
 0x413   :  { %3987 = vtanh.f32 %v1011_v16 }
 0x414   :  { %3989 = vtanh.f32 %v1022_v21 }
 0x41b   :  { %v3984_v22 = vpop.eup %3983 }
 0x41c   :  { %v3986_v23 = vpop.eup %3985  ;;  %v1015_v37 = vmul.f32 0.5, %v3984_v22 }
 0x41d   :  { %v1019_v39 = vmul.f32 0.5, %v3986_v23  ;;  %v3988_v25 = vpop.eup %3987 }
 0x41e   :  { %v1016_v43 = vadd.f32 0.5, %v1015_v37  ;;  %v3990_v53 = vpop.eup %3989 }
 0x41f   :  { %v1020_v45 = vadd.f32 0.5, %v1019_v39  ;;  %v1024_v55 = vmul.f32 0.5, %v3990_v53  ;;  %v925_v39 = vunpack.c.h.bf16 %v917_v40 }
 0x420   :  { %v1027_v27 = vmul.f32 %v3988_v25, %v1016_v43 }
 0x421   :  { %v1026_v51 = vmul.f32 %v1020_v45, %v4808_v35  ;;  %v1025_v13 = vadd.f32 0.5, %v1024_v55 }
 0x423   :  { %v4948_v52 = vadd.f32 %v1027_v27, %v1026_v51 }
 0x425   :  { %3991 = vtanh.f32 %v4948_v52 }
 0x42c   :  { %v1066_v58 = vpop.f32.mrb[28].mxu0  ;;  %v1107_v59 = vpop.f32.mrb[28].mxu1 }
 0x42d   :  { %v1114_v60 = vadd.f32 %v1066_v58, %v922_v54  ;;  %v1068_v2 = vpop.f32.mrb[29].mxu0  ;;  %v1109_v8 = vpop.f32.mrb[29].mxu1  ;;  %v1116_v37 = vadd.f32 %v1107_v59, %v924_v61 }
 0x42e   :  { %v1115_v14 = vadd.f32 %v1068_v2, %v923_v57  ;;  %v1070_v15 = vpop.f32.mrb[30].mxu0  ;;  %v1111_v35 = vpop.f32.mrb[30].mxu1  ;;  %v1117_v25 = vadd.f32 %v1109_v8, %v925_v39 }
 0x42f   :  { %v3992_v16 = vpop.eup %3991  ;;  %v1118_v19 = vmul.f32 0.5, %v1114_v60  ;;  %v1071_v20 = vpop.f32.mrb[31].mxu0  ;;  %v1138_v35 = vld [vmem:[#allocation3 + $0x88] sm:$0xff] }
 0x430   :  { %v1112_v21 = vpop.f32.mrb[31].mxu1  ;;  %v1030_v22 = vmul.f32 %v3992_v16, %v1025_v13  ;;  %v1122_v23 = vmul.f32 0.5, %v1115_v14  ;;  %v1127_v45 = vmul.f32 0.5, %v1117_v25  ;;  %v1137_v14 = vld [vmem:[#allocation3 + $0x80] sm:$0xff] }
 0x431   :  { %3993 = vtanh.f32 %v1118_v19  ;;  %v1141_v15 = vunpack.c.l.bf16 %v1137_v14  ;;  %v1142_v16 = vunpack.c.h.bf16 %v1137_v14 }
 0x432   :  { %v1149_v43 = vpack.c.bf16 %v1030_v22, %v1030_v22  ;;  %3995 = vtanh.f32 %v1122_v23  ;;  %v1143_v22 = vunpack.c.l.bf16 %v1138_v35 }
 0x433   :  { %3997 = vtanh.f32 %v1116_v37 }
 0x434   :  { %1183 = vmatmul.mubr.bf16.vlgmr.msra.gmra.mrb[32].mxu0 %v1149_v43  ;;  %1224 = vmatmul.mubr.bf16.vlgmr.msra.gmra.mrb[32].mxu1 %v1149_v43  ;;  %3999 = vtanh.f32 %v1127_v45 }
 0x435   :  { %1256 = vmatpush1.bf16.msra.mxu0 %v4811_v3  ;;  %1297 = vmatpush1.bf16.msra.mxu1 %v4814_v5 }
 0x436   :  { %1257 = vmatprep.subr.bf16.mxu0 %v4817_v6  ;;  %1298 = vmatprep.subr.bf16.mxu1 %v4820_v7 }
 0x437   :  { %1287 = vmatprep.mubr.bf16.mxu0 %v4445_v0  ;;  %1328 = vmatprep.mubr.bf16.mxu1 %v4445_v0 }
 0x439   :  { %1258 = vmatpush1.bf16.msra.mxu0 %v4825_v9  ;;  %1299 = vmatpush1.bf16.msra.mxu1 %v4828_v10 }
 0x43a   :  { %1259 = vmatprep.subr.bf16.mxu0 %v4831_v11  ;;  %1300 = vmatprep.subr.bf16.mxu1 %v4834_v12 }
 0x43b   :  { %v3994_v27 = vpop.eup %3993 }
 0x43c   :  { %v3996_v51 = vpop.eup %3995  ;;  %v1120_v48 = vmul.f32 0.5, %v3994_v27 }
 0x43d   :  { %v1124_v53 = vmul.f32 0.5, %v3996_v51  ;;  %1260 = vmatpush1.bf16.msra.mxu0 %v4837_v17  ;;  %1301 = vmatpush1.bf16.msra.mxu1 %v4840_v18  ;;  %v3998_v55 = vpop.eup %3997 }
 0x43e   :  { %v1121_v54 = vadd.f32 0.5, %v1120_v48  ;;  %1261 = vmatprep.subr.bf16.mxu0 %v4843_v1  ;;  %1302 = vmatprep.subr.bf16.mxu1 %v4846_v4 }
 0x43f   :  { %v1125_v40 = vadd.f32 0.5, %v1124_v53 }
 0x440   :  { %v1132_v57 = vmul.f32 %v3998_v55, %v1121_v54  ;;  %v1144_v54 = vunpack.c.h.bf16 %v1138_v35  ;;  %v1139_v35 = vld [vmem:[#allocation3 + $0x90] sm:$0xff] }
 0x441   :  { %v1131_v58 = vmul.f32 %v1125_v40, %v4862_v63  ;;  %1262 = vmatpush1.bf16.msra.mxu0 %v4850_v24  ;;  %1303 = vmatpush1.bf16.msra.mxu1 %v4853_v26  ;;  %v4000_v63 = vpop.eup %3999 }
 0x442   :  { %1263 = vmatprep.subr.bf16.mxu0 %v4856_v28  ;;  %1304 = vmatprep.subr.bf16.mxu1 %v4859_v62  ;;  %v1129_v60 = vmul.f32 0.5, %v4000_v63 }
 0x443   :  { %v4970_v59 = vadd.f32 %v1132_v57, %v1131_v58 }
 0x444   :  { %v1130_v61 = vadd.f32 0.5, %v1129_v60 }
 0x445   :  { %4001 = vtanh.f32 %v4970_v59  ;;  %1264 = vmatpush1.bf16.msra.mxu0 %v4865_v56  ;;  %1305 = vmatpush1.bf16.msra.mxu1 %v4868_v33 }
 0x446   :  { %1265 = vmatprep.subr.bf16.mxu0 %v4871_v34  ;;  %1306 = vmatprep.subr.bf16.mxu1 %v4874_v36 }
 0x449   :  { %1266 = vmatpush1.bf16.msra.mxu0 %v4877_v38  ;;  %1307 = vmatpush1.bf16.msra.mxu1 %v4924_v29 }
 0x44a   :  { %1267 = vmatprep.subr.bf16.mxu0 %v4881_v41  ;;  %1308 = vmatprep.subr.bf16.mxu1 %v4928_v30 }
 0x44d   :  { %1268 = vmatpush1.bf16.msra.mxu0 %v4885_v42  ;;  %1309 = vmatpush1.bf16.msra.mxu1 %v4932_v31 }
 0x44e   :  { %1269 = vmatprep.subr.bf16.mxu0 %v4889_v44  ;;  %1310 = vmatprep.subr.bf16.mxu1 %v4936_v32 }
 0x44f   :  { %v4002_v2 = vpop.eup %4001 }
 0x450   :  { %v1135_v8 = vmul.f32 %v4002_v2, %v1130_v61 }
 0x451   :  { %1270 = vmatpush1.bf16.msra.mxu0 %v4939_v49  ;;  %1311 = vmatpush1.bf16.msra.mxu1 %v4942_v50 }
 0x452   :  { %v1254_v13 = vpack.c.bf16 %v1135_v8, %v1135_v8  ;;  %1373 = vmatprep.subr.bf16.mxu0 %v4895_v46  ;;  %1414 = vmatprep.subr.bf16.mxu1 %v4898_v47 }
 0x454   :  { %1288 = vmatmul.mubr.bf16.vlgmr.msra.gmra.mrb[36].mxu0 %v1254_v13  ;;  %1329 = vmatmul.mubr.bf16.vlgmr.msra.gmra.mrb[36].mxu1 %v1254_v13 }
 0x455   :  { %1374 = vmatpush1.bf16.msra.mxu0 %v4811_v3  ;;  %1415 = vmatpush1.bf16.msra.mxu1 %v4814_v5 }
 0x456   :  { %1375 = vmatprep.subr.bf16.mxu0 %v4817_v6  ;;  %1416 = vmatprep.subr.bf16.mxu1 %v4820_v7 }
 0x457   :  { %1405 = vmatprep.mubr.bf16.mxu0 %v4445_v0  ;;  %1446 = vmatprep.mubr.bf16.mxu1 %v4445_v0 }
 0x459   :  { %1376 = vmatpush1.bf16.msra.mxu0 %v4825_v9  ;;  %1417 = vmatpush1.bf16.msra.mxu1 %v4828_v10 }
 0x45a   :  { %1377 = vmatprep.subr.bf16.mxu0 %v4831_v11  ;;  %1418 = vmatprep.subr.bf16.mxu1 %v4834_v12 }
 0x45d   :  { %1378 = vmatpush1.bf16.msra.mxu0 %v4837_v17  ;;  %1419 = vmatpush1.bf16.msra.mxu1 %v4840_v18 }
 0x45e   :  { %1379 = vmatprep.subr.bf16.mxu0 %v4843_v1  ;;  %1420 = vmatprep.subr.bf16.mxu1 %v4846_v4 }
 0x461   :  { %1380 = vmatpush1.bf16.msra.mxu0 %v4850_v24  ;;  %1421 = vmatpush1.bf16.msra.mxu1 %v4853_v26 }
 0x462   :  { %1381 = vmatprep.subr.bf16.mxu0 %v4856_v28  ;;  %1422 = vmatprep.subr.bf16.mxu1 %v4859_v62 }
 0x465   :  { %1382 = vmatpush1.bf16.msra.mxu0 %v4865_v56  ;;  %1423 = vmatpush1.bf16.msra.mxu1 %v4868_v33 }
 0x466   :  { %1383 = vmatprep.subr.bf16.mxu0 %v4871_v34  ;;  %1424 = vmatprep.subr.bf16.mxu1 %v4874_v36 }
 0x469   :  { %1384 = vmatpush1.bf16.msra.mxu0 %v4877_v38  ;;  %1425 = vmatpush1.bf16.msra.mxu1 %v4924_v29 }
 0x46a   :  { %1385 = vmatprep.subr.bf16.mxu0 %v4881_v41  ;;  %1426 = vmatprep.subr.bf16.mxu1 %v4928_v30 }
 0x46d   :  { %1386 = vmatpush1.bf16.msra.mxu0 %v4885_v42  ;;  %1427 = vmatpush1.bf16.msra.mxu1 %v4932_v31 }
 0x46e   :  { %1387 = vmatprep.subr.bf16.mxu0 %v4889_v44  ;;  %1428 = vmatprep.subr.bf16.mxu1 %v4936_v32 }
 0x471   :  { %1388 = vmatpush1.bf16.msra.mxu0 %v4939_v49  ;;  %1429 = vmatpush1.bf16.msra.mxu1 %v4942_v50 }
 0x472   :  { %1478 = vmatprep.subr.bf16.mxu0 %v4895_v46  ;;  %1519 = vmatprep.subr.bf16.mxu1 %v4898_v47 }
 0x507   :  { %v1184_v19 = vpop.f32.mrb[32].mxu0  ;;  %v1225_v20 = vpop.f32.mrb[32].mxu1 }
 0x508   :  { %v1232_v21 = vadd.f32 %v1184_v19, %v1141_v15  ;;  %v1186_v23 = vpop.f32.mrb[33].mxu0  ;;  %v1227_v37 = vpop.f32.mrb[33].mxu1  ;;  %v1234_v53 = vadd.f32 %v1225_v20, %v1143_v22  ;;  %v1145_v19 = vunpack.c.l.bf16 %v1139_v35  ;;  %v1146_v22 = vunpack.c.h.bf16 %v1139_v35 }
 0x509   :  { %v1233_v39 = vadd.f32 %v1186_v23, %v1142_v16  ;;  %v1188_v43 = vpop.f32.mrb[34].mxu0  ;;  %v1229_v25 = vpop.f32.mrb[34].mxu1  ;;  %v1235_v55 = vadd.f32 %v1227_v37, %v1144_v54 }
 0x50a   :  { %v1236_v45 = vmul.f32 0.5, %v1232_v21  ;;  %v1189_v27 = vpop.f32.mrb[35].mxu0  ;;  %v1230_v51 = vpop.f32.mrb[35].mxu1  ;;  %v1140_v21 = vld [vmem:[#allocation3 + $0x98] sm:$0xff] }
 0x50b   :  { %v1240_v48 = vmul.f32 0.5, %v1233_v39  ;;  %v1245_v40 = vmul.f32 0.5, %v1235_v55  ;;  %v1147_v43 = vunpack.c.l.bf16 %v1140_v21 }
 0x50c   :  { %4003 = vtanh.f32 %v1236_v45 }
 0x50d   :  { %4005 = vtanh.f32 %v1240_v48 }
 0x50e   :  { %4007 = vtanh.f32 %v1234_v53 }
 0x50f   :  { %4009 = vtanh.f32 %v1245_v40 }
 0x516   :  { %v4004_v57 = vpop.eup %4003 }
 0x517   :  { %v4006_v58 = vpop.eup %4005  ;;  %v1238_v63 = vmul.f32 0.5, %v4004_v57 }
 0x518   :  { %v1242_v60 = vmul.f32 0.5, %v4006_v58  ;;  %v4008_v2 = vpop.eup %4007 }
 0x519   :  { %v1239_v61 = vadd.f32 0.5, %v1238_v63  ;;  %v4010_v16 = vpop.eup %4009 }
 0x51a   :  { %v1243_v8 = vadd.f32 0.5, %v1242_v60  ;;  %v1247_v20 = vmul.f32 0.5, %v4010_v16  ;;  %v1148_v60 = vunpack.c.h.bf16 %v1140_v21 }
 0x51b   :  { %v1250_v13 = vmul.f32 %v4008_v2, %v1239_v61 }
 0x51c   :  { %v1249_v14 = vmul.f32 %v1243_v8, %v4948_v52  ;;  %v1248_v27 = vadd.f32 0.5, %v1247_v20 }
 0x51e   :  { %v5024_v15 = vadd.f32 %v1250_v13, %v1249_v14 }
 0x520   :  { %4011 = vtanh.f32 %v5024_v15 }
 0x527   :  { %v1289_v23 = vpop.f32.mrb[36].mxu0  ;;  %v1330_v37 = vpop.f32.mrb[36].mxu1 }
 0x528   :  { %v1337_v39 = vadd.f32 %v1289_v23, %v1145_v19  ;;  %v1291_v25 = vpop.f32.mrb[37].mxu0  ;;  %v1332_v45 = vpop.f32.mrb[37].mxu1  ;;  %v1339_v63 = vadd.f32 %v1330_v37, %v1147_v43 }
 0x529   :  { %v1338_v51 = vadd.f32 %v1291_v25, %v1146_v22  ;;  %v1293_v48 = vpop.f32.mrb[38].mxu0  ;;  %v1334_v52 = vpop.f32.mrb[38].mxu1  ;;  %v1340_v2 = vadd.f32 %v1332_v45, %v1148_v60 }
 0x52a   :  { %v4012_v53 = vpop.eup %4011  ;;  %v1341_v54 = vmul.f32 0.5, %v1337_v39  ;;  %v1294_v55 = vpop.f32.mrb[39].mxu0  ;;  %v1361_v52 = vld [vmem:[#allocation3 + $0xa8] sm:$0xff] }
 0x52b   :  { %v1335_v40 = vpop.f32.mrb[39].mxu1  ;;  %v1253_v57 = vmul.f32 %v4012_v53, %v1248_v27  ;;  %v1345_v58 = vmul.f32 0.5, %v1338_v51  ;;  %v1350_v8 = vmul.f32 0.5, %v1340_v2  ;;  %v1360_v51 = vld [vmem:[#allocation3 + $0xa0] sm:$0xff] }
 0x52c   :  { %4013 = vtanh.f32 %v1341_v54  ;;  %v1364_v48 = vunpack.c.l.bf16 %v1360_v51  ;;  %v1365_v53 = vunpack.c.h.bf16 %v1360_v51 }
 0x52d   :  { %v1372_v61 = vpack.c.bf16 %v1253_v57, %v1253_v57  ;;  %4015 = vtanh.f32 %v1345_v58  ;;  %v1366_v57 = vunpack.c.l.bf16 %v1361_v52 }
 0x52e   :  { %4017 = vtanh.f32 %v1339_v63 }
 0x52f   :  { %1406 = vmatmul.mubr.bf16.vlgmr.msra.gmra.mrb[40].mxu0 %v1372_v61  ;;  %1447 = vmatmul.mubr.bf16.vlgmr.msra.gmra.mrb[40].mxu1 %v1372_v61  ;;  %4019 = vtanh.f32 %v1350_v8 }
 0x530   :  { %1479 = vmatpush1.bf16.msra.mxu0 %v4811_v3  ;;  %1520 = vmatpush1.bf16.msra.mxu1 %v4814_v5 }
 0x531   :  { %1480 = vmatprep.subr.bf16.mxu0 %v4817_v6  ;;  %1521 = vmatprep.subr.bf16.mxu1 %v4820_v7 }
 0x532   :  { %1510 = vmatprep.mubr.bf16.mxu0 %v4445_v0  ;;  %1551 = vmatprep.mubr.bf16.mxu1 %v4445_v0 }
 0x534   :  { %1481 = vmatpush1.bf16.msra.mxu0 %v4825_v9  ;;  %1522 = vmatpush1.bf16.msra.mxu1 %v4828_v10 }
 0x535   :  { %1482 = vmatprep.subr.bf16.mxu0 %v4831_v11  ;;  %1523 = vmatprep.subr.bf16.mxu1 %v4834_v12 }
 0x536   :  { %v4014_v13 = vpop.eup %4013 }
 0x537   :  { %v4016_v14 = vpop.eup %4015  ;;  %v1343_v35 = vmul.f32 0.5, %v4014_v13 }
 0x538   :  { %v1347_v16 = vmul.f32 0.5, %v4016_v14  ;;  %1483 = vmatpush1.bf16.msra.mxu0 %v4837_v17  ;;  %1524 = vmatpush1.bf16.msra.mxu1 %v4840_v18  ;;  %v4018_v20 = vpop.eup %4017 }
 0x539   :  { %v1344_v19 = vadd.f32 0.5, %v1343_v35  ;;  %1484 = vmatprep.subr.bf16.mxu0 %v4843_v1  ;;  %1525 = vmatprep.subr.bf16.mxu1 %v4846_v4 }
 0x53a   :  { %v1348_v21 = vadd.f32 0.5, %v1347_v16 }
 0x53b   :  { %v1355_v22 = vmul.f32 %v4018_v20, %v1344_v19  ;;  %v1367_v19 = vunpack.c.h.bf16 %v1361_v52  ;;  %v1362_v52 = vld [vmem:[#allocation3 + $0xb0] sm:$0xff] }
 0x53c   :  { %v1354_v23 = vmul.f32 %v1348_v21, %v4970_v59  ;;  %1485 = vmatpush1.bf16.msra.mxu0 %v4850_v24  ;;  %1526 = vmatpush1.bf16.msra.mxu1 %v4853_v26  ;;  %v4020_v59 = vpop.eup %4019 }
 0x53d   :  { %1486 = vmatprep.subr.bf16.mxu0 %v4856_v28  ;;  %1527 = vmatprep.subr.bf16.mxu1 %v4859_v62  ;;  %v1352_v39 = vmul.f32 0.5, %v4020_v59 }
 0x53e   :  { %v5046_v37 = vadd.f32 %v1355_v22, %v1354_v23 }
 0x53f   :  { %v1353_v43 = vadd.f32 0.5, %v1352_v39 }
 0x540   :  { %4021 = vtanh.f32 %v5046_v37  ;;  %1487 = vmatpush1.bf16.msra.mxu0 %v4865_v56  ;;  %1528 = vmatpush1.bf16.msra.mxu1 %v4868_v33 }
 0x541   :  { %1488 = vmatprep.subr.bf16.mxu0 %v4871_v34  ;;  %1529 = vmatprep.subr.bf16.mxu1 %v4874_v36 }
 0x544   :  { %1489 = vmatpush1.bf16.msra.mxu0 %v4877_v38  ;;  %1530 = vmatpush1.bf16.msra.mxu1 %v4924_v29 }
 0x545   :  { %1490 = vmatprep.subr.bf16.mxu0 %v4881_v41  ;;  %1531 = vmatprep.subr.bf16.mxu1 %v4928_v30 }
 0x548   :  { %1491 = vmatpush1.bf16.msra.mxu0 %v4885_v42  ;;  %1532 = vmatpush1.bf16.msra.mxu1 %v4932_v31 }
 0x549   :  { %1492 = vmatprep.subr.bf16.mxu0 %v4889_v44  ;;  %1533 = vmatprep.subr.bf16.mxu1 %v4936_v32 }
 0x54a   :  { %v4022_v25 = vpop.eup %4021 }
 0x54b   :  { %v1358_v45 = vmul.f32 %v4022_v25, %v1353_v43 }
 0x54c   :  { %1493 = vmatpush1.bf16.msra.mxu0 %v4939_v49  ;;  %1534 = vmatpush1.bf16.msra.mxu1 %v4942_v50 }
 0x54d   :  { %v1477_v27 = vpack.c.bf16 %v1358_v45, %v1358_v45  ;;  %1596 = vmatprep.subr.bf16.mxu0 %v4895_v46  ;;  %1637 = vmatprep.subr.bf16.mxu1 %v4898_v47 }
 0x54f   :  { %1511 = vmatmul.mubr.bf16.vlgmr.msra.gmra.mrb[44].mxu0 %v1477_v27  ;;  %1552 = vmatmul.mubr.bf16.vlgmr.msra.gmra.mrb[44].mxu1 %v1477_v27 }
 0x550   :  { %1597 = vmatpush1.bf16.msra.mxu0 %v4811_v3  ;;  %1638 = vmatpush1.bf16.msra.mxu1 %v4814_v5 }
 0x551   :  { %1598 = vmatprep.subr.bf16.mxu0 %v4817_v6  ;;  %1639 = vmatprep.subr.bf16.mxu1 %v4820_v7 }
 0x552   :  { %1628 = vmatprep.mubr.bf16.mxu0 %v4445_v0  ;;  %1669 = vmatprep.mubr.bf16.mxu1 %v4445_v0 }
 0x554   :  { %1599 = vmatpush1.bf16.msra.mxu0 %v4825_v9  ;;  %1640 = vmatpush1.bf16.msra.mxu1 %v4828_v10 }
 0x555   :  { %1600 = vmatprep.subr.bf16.mxu0 %v4831_v11  ;;  %1641 = vmatprep.subr.bf16.mxu1 %v4834_v12 }
 0x558   :  { %1601 = vmatpush1.bf16.msra.mxu0 %v4837_v17  ;;  %1642 = vmatpush1.bf16.msra.mxu1 %v4840_v18 }
 0x559   :  { %1602 = vmatprep.subr.bf16.mxu0 %v4843_v1  ;;  %1643 = vmatprep.subr.bf16.mxu1 %v4846_v4 }
 0x55c   :  { %1603 = vmatpush1.bf16.msra.mxu0 %v4850_v24  ;;  %1644 = vmatpush1.bf16.msra.mxu1 %v4853_v26 }
 0x55d   :  { %1604 = vmatprep.subr.bf16.mxu0 %v4856_v28  ;;  %1645 = vmatprep.subr.bf16.mxu1 %v4859_v62 }
 0x560   :  { %1605 = vmatpush1.bf16.msra.mxu0 %v4865_v56  ;;  %1646 = vmatpush1.bf16.msra.mxu1 %v4868_v33 }
 0x561   :  { %1606 = vmatprep.subr.bf16.mxu0 %v4871_v34  ;;  %1647 = vmatprep.subr.bf16.mxu1 %v4874_v36 }
 0x564   :  { %1607 = vmatpush1.bf16.msra.mxu0 %v4877_v38  ;;  %1648 = vmatpush1.bf16.msra.mxu1 %v4924_v29 }
 0x565   :  { %1608 = vmatprep.subr.bf16.mxu0 %v4881_v41  ;;  %1649 = vmatprep.subr.bf16.mxu1 %v4928_v30 }
 0x568   :  { %1609 = vmatpush1.bf16.msra.mxu0 %v4885_v42  ;;  %1650 = vmatpush1.bf16.msra.mxu1 %v4932_v31 }
 0x569   :  { %1610 = vmatprep.subr.bf16.mxu0 %v4889_v44  ;;  %1651 = vmatprep.subr.bf16.mxu1 %v4936_v32 }
 0x56c   :  { %1611 = vmatpush1.bf16.msra.mxu0 %v4939_v49  ;;  %1652 = vmatpush1.bf16.msra.mxu1 %v4942_v50 }
 0x56d   :  { %1701 = vmatprep.subr.bf16.mxu0 %v4895_v46  ;;  %1742 = vmatprep.subr.bf16.mxu1 %v4898_v47 }
 0x602   :  { %v1407_v54 = vpop.f32.mrb[40].mxu0  ;;  %v1448_v55 = vpop.f32.mrb[40].mxu1 }
 0x603   :  { %v1455_v40 = vadd.f32 %v1407_v54, %v1364_v48  ;;  %v1409_v58 = vpop.f32.mrb[41].mxu0  ;;  %v1450_v63 = vpop.f32.mrb[41].mxu1  ;;  %v1457_v16 = vadd.f32 %v1448_v55, %v1366_v57  ;;  %v1368_v54 = vunpack.c.l.bf16 %v1362_v52  ;;  %v1369_v57 = vunpack.c.h.bf16 %v1362_v52  ;;  %v5150_v52 = vld [vmem:[#allocation6 + $0x2c] ss:$16 sps:$4 sm:$0xff]  }
 0x604   :  { %v1456_v60 = vadd.f32 %v1409_v58, %v1365_v53  ;;  %v1411_v61 = vpop.f32.mrb[42].mxu0  ;;  %v1452_v2 = vpop.f32.mrb[42].mxu1  ;;  %v1458_v20 = vadd.f32 %v1450_v63, %v1367_v19 }
 0x605   :  { %v1459_v8 = vmul.f32 0.5, %v1455_v40  ;;  %v1412_v13 = vpop.f32.mrb[43].mxu0  ;;  %v1453_v14 = vpop.f32.mrb[43].mxu1  ;;  %v1363_v40 = vld [vmem:[#allocation3 + $0xb8] sm:$0xff] }
 0x606   :  { %v1463_v35 = vmul.f32 0.5, %v1456_v60  ;;  %v1468_v21 = vmul.f32 0.5, %v1458_v20  ;;  %v1370_v61 = vunpack.c.l.bf16 %v1363_v40 }
 0x607   :  { %4023 = vtanh.f32 %v1459_v8 }
 0x608   :  { %4025 = vtanh.f32 %v1463_v35 }
 0x609   :  { %4027 = vtanh.f32 %v1457_v16 }
 0x60a   :  { %4029 = vtanh.f32 %v1468_v21 }
 0x611   :  { %v4024_v22 = vpop.eup %4023 }
 0x612   :  { %v4026_v23 = vpop.eup %4025  ;;  %v1461_v59 = vmul.f32 0.5, %v4024_v22 }
 0x613   :  { %v1465_v39 = vmul.f32 0.5, %v4026_v23  ;;  %v4028_v25 = vpop.eup %4027 }
 0x614   :  { %v1462_v43 = vadd.f32 0.5, %v1461_v59  ;;  %v4030_v53 = vpop.eup %4029 }
 0x615   :  { %v1466_v45 = vadd.f32 0.5, %v1465_v39  ;;  %v1470_v55 = vmul.f32 0.5, %v4030_v53  ;;  %v1371_v39 = vunpack.c.h.bf16 %v1363_v40  ;;  %v5155_v53 = vld [vmem:[#allocation6 + $0x20] ss:$16 sps:$4 sm:$0xff]   ;;  %v5164_v40 = vld [vmem:[#allocation6 + $0x4c] ss:$16 sps:$4 sm:$0xff]  }
 0x616   :  { %v1473_v27 = vmul.f32 %v4028_v25, %v1462_v43 }
 0x617   :  { %v1472_v51 = vmul.f32 %v1466_v45, %v5024_v15  ;;  %v1471_v13 = vadd.f32 0.5, %v1470_v55  ;;  %v5161_v55 = vld [vmem:[#allocation6 + $0x44] ss:$16 sps:$4 sm:$0xff]  }
 0x619   :  { %v5100_v48 = vadd.f32 %v1473_v27, %v1472_v51 }
 0x61b   :  { %4031 = vtanh.f32 %v5100_v48 }
 0x622   :  { %v1512_v58 = vpop.f32.mrb[44].mxu0  ;;  %v1553_v63 = vpop.f32.mrb[44].mxu1 }
 0x623   :  { %v1560_v60 = vadd.f32 %v1512_v58, %v1368_v54  ;;  %v1514_v2 = vpop.f32.mrb[45].mxu0  ;;  %v1555_v8 = vpop.f32.mrb[45].mxu1  ;;  %v1562_v59 = vadd.f32 %v1553_v63, %v1370_v61  ;;  %v5158_v54 = vld [vmem:[#allocation6 + $0x28] ss:$16 sps:$4 sm:$0xff]   ;;  %v5173_v63 = vld [vmem:[#allocation6 + $0x64] ss:$16 sps:$4 sm:$0xff]  }
 0x624   :  { %v1561_v14 = vadd.f32 %v1514_v2, %v1369_v57  ;;  %v1516_v35 = vpop.f32.mrb[46].mxu0  ;;  %v1557_v15 = vpop.f32.mrb[46].mxu1  ;;  %v1563_v25 = vadd.f32 %v1555_v8, %v1371_v39  ;;  %v5167_v57 = vld [vmem:[#allocation6 + $0x40] ss:$16 sps:$4 sm:$0xff]   ;;  %v5170_v58 = vld [vmem:[#allocation6 + $0x48] ss:$16 sps:$4 sm:$0xff]  }
 0x625   :  { %v4032_v16 = vpop.eup %4031  ;;  %v1564_v19 = vmul.f32 0.5, %v1560_v60  ;;  %v1517_v20 = vpop.f32.mrb[47].mxu0  ;;  %v5176_v60 = vld [vmem:[#allocation6 + $0x6c] ss:$16 sps:$4 sm:$0xff]   ;;  %v5179_v61 = vld [vmem:[#allocation6 + $0x60] ss:$16 sps:$4 sm:$0xff]  }
 0x626   :  { %v1558_v21 = vpop.f32.mrb[47].mxu1  ;;  %v1476_v22 = vmul.f32 %v4032_v16, %v1471_v13  ;;  %v1568_v23 = vmul.f32 0.5, %v1561_v14  ;;  %v1573_v45 = vmul.f32 0.5, %v1563_v25  ;;  %v5182_v2 = vld [vmem:[#allocation6 + $0x68] ss:$16 sps:$4 sm:$0xff]  }
 0x627   :  { %4033 = vtanh.f32 %v1564_v19  ;;  %v5185_v8 = vld [vmem:[#allocation6 + $0x84] ss:$16 sps:$4 sm:$0xff]   ;;  %v5188_v13 = vld [vmem:[#allocation6 + $0x8c] ss:$16 sps:$4 sm:$0xff]  }
 0x628   :  { %v1595_v43 = vpack.c.bf16 %v1476_v22, %v1476_v22  ;;  %4035 = vtanh.f32 %v1568_v23 }
 0x629   :  { %4037 = vtanh.f32 %v1562_v59 }
 0x62a   :  { %1629 = vmatmul.mubr.bf16.vlgmr.msra.gmra.mrb[48].mxu0 %v1595_v43  ;;  %1670 = vmatmul.mubr.bf16.vlgmr.msra.gmra.mrb[48].mxu1 %v1595_v43  ;;  %4039 = vtanh.f32 %v1573_v45 }
 0x62b   :  { %1702 = vmatpush1.bf16.msra.mxu0 %v4811_v3  ;;  %1743 = vmatpush1.bf16.msra.mxu1 %v4814_v5 }
 0x62c   :  { %1703 = vmatprep.subr.bf16.mxu0 %v4817_v6  ;;  %1744 = vmatprep.subr.bf16.mxu1 %v4820_v7 }
 0x62d   :  { %1733 = vmatprep.mubr.bf16.mxu0 %v4445_v0  ;;  %1774 = vmatprep.mubr.bf16.mxu1 %v4445_v0 }
 0x62f   :  { %1704 = vmatpush1.bf16.msra.mxu0 %v4825_v9  ;;  %1745 = vmatpush1.bf16.msra.mxu1 %v4828_v10 }
 0x630   :  { %1705 = vmatprep.subr.bf16.mxu0 %v4831_v11  ;;  %1746 = vmatprep.subr.bf16.mxu1 %v4834_v12 }
 0x631   :  { %v4034_v3 = vpop.eup %4033 }
 0x632   :  { %v4036_v27 = vpop.eup %4035  ;;  %v1566_v5 = vmul.f32 0.5, %v4034_v3 }
 0x633   :  { %v1570_v51 = vmul.f32 0.5, %v4036_v27  ;;  %1706 = vmatpush1.bf16.msra.mxu0 %v4837_v17  ;;  %1747 = vmatpush1.bf16.msra.mxu1 %v4840_v18  ;;  %v4038_v7 = vpop.eup %4037  ;;  %v1585_v27 = vld [vmem:[#allocation3 + $0xd0] sm:$0xff] }
 0x634   :  { %v1567_v6 = vadd.f32 0.5, %v1566_v5  ;;  %1707 = vmatprep.subr.bf16.mxu0 %v4843_v1  ;;  %1748 = vmatprep.subr.bf16.mxu1 %v4846_v4  ;;  %v4040_v17 = vpop.eup %4039 }
 0x635   :  { %v1571_v9 = vadd.f32 0.5, %v1570_v51  ;;  %v1575_v18 = vmul.f32 0.5, %v4040_v17  ;;  %v1591_v51 = vunpack.c.l.bf16 %v1585_v27 }
 0x636   :  { %v1578_v10 = vmul.f32 %v4038_v7, %v1567_v6  ;;  %v1586_v7 = vld [vmem:[#allocation3 + $0xd8] sm:$0xff] }
 0x637   :  { %v1577_v11 = vmul.f32 %v1571_v9, %v5046_v37  ;;  %1708 = vmatpush1.bf16.msra.mxu0 %v4850_v24  ;;  %1749 = vmatpush1.bf16.msra.mxu1 %v4853_v26  ;;  %v1576_v1 = vadd.f32 0.5, %v1575_v18  ;;  %v5147_v37 = vld [vmem:[#allocation6 + $0x24] ss:$16 sps:$4 sm:$0xff]   ;;  %v1592_v9 = vunpack.c.h.bf16 %v1585_v27  ;;  %v1593_v18 = vunpack.c.l.bf16 %v1586_v7  ;;  %v5254_v27 = vld [vmem:[#allocation6 + $0xcc] ss:$16 sps:$4 sm:$0xff]  }
 0x638   :  { %1709 = vmatprep.subr.bf16.mxu0 %v4856_v28  ;;  %1750 = vmatprep.subr.bf16.mxu1 %v4859_v62  ;;  %v5141_v28 = vld [vmem:[#allocation6] ss:$16 sps:$4 sm:$0xff]   ;;  %v5144_v62 = vld [vmem:[#allocation6 + $0x8] ss:$16 sps:$4 sm:$0xff]  }
 0x639   :  { %v5122_v12 = vadd.f32 %v1578_v10, %v1577_v11 }
 0x63b   :  { %4041 = vtanh.f32 %v5122_v12  ;;  %1710 = vmatpush1.bf16.msra.mxu0 %v4865_v56  ;;  %1751 = vmatpush1.bf16.msra.mxu1 %v4868_v33 }
 0x63c   :  { %1711 = vmatprep.subr.bf16.mxu0 %v4871_v34  ;;  %1752 = vmatprep.subr.bf16.mxu1 %v4874_v36 }
 0x63f   :  { %1712 = vmatpush1.bf16.msra.mxu0 %v4877_v38  ;;  %1753 = vmatpush1.bf16.msra.mxu1 %v4924_v29 }
 0x640   :  { %1713 = vmatprep.subr.bf16.mxu0 %v4881_v41  ;;  %1754 = vmatprep.subr.bf16.mxu1 %v4928_v30 }
 0x643   :  { %1714 = vmatpush1.bf16.msra.mxu0 %v4885_v42  ;;  %1755 = vmatpush1.bf16.msra.mxu1 %v4932_v31 }
 0x644   :  { %1715 = vmatprep.subr.bf16.mxu0 %v4889_v44  ;;  %1756 = vmatprep.subr.bf16.mxu1 %v4936_v32 }
 0x645   :  { %v4042_v4 = vpop.eup %4041 }
 0x646   :  { %v1581_v24 = vmul.f32 %v4042_v4, %v1576_v1 }
 0x647   :  { %1716 = vmatpush1.bf16.msra.mxu0 %v4939_v49  ;;  %1757 = vmatpush1.bf16.msra.mxu1 %v4942_v50 }
 0x648   :  { %v1700_v26 = vpack.c.bf16 %v1581_v24, %v1581_v24  ;;  %1819 = vmatprep.subr.bf16.mxu0 %v4895_v46  ;;  %1860 = vmatprep.subr.bf16.mxu1 %v4898_v47 }
 0x64a   :  { %1734 = vmatmul.mubr.bf16.vlgmr.msra.gmra.mrb[52].mxu0 %v1700_v26  ;;  %1775 = vmatmul.mubr.bf16.vlgmr.msra.gmra.mrb[52].mxu1 %v1700_v26 }
 0x64b   :  { %1820 = vmatpush1.bf16.msra.mxu0 %v5141_v28  ;;  %1861 = vmatpush1.bf16.msra.mxu1 %v5144_v62 }
 0x64c   :  { %1821 = vmatprep.subr.bf16.mxu0 %v5147_v37  ;;  %1862 = vmatprep.subr.bf16.mxu1 %v5150_v52 }
 0x64d   :  { %1851 = vmatprep.mubr.bf16.mxu0 %v4445_v0  ;;  %1892 = vmatprep.mubr.bf16.mxu1 %v4445_v0 }
 0x64f   :  { %1822 = vmatpush1.bf16.msra.mxu0 %v5155_v53  ;;  %1863 = vmatpush1.bf16.msra.mxu1 %v5158_v54 }
 0x650   :  { %1823 = vmatprep.subr.bf16.mxu0 %v5161_v55  ;;  %1864 = vmatprep.subr.bf16.mxu1 %v5164_v40 }
 0x653   :  { %1824 = vmatpush1.bf16.msra.mxu0 %v5167_v57  ;;  %1865 = vmatpush1.bf16.msra.mxu1 %v5170_v58 }
 0x654   :  { %1825 = vmatprep.subr.bf16.mxu0 %v5173_v63  ;;  %1866 = vmatprep.subr.bf16.mxu1 %v5176_v60 }
 0x657   :  { %1826 = vmatpush1.bf16.msra.mxu0 %v5179_v61  ;;  %1867 = vmatpush1.bf16.msra.mxu1 %v5182_v2 }
 0x658   :  { %1827 = vmatprep.subr.bf16.mxu0 %v5185_v8  ;;  %1868 = vmatprep.subr.bf16.mxu1 %v5188_v13 }
 0x65b   :  { %1828 = vmatpush1.bf16.msra.mxu0 %v4865_v56  ;;  %1869 = vmatpush1.bf16.msra.mxu1 %v4868_v33  ;;  %v1583_v56 = vld [vmem:[#allocation3 + $0xc0] sm:$0xff] }
 0x65c   :  { %1829 = vmatprep.subr.bf16.mxu0 %v4871_v34  ;;  %1870 = vmatprep.subr.bf16.mxu1 %v4874_v36  ;;  %v1587_v33 = vunpack.c.l.bf16 %v1583_v56  ;;  %v1584_v34 = vld [vmem:[#allocation3 + $0xc8] sm:$0xff]  ;;  %v1588_v36 = vunpack.c.h.bf16 %v1583_v56 }
 0x65f   :  { %1830 = vmatpush1.bf16.msra.mxu0 %v4877_v38  ;;  %1871 = vmatpush1.bf16.msra.mxu1 %v4924_v29  ;;  %v1589_v29 = vunpack.c.l.bf16 %v1584_v34 }
 0x660   :  { %1831 = vmatprep.subr.bf16.mxu0 %v4881_v41  ;;  %1872 = vmatprep.subr.bf16.mxu1 %v4928_v30 }
 0x663   :  { %1832 = vmatpush1.bf16.msra.mxu0 %v4885_v42  ;;  %1873 = vmatpush1.bf16.msra.mxu1 %v4932_v31 }
 0x664   :  { %1833 = vmatprep.subr.bf16.mxu0 %v4889_v44  ;;  %1874 = vmatprep.subr.bf16.mxu1 %v4936_v32 }
 0x667   :  { %1834 = vmatpush1.bf16.msra.mxu0 %v4939_v49  ;;  %1875 = vmatpush1.bf16.msra.mxu1 %v4942_v50 }
 0x668   :  { %1924 = vmatprep.subr.bf16.mxu0 %v4895_v46  ;;  %1965 = vmatprep.subr.bf16.mxu1 %v4898_v47  ;;  %v1590_v47 = vunpack.c.h.bf16 %v1584_v34 }
 0x6fd   :  { %v1630_v38 = vpop.f32.mrb[48].mxu0  ;;  %v1671_v41 = vpop.f32.mrb[48].mxu1 }
 0x6fe   :  { %v1678_v42 = vadd.f32 %v1630_v38, %v1587_v33  ;;  %v1632_v30 = vpop.f32.mrb[49].mxu0  ;;  %v1673_v44 = vpop.f32.mrb[49].mxu1  ;;  %v1680_v46 = vadd.f32 %v1671_v41, %v1589_v29 }
 0x6ff   :  { %v1679_v31 = vadd.f32 %v1632_v30, %v1588_v36  ;;  %v1634_v32 = vpop.f32.mrb[50].mxu0  ;;  %v1675_v14 = vpop.f32.mrb[50].mxu1  ;;  %v1681_v16 = vadd.f32 %v1673_v44, %v1590_v47  ;;  %v1594_v30 = vunpack.c.h.bf16 %v1586_v7  ;;  %v5263_v7 = vld [vmem:[#allocation6 + $0xe4] ss:$16 sps:$4 sm:$0xff]  }
 0x700   :  { %v1682_v49 = vmul.f32 0.5, %v1678_v42  ;;  %v1635_v35 = vpop.f32.mrb[51].mxu0  ;;  %v1676_v50 = vpop.f32.mrb[51].mxu1 }
 0x701   :  { %v1686_v15 = vmul.f32 0.5, %v1679_v31  ;;  %v1691_v19 = vmul.f32 0.5, %v1681_v16 }
 0x702   :  { %4043 = vtanh.f32 %v1682_v49 }
 0x703   :  { %4045 = vtanh.f32 %v1686_v15 }
 0x704   :  { %4047 = vtanh.f32 %v1680_v46 }
 0x705   :  { %4049 = vtanh.f32 %v1691_v19 }
 0x70c   :  { %v4044_v20 = vpop.eup %4043 }
 0x70d   :  { %v4046_v21 = vpop.eup %4045  ;;  %v1684_v22 = vmul.f32 0.5, %v4044_v20 }
 0x70e   :  { %v1688_v23 = vmul.f32 0.5, %v4046_v21  ;;  %v4048_v39 = vpop.eup %4047  ;;  %v5233_v21 = vld [vmem:[#allocation6 + $0x80] ss:$16 sps:$4 sm:$0xff]  }
 0x70f   :  { %v1685_v59 = vadd.f32 0.5, %v1684_v22  ;;  %v4050_v5 = vpop.eup %4049  ;;  %v5236_v22 = vld [vmem:[#allocation6 + $0x88] ss:$16 sps:$4 sm:$0xff]  }
 0x710   :  { %v1689_v43 = vadd.f32 0.5, %v1688_v23  ;;  %v1693_v6 = vmul.f32 0.5, %v4050_v5  ;;  %v5242_v23 = vld [vmem:[#allocation6 + $0xac] ss:$16 sps:$4 sm:$0xff]   ;;  %v5257_v5 = vld [vmem:[#allocation6 + $0xc0] ss:$16 sps:$4 sm:$0xff]  }
 0x711   :  { %v1696_v25 = vmul.f32 %v4048_v39, %v1685_v59  ;;  %v5245_v39 = vld [vmem:[#allocation6 + $0xa0] ss:$16 sps:$4 sm:$0xff]  }
 0x712   :  { %v1695_v45 = vmul.f32 %v1689_v43, %v5100_v48  ;;  %v1694_v24 = vadd.f32 0.5, %v1693_v6  ;;  %v5248_v43 = vld [vmem:[#allocation6 + $0xa8] ss:$16 sps:$4 sm:$0xff]  }
 0x714   :  { %v5208_v3 = vadd.f32 %v1696_v25, %v1695_v45  ;;  %v5251_v45 = vld [vmem:[#allocation6 + $0xc4] ss:$16 sps:$4 sm:$0xff]  }
 0x716   :  { %4051 = vtanh.f32 %v5208_v3 }
 0x71d   :  { %v1735_v10 = vpop.f32.mrb[52].mxu0  ;;  %v1776_v11 = vpop.f32.mrb[52].mxu1 }
 0x71e   :  { %v1783_v17 = vadd.f32 %v1735_v10, %v1591_v51  ;;  %v1737_v1 = vpop.f32.mrb[53].mxu0  ;;  %v1778_v4 = vpop.f32.mrb[53].mxu1  ;;  %v1785_v29 = vadd.f32 %v1776_v11, %v1593_v18  ;;  %v5260_v51 = vld [vmem:[#allocation6 + $0xc8] ss:$16 sps:$4 sm:$0xff]  }
 0x71f   :  { %v1784_v26 = vadd.f32 %v1737_v1, %v1592_v9  ;;  %v1739_v56 = vpop.f32.mrb[54].mxu0  ;;  %v1780_v48 = vpop.f32.mrb[54].mxu1  ;;  %v1786_v31 = vadd.f32 %v1778_v4, %v1594_v30  ;;  %v5266_v9 = vld [vmem:[#allocation6 + $0xec] ss:$16 sps:$4 sm:$0xff]   ;;  %v5272_v18 = vld [vmem:[#allocation6 + $0xe8] ss:$16 sps:$4 sm:$0xff]  }
 0x720   :  { %v4052_v33 = vpop.eup %4051  ;;  %v1787_v34 = vmul.f32 0.5, %v1783_v17  ;;  %v1740_v36 = vpop.f32.mrb[55].mxu0  ;;  %v5269_v17 = vld [vmem:[#allocation6 + $0xe0] ss:$16 sps:$4 sm:$0xff]   ;;  %v5275_v4 = vld [vmem:[#allocation6 + $0x4] ss:$16 sps:$4 sm:$0xff]  }
 0x721   :  { %v1781_v38 = vpop.f32.mrb[55].mxu1  ;;  %v1699_v41 = vmul.f32 %v4052_v33, %v1694_v24  ;;  %v1791_v42 = vmul.f32 0.5, %v1784_v26  ;;  %v1796_v32 = vmul.f32 0.5, %v1786_v31  ;;  %v5278_v24 = vld [vmem:[#allocation6 + $0xc] ss:$16 sps:$4 sm:$0xff]   ;;  %v1806_v26 = vld [vmem:[#allocation3 + $0xe0] sm:$0xff] }
 0x722   :  { %4053 = vtanh.f32 %v1787_v34  ;;  %v1810_v56 = vunpack.c.l.bf16 %v1806_v26  ;;  %v1807_v48 = vld [vmem:[#allocation3 + $0xe8] sm:$0xff]  ;;  %v1811_v33 = vunpack.c.h.bf16 %v1806_v26 }
 0x723   :  { %v1818_v44 = vpack.c.bf16 %v1699_v41, %v1699_v41  ;;  %4055 = vtanh.f32 %v1791_v42  ;;  %v1812_v41 = vunpack.c.l.bf16 %v1807_v48 }
 0x724   :  { %4057 = vtanh.f32 %v1785_v29 }
 0x725   :  { %1852 = vmatmul.mubr.bf16.vlgmr.msra.gmra.mrb[56].mxu0 %v1818_v44  ;;  %1893 = vmatmul.mubr.bf16.vlgmr.msra.gmra.mrb[56].mxu1 %v1818_v44  ;;  %4059 = vtanh.f32 %v1796_v32 }
 0x726   :  { %1925 = vmatpush1.bf16.msra.mxu0 %v5141_v28  ;;  %1966 = vmatpush1.bf16.msra.mxu1 %v5144_v62 }
 0x727   :  { %1926 = vmatprep.subr.bf16.mxu0 %v5147_v37  ;;  %1967 = vmatprep.subr.bf16.mxu1 %v5150_v52 }
 0x728   :  { %1956 = vmatprep.mubr.bf16.mxu0 %v4445_v0  ;;  %1997 = vmatprep.mubr.bf16.mxu1 %v4445_v0 }
 0x72a   :  { %1927 = vmatpush1.bf16.msra.mxu0 %v5155_v53  ;;  %1968 = vmatpush1.bf16.msra.mxu1 %v5158_v54 }
 0x72b   :  { %1928 = vmatprep.subr.bf16.mxu0 %v5161_v55  ;;  %1969 = vmatprep.subr.bf16.mxu1 %v5164_v40 }
 0x72c   :  { %v4054_v14 = vpop.eup %4053 }
 0x72d   :  { %v4056_v49 = vpop.eup %4055  ;;  %v1789_v35 = vmul.f32 0.5, %v4054_v14 }
 0x72e   :  { %v1793_v50 = vmul.f32 0.5, %v4056_v49  ;;  %1929 = vmatpush1.bf16.msra.mxu0 %v5167_v57  ;;  %1970 = vmatpush1.bf16.msra.mxu1 %v5170_v58  ;;  %v4058_v46 = vpop.eup %4057 }
 0x72f   :  { %v1790_v15 = vadd.f32 0.5, %v1789_v35  ;;  %1930 = vmatprep.subr.bf16.mxu0 %v5173_v63  ;;  %1971 = vmatprep.subr.bf16.mxu1 %v5176_v60  ;;  %v4060_v59 = vpop.eup %4059 }
 0x730   :  { %v1794_v47 = vadd.f32 0.5, %v1793_v50  ;;  %v1798_v25 = vmul.f32 0.5, %v4060_v59 }
 0x731   :  { %v1801_v16 = vmul.f32 %v4058_v46, %v1790_v15  ;;  %v1813_v15 = vunpack.c.h.bf16 %v1807_v48  ;;  %v1808_v48 = vld [vmem:[#allocation3 + $0xf0] sm:$0xff] }
 0x732   :  { %v1800_v19 = vmul.f32 %v1794_v47, %v5122_v12  ;;  %1931 = vmatpush1.bf16.msra.mxu0 %v5179_v61  ;;  %1972 = vmatpush1.bf16.msra.mxu1 %v5182_v2  ;;  %v5239_v12 = vld [vmem:[#allocation6 + $0xa4] ss:$16 sps:$4 sm:$0xff]   ;;  %v1799_v6 = vadd.f32 0.5, %v1798_v25 }
 0x733   :  { %1932 = vmatprep.subr.bf16.mxu0 %v5185_v8  ;;  %1973 = vmatprep.subr.bf16.mxu1 %v5188_v13 }
 0x734   :  { %v5230_v20 = vadd.f32 %v1801_v16, %v1800_v19 }
 0x736   :  { %4061 = vtanh.f32 %v5230_v20  ;;  %1933 = vmatpush1.bf16.msra.mxu0 %v5233_v21  ;;  %1974 = vmatpush1.bf16.msra.mxu1 %v5236_v22 }
 0x737   :  { %1934 = vmatprep.subr.bf16.mxu0 %v5239_v12  ;;  %1975 = vmatprep.subr.bf16.mxu1 %v5242_v23 }
 0x73a   :  { %1935 = vmatpush1.bf16.msra.mxu0 %v5245_v39  ;;  %1976 = vmatpush1.bf16.msra.mxu1 %v5248_v43 }
 0x73b   :  { %1936 = vmatprep.subr.bf16.mxu0 %v5251_v45  ;;  %1977 = vmatprep.subr.bf16.mxu1 %v5254_v27 }
 0x73e   :  { %1937 = vmatpush1.bf16.msra.mxu0 %v5257_v5  ;;  %1978 = vmatpush1.bf16.msra.mxu1 %v5260_v51 }
 0x73f   :  { %1938 = vmatprep.subr.bf16.mxu0 %v5263_v7  ;;  %1979 = vmatprep.subr.bf16.mxu1 %v5266_v9 }
 0x740   :  { %v4062_v10 = vpop.eup %4061 }
 0x741   :  { %v1804_v11 = vmul.f32 %v4062_v10, %v1799_v6 }
 0x742   :  { %1939 = vmatpush1.bf16.msra.mxu0 %v5269_v17  ;;  %1980 = vmatpush1.bf16.msra.mxu1 %v5272_v18 }
 0x743   :  { %v1923_v1 = vpack.c.bf16 %v1804_v11, %v1804_v11  ;;  %2042 = vmatprep.subr.bf16.mxu0 %v5275_v4  ;;  %2083 = vmatprep.subr.bf16.mxu1 %v5278_v24 }
 0x745   :  { %1957 = vmatmul.mubr.bf16.vlgmr.msra.gmra.mrb[60].mxu0 %v1923_v1  ;;  %1998 = vmatmul.mubr.bf16.vlgmr.msra.gmra.mrb[60].mxu1 %v1923_v1 }
 0x746   :  { %2043 = vmatpush1.bf16.msra.mxu0 %v5141_v28  ;;  %2084 = vmatpush1.bf16.msra.mxu1 %v5144_v62 }
 0x747   :  { %2044 = vmatprep.subr.bf16.mxu0 %v5147_v37  ;;  %2085 = vmatprep.subr.bf16.mxu1 %v5150_v52 }
 0x748   :  { %2074 = vmatprep.mubr.bf16.mxu0 %v4445_v0  ;;  %2115 = vmatprep.mubr.bf16.mxu1 %v4445_v0 }
 0x74a   :  { %2045 = vmatpush1.bf16.msra.mxu0 %v5155_v53  ;;  %2086 = vmatpush1.bf16.msra.mxu1 %v5158_v54 }
 0x74b   :  { %2046 = vmatprep.subr.bf16.mxu0 %v5161_v55  ;;  %2087 = vmatprep.subr.bf16.mxu1 %v5164_v40 }
 0x74e   :  { %2047 = vmatpush1.bf16.msra.mxu0 %v5167_v57  ;;  %2088 = vmatpush1.bf16.msra.mxu1 %v5170_v58 }
 0x74f   :  { %2048 = vmatprep.subr.bf16.mxu0 %v5173_v63  ;;  %2089 = vmatprep.subr.bf16.mxu1 %v5176_v60 }
 0x752   :  { %2049 = vmatpush1.bf16.msra.mxu0 %v5179_v61  ;;  %2090 = vmatpush1.bf16.msra.mxu1 %v5182_v2 }
 0x753   :  { %2050 = vmatprep.subr.bf16.mxu0 %v5185_v8  ;;  %2091 = vmatprep.subr.bf16.mxu1 %v5188_v13 }
 0x756   :  { %2051 = vmatpush1.bf16.msra.mxu0 %v5233_v21  ;;  %2092 = vmatpush1.bf16.msra.mxu1 %v5236_v22 }
 0x757   :  { %2052 = vmatprep.subr.bf16.mxu0 %v5239_v12  ;;  %2093 = vmatprep.subr.bf16.mxu1 %v5242_v23 }
 0x75a   :  { %2053 = vmatpush1.bf16.msra.mxu0 %v5245_v39  ;;  %2094 = vmatpush1.bf16.msra.mxu1 %v5248_v43 }
 0x75b   :  { %2054 = vmatprep.subr.bf16.mxu0 %v5251_v45  ;;  %2095 = vmatprep.subr.bf16.mxu1 %v5254_v27 }
 0x75e   :  { %2055 = vmatpush1.bf16.msra.mxu0 %v5257_v5  ;;  %2096 = vmatpush1.bf16.msra.mxu1 %v5260_v51 }
 0x75f   :  { %2056 = vmatprep.subr.bf16.mxu0 %v5263_v7  ;;  %2097 = vmatprep.subr.bf16.mxu1 %v5266_v9 }
 0x762   :  { %2057 = vmatpush1.bf16.msra.mxu0 %v5269_v17  ;;  %2098 = vmatpush1.bf16.msra.mxu1 %v5272_v18 }
 0x763   :  { %2147 = vmatprep.subr.bf16.mxu0 %v5275_v4  ;;  %2188 = vmatprep.subr.bf16.mxu1 %v5278_v24 }
 0x7f8   :  { %v1853_v34 = vpop.f32.mrb[56].mxu0  ;;  %v1894_v36 = vpop.f32.mrb[56].mxu1 }
 0x7f9   :  { %v1901_v38 = vadd.f32 %v1853_v34, %v1810_v56  ;;  %v1855_v42 = vpop.f32.mrb[57].mxu0  ;;  %v1896_v29 = vpop.f32.mrb[57].mxu1  ;;  %v1903_v50 = vadd.f32 %v1894_v36, %v1812_v41  ;;  %v1814_v34 = vunpack.c.l.bf16 %v1808_v48  ;;  %v1815_v41 = vunpack.c.h.bf16 %v1808_v48 }
 0x7fa   :  { %v1902_v30 = vadd.f32 %v1855_v42, %v1811_v33  ;;  %v1857_v44 = vpop.f32.mrb[58].mxu0  ;;  %v1898_v31 = vpop.f32.mrb[58].mxu1  ;;  %v1904_v46 = vadd.f32 %v1896_v29, %v1813_v15 }
 0x7fb   :  { %v1905_v32 = vmul.f32 0.5, %v1901_v38  ;;  %v1858_v14 = vpop.f32.mrb[59].mxu0  ;;  %v1899_v49 = vpop.f32.mrb[59].mxu1  ;;  %v1809_v38 = vld [vmem:[#allocation3 + $0xf8] sm:$0xff] }
 0x7fc   :  { %v1909_v35 = vmul.f32 0.5, %v1902_v30  ;;  %v1914_v47 = vmul.f32 0.5, %v1904_v46  ;;  %v1816_v44 = vunpack.c.l.bf16 %v1809_v38 }
 0x7fd   :  { %4063 = vtanh.f32 %v1905_v32 }
 0x7fe   :  { %4065 = vtanh.f32 %v1909_v35 }
 0x7ff   :  { %4067 = vtanh.f32 %v1903_v50 }
 0x800   :  { %4069 = vtanh.f32 %v1914_v47 }
 0x807   :  { %v4064_v16 = vpop.eup %4063 }
 0x808   :  { %v4066_v19 = vpop.eup %4065  ;;  %v1907_v59 = vmul.f32 0.5, %v4064_v16 }
 0x809   :  { %v1911_v25 = vmul.f32 0.5, %v4066_v19  ;;  %v4068_v10 = vpop.eup %4067 }
 0x80a   :  { %v1908_v6 = vadd.f32 0.5, %v1907_v59  ;;  %v4070_v33 = vpop.eup %4069 }
 0x80b   :  { %v1912_v11 = vadd.f32 0.5, %v1911_v25  ;;  %v1916_v36 = vmul.f32 0.5, %v4070_v33  ;;  %v1817_v25 = vunpack.c.h.bf16 %v1809_v38 }
 0x80c   :  { %v1919_v1 = vmul.f32 %v4068_v10, %v1908_v6 }
 0x80d   :  { %v1918_v26 = vmul.f32 %v1912_v11, %v5208_v3  ;;  %v1917_v14 = vadd.f32 0.5, %v1916_v36 }
 0x80f   :  { %v5316_v56 = vadd.f32 %v1919_v1, %v1918_v26 }
 0x811   :  { %4071 = vtanh.f32 %v5316_v56 }
 0x818   :  { %v1958_v42 = vpop.f32.mrb[60].mxu0  ;;  %v1999_v29 = vpop.f32.mrb[60].mxu1 }
 0x819   :  { %v2006_v30 = vadd.f32 %v1958_v42, %v1814_v34  ;;  %v1960_v31 = vpop.f32.mrb[61].mxu0  ;;  %v2001_v32 = vpop.f32.mrb[61].mxu1  ;;  %v2008_v59 = vadd.f32 %v1999_v29, %v1816_v44 }
 0x81a   :  { %v2007_v49 = vadd.f32 %v1960_v31, %v1815_v41  ;;  %v1962_v35 = vpop.f32.mrb[62].mxu0  ;;  %v2003_v3 = vpop.f32.mrb[62].mxu1  ;;  %v2009_v10 = vadd.f32 %v2001_v32, %v1817_v25 }
 0x81b   :  { %v4072_v50 = vpop.eup %4071  ;;  %v2010_v15 = vmul.f32 0.5, %v2006_v30  ;;  %v1963_v46 = vpop.f32.mrb[63].mxu0  ;;  %v2030_v3 = vld [vmem:[#allocation3 + $0x108] sm:$0xff] }
 0x81c   :  { %v2004_v47 = vpop.f32.mrb[63].mxu1  ;;  %v1922_v16 = vmul.f32 %v4072_v50, %v1917_v14  ;;  %v2014_v19 = vmul.f32 0.5, %v2007_v49  ;;  %v2019_v11 = vmul.f32 0.5, %v2009_v10  ;;  %v2029_v49 = vld [vmem:[#allocation3 + $0x100] sm:$0xff] }
 0x81d   :  { %4073 = vtanh.f32 %v2010_v15  ;;  %v2033_v35 = vunpack.c.l.bf16 %v2029_v49  ;;  %v2034_v50 = vunpack.c.h.bf16 %v2029_v49 }
 0x81e   :  { %v2041_v6 = vpack.c.bf16 %v1922_v16, %v1922_v16  ;;  %4075 = vtanh.f32 %v2014_v19  ;;  %v2035_v16 = vunpack.c.l.bf16 %v2030_v3 }
 0x81f   :  { %4077 = vtanh.f32 %v2008_v59 }
 0x820   :  { %2075 = vmatmul.mubr.bf16.vlgmr.msra.gmra.mrb[64].mxu0 %v2041_v6  ;;  %2116 = vmatmul.mubr.bf16.vlgmr.msra.gmra.mrb[64].mxu1 %v2041_v6  ;;  %4079 = vtanh.f32 %v2019_v11 }
 0x821   :  { %2148 = vmatpush1.bf16.msra.mxu0 %v5141_v28  ;;  %2189 = vmatpush1.bf16.msra.mxu1 %v5144_v62 }
 0x822   :  { %2149 = vmatprep.subr.bf16.mxu0 %v5147_v37  ;;  %2190 = vmatprep.subr.bf16.mxu1 %v5150_v52 }
 0x823   :  { %2179 = vmatprep.mubr.bf16.mxu0 %v4445_v0  ;;  %2220 = vmatprep.mubr.bf16.mxu1 %v4445_v0 }
 0x825   :  { %2150 = vmatpush1.bf16.msra.mxu0 %v5155_v53  ;;  %2191 = vmatpush1.bf16.msra.mxu1 %v5158_v54 }
 0x826   :  { %2151 = vmatprep.subr.bf16.mxu0 %v5161_v55  ;;  %2192 = vmatprep.subr.bf16.mxu1 %v5164_v40 }
 0x827   :  { %v4074_v1 = vpop.eup %4073 }
 0x828   :  { %v4076_v26 = vpop.eup %4075  ;;  %v2012_v48 = vmul.f32 0.5, %v4074_v1 }
 0x829   :  { %v2016_v33 = vmul.f32 0.5, %v4076_v26  ;;  %2152 = vmatpush1.bf16.msra.mxu0 %v5167_v57  ;;  %2193 = vmatpush1.bf16.msra.mxu1 %v5170_v58  ;;  %v4078_v36 = vpop.eup %4077 }
 0x82a   :  { %v2013_v34 = vadd.f32 0.5, %v2012_v48  ;;  %2153 = vmatprep.subr.bf16.mxu0 %v5173_v63  ;;  %2194 = vmatprep.subr.bf16.mxu1 %v5176_v60 }
 0x82b   :  { %v2017_v38 = vadd.f32 0.5, %v2016_v33 }
 0x82c   :  { %v2024_v41 = vmul.f32 %v4078_v36, %v2013_v34  ;;  %v2036_v34 = vunpack.c.h.bf16 %v2030_v3  ;;  %v2031_v3 = vld [vmem:[#allocation3 + $0x110] sm:$0xff] }
 0x82d   :  { %v2023_v42 = vmul.f32 %v2017_v38, %v5230_v20  ;;  %2154 = vmatpush1.bf16.msra.mxu0 %v5179_v61  ;;  %2195 = vmatpush1.bf16.msra.mxu1 %v5182_v2  ;;  %v4080_v20 = vpop.eup %4079 }
 0x82e   :  { %2155 = vmatprep.subr.bf16.mxu0 %v5185_v8  ;;  %2196 = vmatprep.subr.bf16.mxu1 %v5188_v13  ;;  %v2021_v30 = vmul.f32 0.5, %v4080_v20 }
 0x82f   :  { %v5338_v29 = vadd.f32 %v2024_v41, %v2023_v42 }
 0x830   :  { %v2022_v44 = vadd.f32 0.5, %v2021_v30 }
 0x831   :  { %4081 = vtanh.f32 %v5338_v29  ;;  %2156 = vmatpush1.bf16.msra.mxu0 %v5233_v21  ;;  %2197 = vmatpush1.bf16.msra.mxu1 %v5236_v22 }
 0x832   :  { %2157 = vmatprep.subr.bf16.mxu0 %v5239_v12  ;;  %2198 = vmatprep.subr.bf16.mxu1 %v5242_v23 }
 0x835   :  { %2158 = vmatpush1.bf16.msra.mxu0 %v5245_v39  ;;  %2199 = vmatpush1.bf16.msra.mxu1 %v5248_v43 }
 0x836   :  { %2159 = vmatprep.subr.bf16.mxu0 %v5251_v45  ;;  %2200 = vmatprep.subr.bf16.mxu1 %v5254_v27 }
 0x839   :  { %2160 = vmatpush1.bf16.msra.mxu0 %v5257_v5  ;;  %2201 = vmatpush1.bf16.msra.mxu1 %v5260_v51 }
 0x83a   :  { %2161 = vmatprep.subr.bf16.mxu0 %v5263_v7  ;;  %2202 = vmatprep.subr.bf16.mxu1 %v5266_v9 }
 0x83b   :  { %v4082_v31 = vpop.eup %4081 }
 0x83c   :  { %v2027_v32 = vmul.f32 %v4082_v31, %v2022_v44 }
 0x83d   :  { %2162 = vmatpush1.bf16.msra.mxu0 %v5269_v17  ;;  %2203 = vmatpush1.bf16.msra.mxu1 %v5272_v18 }
 0x83e   :  { %v2146_v14 = vpack.c.bf16 %v2027_v32, %v2027_v32  ;;  %2265 = vmatprep.subr.bf16.mxu0 %v5275_v4  ;;  %2306 = vmatprep.subr.bf16.mxu1 %v5278_v24 }
 0x840   :  { %2180 = vmatmul.mubr.bf16.vlgmr.msra.gmra.mrb[68].mxu0 %v2146_v14  ;;  %2221 = vmatmul.mubr.bf16.vlgmr.msra.gmra.mrb[68].mxu1 %v2146_v14 }
 0x841   :  { %2266 = vmatpush1.bf16.msra.mxu0 %v5141_v28  ;;  %2307 = vmatpush1.bf16.msra.mxu1 %v5144_v62 }
 0x842   :  { %2267 = vmatprep.subr.bf16.mxu0 %v5147_v37  ;;  %2308 = vmatprep.subr.bf16.mxu1 %v5150_v52 }
 0x843   :  { %2297 = vmatprep.mubr.bf16.mxu0 %v4445_v0  ;;  %2338 = vmatprep.mubr.bf16.mxu1 %v4445_v0 }
 0x845   :  { %2268 = vmatpush1.bf16.msra.mxu0 %v5155_v53  ;;  %2309 = vmatpush1.bf16.msra.mxu1 %v5158_v54 }
 0x846   :  { %2269 = vmatprep.subr.bf16.mxu0 %v5161_v55  ;;  %2310 = vmatprep.subr.bf16.mxu1 %v5164_v40 }
 0x849   :  { %2270 = vmatpush1.bf16.msra.mxu0 %v5167_v57  ;;  %2311 = vmatpush1.bf16.msra.mxu1 %v5170_v58 }
 0x84a   :  { %2271 = vmatprep.subr.bf16.mxu0 %v5173_v63  ;;  %2312 = vmatprep.subr.bf16.mxu1 %v5176_v60 }
 0x84d   :  { %2272 = vmatpush1.bf16.msra.mxu0 %v5179_v61  ;;  %2313 = vmatpush1.bf16.msra.mxu1 %v5182_v2 }
 0x84e   :  { %2273 = vmatprep.subr.bf16.mxu0 %v5185_v8  ;;  %2314 = vmatprep.subr.bf16.mxu1 %v5188_v13 }
 0x851   :  { %2274 = vmatpush1.bf16.msra.mxu0 %v5233_v21  ;;  %2315 = vmatpush1.bf16.msra.mxu1 %v5236_v22 }
 0x852   :  { %2275 = vmatprep.subr.bf16.mxu0 %v5239_v12  ;;  %2316 = vmatprep.subr.bf16.mxu1 %v5242_v23 }
 0x855   :  { %2276 = vmatpush1.bf16.msra.mxu0 %v5245_v39  ;;  %2317 = vmatpush1.bf16.msra.mxu1 %v5248_v43 }
 0x856   :  { %2277 = vmatprep.subr.bf16.mxu0 %v5251_v45  ;;  %2318 = vmatprep.subr.bf16.mxu1 %v5254_v27 }
 0x859   :  { %2278 = vmatpush1.bf16.msra.mxu0 %v5257_v5  ;;  %2319 = vmatpush1.bf16.msra.mxu1 %v5260_v51 }
 0x85a   :  { %2279 = vmatprep.subr.bf16.mxu0 %v5263_v7  ;;  %2320 = vmatprep.subr.bf16.mxu1 %v5266_v9 }
 0x85d   :  { %2280 = vmatpush1.bf16.msra.mxu0 %v5269_v17  ;;  %2321 = vmatpush1.bf16.msra.mxu1 %v5272_v18 }
 0x85e   :  { %2370 = vmatprep.subr.bf16.mxu0 %v5275_v4  ;;  %2411 = vmatprep.subr.bf16.mxu1 %v5278_v24 }
 0x8f3   :  { %v2076_v15 = vpop.f32.mrb[64].mxu0  ;;  %v2117_v46 = vpop.f32.mrb[64].mxu1 }
 0x8f4   :  { %v2124_v47 = vadd.f32 %v2076_v15, %v2033_v35  ;;  %v2078_v19 = vpop.f32.mrb[65].mxu0  ;;  %v2119_v59 = vpop.f32.mrb[65].mxu1  ;;  %v2126_v33 = vadd.f32 %v2117_v46, %v2035_v16  ;;  %v2037_v15 = vunpack.c.l.bf16 %v2031_v3  ;;  %v2038_v16 = vunpack.c.h.bf16 %v2031_v3 }
 0x8f5   :  { %v2125_v25 = vadd.f32 %v2078_v19, %v2034_v50  ;;  %v2080_v6 = vpop.f32.mrb[66].mxu0  ;;  %v2121_v10 = vpop.f32.mrb[66].mxu1  ;;  %v2127_v36 = vadd.f32 %v2119_v59, %v2036_v34 }
 0x8f6   :  { %v2128_v11 = vmul.f32 0.5, %v2124_v47  ;;  %v2081_v1 = vpop.f32.mrb[67].mxu0  ;;  %v2122_v26 = vpop.f32.mrb[67].mxu1  ;;  %v2032_v47 = vld [vmem:[#allocation3 + $0x118] sm:$0xff] }
 0x8f7   :  { %v2132_v48 = vmul.f32 0.5, %v2125_v25  ;;  %v2137_v38 = vmul.f32 0.5, %v2127_v36  ;;  %v2039_v6 = vunpack.c.l.bf16 %v2032_v47 }
 0x8f8   :  { %4083 = vtanh.f32 %v2128_v11 }
 0x8f9   :  { %4085 = vtanh.f32 %v2132_v48 }
 0x8fa   :  { %4087 = vtanh.f32 %v2126_v33 }
 0x8fb   :  { %4089 = vtanh.f32 %v2137_v38 }
 0x902   :  { %v4084_v41 = vpop.eup %4083 }
 0x903   :  { %v4086_v42 = vpop.eup %4085  ;;  %v2130_v20 = vmul.f32 0.5, %v4084_v41 }
 0x904   :  { %v2134_v30 = vmul.f32 0.5, %v4086_v42  ;;  %v4088_v31 = vpop.eup %4087 }
 0x905   :  { %v2131_v44 = vadd.f32 0.5, %v2130_v20  ;;  %v4090_v50 = vpop.eup %4089 }
 0x906   :  { %v2135_v32 = vadd.f32 0.5, %v2134_v30  ;;  %v2139_v46 = vmul.f32 0.5, %v4090_v50  ;;  %v2040_v30 = vunpack.c.h.bf16 %v2032_v47 }
 0x907   :  { %v2142_v14 = vmul.f32 %v4088_v31, %v2131_v44 }
 0x908   :  { %v2141_v49 = vmul.f32 %v2135_v32, %v5316_v56  ;;  %v2140_v1 = vadd.f32 0.5, %v2139_v46 }
 0x90a   :  { %v5392_v35 = vadd.f32 %v2142_v14, %v2141_v49 }
 0x90c   :  { %4091 = vtanh.f32 %v5392_v35 }
 0x913   :  { %v2181_v19 = vpop.f32.mrb[68].mxu0  ;;  %v2222_v59 = vpop.f32.mrb[68].mxu1 }
 0x914   :  { %v2229_v25 = vadd.f32 %v2181_v19, %v2037_v15  ;;  %v2183_v10 = vpop.f32.mrb[69].mxu0  ;;  %v2224_v11 = vpop.f32.mrb[69].mxu1  ;;  %v2231_v20 = vadd.f32 %v2222_v59, %v2039_v6 }
 0x915   :  { %v2230_v26 = vadd.f32 %v2183_v10, %v2038_v16  ;;  %v2185_v48 = vpop.f32.mrb[70].mxu0  ;;  %v2226_v56 = vpop.f32.mrb[70].mxu1  ;;  %v2232_v31 = vadd.f32 %v2224_v11, %v2040_v30 }
 0x916   :  { %v4092_v33 = vpop.eup %4091  ;;  %v2233_v34 = vmul.f32 0.5, %v2229_v25  ;;  %v2186_v36 = vpop.f32.mrb[71].mxu0 }
 0x917   :  { %v2227_v38 = vpop.f32.mrb[71].mxu1  ;;  %v2145_v41 = vmul.f32 %v4092_v33, %v2140_v1  ;;  %v2237_v42 = vmul.f32 0.5, %v2230_v26  ;;  %v2242_v32 = vmul.f32 0.5, %v2232_v31 }
 0x918   :  { %4093 = vtanh.f32 %v2233_v34 }
 0x919   :  { %v2264_v44 = vpack.c.bf16 %v2145_v41, %v2145_v41  ;;  %4095 = vtanh.f32 %v2237_v42 }
 0x91a   :  { %4097 = vtanh.f32 %v2231_v20 }
 0x91b   :  { %2298 = vmatmul.mubr.bf16.vlgmr.msra.gmra.mrb[72].mxu0 %v2264_v44  ;;  %2339 = vmatmul.mubr.bf16.vlgmr.msra.gmra.mrb[72].mxu1 %v2264_v44  ;;  %4099 = vtanh.f32 %v2242_v32 }
 0x91c   :  { %2371 = vmatpush1.bf16.msra.mxu0 %v5141_v28  ;;  %2412 = vmatpush1.bf16.msra.mxu1 %v5144_v62 }
 0x91d   :  { %2372 = vmatprep.subr.bf16.mxu0 %v5147_v37  ;;  %2413 = vmatprep.subr.bf16.mxu1 %v5150_v52 }
 0x91e   :  { %2402 = vmatprep.mubr.bf16.mxu0 %v4445_v0  ;;  %2443 = vmatprep.mubr.bf16.mxu1 %v4445_v0 }
 0x920   :  { %2373 = vmatpush1.bf16.msra.mxu0 %v5155_v53  ;;  %2414 = vmatpush1.bf16.msra.mxu1 %v5158_v54 }
 0x921   :  { %2374 = vmatprep.subr.bf16.mxu0 %v5161_v55  ;;  %2415 = vmatprep.subr.bf16.mxu1 %v5164_v40 }
 0x922   :  { %v4094_v14 = vpop.eup %4093 }
 0x923   :  { %v4096_v49 = vpop.eup %4095  ;;  %v2235_v3 = vmul.f32 0.5, %v4094_v14 }
 0x924   :  { %v2239_v50 = vmul.f32 0.5, %v4096_v49  ;;  %2375 = vmatpush1.bf16.msra.mxu0 %v5167_v57  ;;  %2416 = vmatpush1.bf16.msra.mxu1 %v5170_v58  ;;  %v4098_v46 = vpop.eup %4097  ;;  %v2254_v49 = vld [vmem:[#allocation3 + $0x130] sm:$0xff] }
 0x925   :  { %v2236_v15 = vadd.f32 0.5, %v2235_v3  ;;  %2376 = vmatprep.subr.bf16.mxu0 %v5173_v63  ;;  %2417 = vmatprep.subr.bf16.mxu1 %v5176_v60 }
 0x926   :  { %v2240_v47 = vadd.f32 0.5, %v2239_v50  ;;  %v2260_v50 = vunpack.c.l.bf16 %v2254_v49 }
 0x927   :  { %v2247_v16 = vmul.f32 %v4098_v46, %v2236_v15  ;;  %v2255_v46 = vld [vmem:[#allocation3 + $0x138] sm:$0xff] }
 0x928   :  { %v2246_v19 = vmul.f32 %v2240_v47, %v5338_v29  ;;  %2377 = vmatpush1.bf16.msra.mxu0 %v5179_v61  ;;  %2418 = vmatpush1.bf16.msra.mxu1 %v5182_v2  ;;  %v4100_v29 = vpop.eup %4099  ;;  %v2261_v47 = vunpack.c.h.bf16 %v2254_v49 }
 0x929   :  { %2378 = vmatprep.subr.bf16.mxu0 %v5185_v8  ;;  %2419 = vmatprep.subr.bf16.mxu1 %v5188_v13  ;;  %v2244_v25 = vmul.f32 0.5, %v4100_v29 }
 0x92a   :  { %v5414_v59 = vadd.f32 %v2247_v16, %v2246_v19 }
 0x92b   :  { %v2245_v6 = vadd.f32 0.5, %v2244_v25  ;;  %v2262_v25 = vunpack.c.l.bf16 %v2255_v46 }
 0x92c   :  { %4101 = vtanh.f32 %v5414_v59  ;;  %2379 = vmatpush1.bf16.msra.mxu0 %v5233_v21  ;;  %2420 = vmatpush1.bf16.msra.mxu1 %v5236_v22 }
 0x92d   :  { %2380 = vmatprep.subr.bf16.mxu0 %v5239_v12  ;;  %2421 = vmatprep.subr.bf16.mxu1 %v5242_v23 }
 0x930   :  { %2381 = vmatpush1.bf16.msra.mxu0 %v5245_v39  ;;  %2422 = vmatpush1.bf16.msra.mxu1 %v5248_v43 }
 0x931   :  { %2382 = vmatprep.subr.bf16.mxu0 %v5251_v45  ;;  %2423 = vmatprep.subr.bf16.mxu1 %v5254_v27 }
 0x934   :  { %2383 = vmatpush1.bf16.msra.mxu0 %v5257_v5  ;;  %2424 = vmatpush1.bf16.msra.mxu1 %v5260_v51 }
 0x935   :  { %2384 = vmatprep.subr.bf16.mxu0 %v5263_v7  ;;  %2425 = vmatprep.subr.bf16.mxu1 %v5266_v9 }
 0x936   :  { %v4102_v10 = vpop.eup %4101 }
 0x937   :  { %v2250_v11 = vmul.f32 %v4102_v10, %v2245_v6 }
 0x938   :  { %2385 = vmatpush1.bf16.msra.mxu0 %v5269_v17  ;;  %2426 = vmatpush1.bf16.msra.mxu1 %v5272_v18 }
 0x939   :  { %v2369_v1 = vpack.c.bf16 %v2250_v11, %v2250_v11  ;;  %2488 = vmatprep.subr.bf16.mxu0 %v5275_v4  ;;  %2529 = vmatprep.subr.bf16.mxu1 %v5278_v24 }
 0x93b   :  { %2403 = vmatmul.mubr.bf16.vlgmr.msra.gmra.mrb[76].mxu0 %v2369_v1  ;;  %2444 = vmatmul.mubr.bf16.vlgmr.msra.gmra.mrb[76].mxu1 %v2369_v1 }
 0x93c   :  { %2489 = vmatpush1.bf16.msra.mxu0 %v5141_v28  ;;  %2530 = vmatpush1.bf16.msra.mxu1 %v5144_v62  ;;  %v2252_v28 = vld [vmem:[#allocation3 + $0x120] sm:$0xff] }
 0x93d   :  { %2490 = vmatprep.subr.bf16.mxu0 %v5147_v37  ;;  %2531 = vmatprep.subr.bf16.mxu1 %v5150_v52  ;;  %v2256_v62 = vunpack.c.l.bf16 %v2252_v28  ;;  %v2253_v37 = vld [vmem:[#allocation3 + $0x128] sm:$0xff]  ;;  %v2257_v52 = vunpack.c.h.bf16 %v2252_v28 }
 0x93e   :  { %2520 = vmatprep.mubr.bf16.mxu0 %v4445_v0  ;;  %2561 = vmatprep.mubr.bf16.mxu1 %v4445_v0  ;;  %v2259_v56 = vunpack.c.h.bf16 %v2253_v37 }
 0x940   :  { %2491 = vmatpush1.bf16.msra.mxu0 %v5155_v53  ;;  %2532 = vmatpush1.bf16.msra.mxu1 %v5158_v54 }
 0x941   :  { %2492 = vmatprep.subr.bf16.mxu0 %v5161_v55  ;;  %2533 = vmatprep.subr.bf16.mxu1 %v5164_v40  ;;  %v2258_v40 = vunpack.c.l.bf16 %v2253_v37 }
 0x944   :  { %2493 = vmatpush1.bf16.msra.mxu0 %v5167_v57  ;;  %2534 = vmatpush1.bf16.msra.mxu1 %v5170_v58 }
 0x945   :  { %2494 = vmatprep.subr.bf16.mxu0 %v5173_v63  ;;  %2535 = vmatprep.subr.bf16.mxu1 %v5176_v60 }
 0x948   :  { %2495 = vmatpush1.bf16.msra.mxu0 %v5179_v61  ;;  %2536 = vmatpush1.bf16.msra.mxu1 %v5182_v2 }
 0x949   :  { %2496 = vmatprep.subr.bf16.mxu0 %v5185_v8  ;;  %2537 = vmatprep.subr.bf16.mxu1 %v5188_v13 }
 0x94c   :  { %2497 = vmatpush1.bf16.msra.mxu0 %v5233_v21  ;;  %2538 = vmatpush1.bf16.msra.mxu1 %v5236_v22 }
 0x94d   :  { %2498 = vmatprep.subr.bf16.mxu0 %v5239_v12  ;;  %2539 = vmatprep.subr.bf16.mxu1 %v5242_v23 }
 0x950   :  { %2499 = vmatpush1.bf16.msra.mxu0 %v5245_v39  ;;  %2540 = vmatpush1.bf16.msra.mxu1 %v5248_v43 }
 0x951   :  { %2500 = vmatprep.subr.bf16.mxu0 %v5251_v45  ;;  %2541 = vmatprep.subr.bf16.mxu1 %v5254_v27 }
 0x954   :  { %2501 = vmatpush1.bf16.msra.mxu0 %v5257_v5  ;;  %2542 = vmatpush1.bf16.msra.mxu1 %v5260_v51 }
 0x955   :  { %2502 = vmatprep.subr.bf16.mxu0 %v5263_v7  ;;  %2543 = vmatprep.subr.bf16.mxu1 %v5266_v9 }
 0x958   :  { %2503 = vmatpush1.bf16.msra.mxu0 %v5269_v17  ;;  %2544 = vmatpush1.bf16.msra.mxu1 %v5272_v18 }
 0x959   :  { %2593 = vmatprep.subr.bf16.mxu0 %v5275_v4  ;;  %2634 = vmatprep.subr.bf16.mxu1 %v5278_v24 }
 0x9ee   :  { %v2299_v53 = vpop.f32.mrb[72].mxu0  ;;  %v2340_v54 = vpop.f32.mrb[72].mxu1 }
 0x9ef   :  { %v2347_v55 = vadd.f32 %v2299_v53, %v2256_v62  ;;  %v2301_v57 = vpop.f32.mrb[73].mxu0  ;;  %v2342_v58 = vpop.f32.mrb[73].mxu1  ;;  %v2349_v48 = vadd.f32 %v2340_v54, %v2258_v40 }
 0x9f0   :  { %v2348_v63 = vadd.f32 %v2301_v57, %v2257_v52  ;;  %v2303_v60 = vpop.f32.mrb[74].mxu0  ;;  %v2344_v61 = vpop.f32.mrb[74].mxu1  ;;  %v2350_v33 = vadd.f32 %v2342_v58, %v2259_v56  ;;  %v2263_v57 = vunpack.c.h.bf16 %v2255_v46  ;;  %v5491_v56 = vld [vmem:[#allocation6 + $0x44] ss:$16 sps:$4 sm:$0xff]   ;;  %v5513_v46 = vld [vmem:[#allocation6 + $0x68] ss:$16 sps:$4 sm:$0xff]  }
 0x9f1   :  { %v2351_v2 = vmul.f32 0.5, %v2347_v55  ;;  %v2304_v8 = vpop.f32.mrb[75].mxu0  ;;  %v2345_v13 = vpop.f32.mrb[75].mxu1  ;;  %v5471_v60 = vld [vmem:[#allocation6] ss:$16 sps:$4 sm:$0xff]  }
 0x9f2   :  { %v2355_v26 = vmul.f32 0.5, %v2348_v63  ;;  %v2360_v34 = vmul.f32 0.5, %v2350_v33  ;;  %v5474_v61 = vld [vmem:[#allocation6 + $0x8] ss:$16 sps:$4 sm:$0xff]   ;;  %v5480_v8 = vld [vmem:[#allocation6 + $0x2c] ss:$16 sps:$4 sm:$0xff]  }
 0x9f3   :  { %4103 = vtanh.f32 %v2351_v2  ;;  %v5477_v2 = vld [vmem:[#allocation6 + $0x24] ss:$16 sps:$4 sm:$0xff]   ;;  %v5494_v33 = vld [vmem:[#allocation6 + $0x4c] ss:$16 sps:$4 sm:$0xff]  }
 0x9f4   :  { %4105 = vtanh.f32 %v2355_v26  ;;  %v5485_v26 = vld [vmem:[#allocation6 + $0x20] ss:$16 sps:$4 sm:$0xff]  }
 0x9f5   :  { %4107 = vtanh.f32 %v2349_v48  ;;  %v5488_v48 = vld [vmem:[#allocation6 + $0x28] ss:$16 sps:$4 sm:$0xff]  }
 0x9f6   :  { %4109 = vtanh.f32 %v2360_v34 }
 0x9fd   :  { %v4104_v36 = vpop.eup %4103 }
 0x9fe   :  { %v4106_v38 = vpop.eup %4105  ;;  %v2353_v41 = vmul.f32 0.5, %v4104_v36 }
 0x9ff   :  { %v2357_v42 = vmul.f32 0.5, %v4106_v38  ;;  %v4108_v30 = vpop.eup %4107 }
 0xa00   :  { %v2354_v20 = vadd.f32 0.5, %v2353_v41  ;;  %v4110_v3 = vpop.eup %4109 }
 0xa01   :  { %v2358_v44 = vadd.f32 0.5, %v2357_v42  ;;  %v2362_v15 = vmul.f32 0.5, %v4110_v3  ;;  %v5497_v42 = vld [vmem:[#allocation6 + $0x40] ss:$16 sps:$4 sm:$0xff]  }
 0xa02   :  { %v2365_v31 = vmul.f32 %v4108_v30, %v2354_v20  ;;  %v5500_v20 = vld [vmem:[#allocation6 + $0x48] ss:$16 sps:$4 sm:$0xff]  }
 0xa03   :  { %v2364_v32 = vmul.f32 %v2358_v44, %v5392_v35  ;;  %v2363_v11 = vadd.f32 0.5, %v2362_v15  ;;  %v5503_v44 = vld [vmem:[#allocation6 + $0x64] ss:$16 sps:$4 sm:$0xff]   ;;  %v5510_v15 = vld [vmem:[#allocation6 + $0x60] ss:$16 sps:$4 sm:$0xff]  }
 0xa05   :  { %v5468_v14 = vadd.f32 %v2365_v31, %v2364_v32  ;;  %v5506_v31 = vld [vmem:[#allocation6 + $0x6c] ss:$16 sps:$4 sm:$0xff]  }
 0xa07   :  { %4111 = vtanh.f32 %v5468_v14 }
 0xa0e   :  { %v2404_v16 = vpop.f32.mrb[76].mxu0  ;;  %v2445_v19 = vpop.f32.mrb[76].mxu1 }
 0xa0f   :  { %v2452_v29 = vadd.f32 %v2404_v16, %v2260_v50  ;;  %v2406_v6 = vpop.f32.mrb[77].mxu0  ;;  %v2447_v10 = vpop.f32.mrb[77].mxu1  ;;  %v2454_v40 = vadd.f32 %v2445_v19, %v2262_v25  ;;  %v5519_v16 = vld [vmem:[#allocation6 + $0x8c] ss:$16 sps:$4 sm:$0xff]  }
 0xa10   :  { %v2453_v1 = vadd.f32 %v2406_v6, %v2261_v47  ;;  %v2408_v28 = vpop.f32.mrb[78].mxu0  ;;  %v2449_v35 = vpop.f32.mrb[78].mxu1  ;;  %v2455_v63 = vadd.f32 %v2447_v10, %v2263_v57  ;;  %v5516_v47 = vld [vmem:[#allocation6 + $0x84] ss:$16 sps:$4 sm:$0xff]  }
 0xa11   :  { %v4112_v62 = vpop.eup %4111  ;;  %v2456_v37 = vmul.f32 0.5, %v2452_v29  ;;  %v2409_v52 = vpop.f32.mrb[79].mxu0 }
 0xa12   :  { %v2450_v53 = vpop.f32.mrb[79].mxu1  ;;  %v2368_v54 = vmul.f32 %v4112_v62, %v2363_v11  ;;  %v2460_v55 = vmul.f32 0.5, %v2453_v1  ;;  %v2465_v13 = vmul.f32 0.5, %v2455_v63 }
 0xa13   :  { %4113 = vtanh.f32 %v2456_v37 }
 0xa14   :  { %v2487_v58 = vpack.c.bf16 %v2368_v54, %v2368_v54  ;;  %4115 = vtanh.f32 %v2460_v55 }
 0xa15   :  { %4117 = vtanh.f32 %v2454_v40 }
 0xa16   :  { %2521 = vmatmul.mubr.bf16.vlgmr.msra.gmra.mrb[80].mxu0 %v2487_v58  ;;  %2562 = vmatmul.mubr.bf16.vlgmr.msra.gmra.mrb[80].mxu1 %v2487_v58  ;;  %4119 = vtanh.f32 %v2465_v13 }
 0xa17   :  { %2594 = vmatpush1.bf16.msra.mxu0 %v5471_v60  ;;  %2635 = vmatpush1.bf16.msra.mxu1 %v5474_v61 }
 0xa18   :  { %2595 = vmatprep.subr.bf16.mxu0 %v5477_v2  ;;  %2636 = vmatprep.subr.bf16.mxu1 %v5480_v8 }
 0xa19   :  { %2625 = vmatprep.mubr.bf16.mxu0 %v4445_v0  ;;  %2666 = vmatprep.mubr.bf16.mxu1 %v4445_v0 }
 0xa1b   :  { %2596 = vmatpush1.bf16.msra.mxu0 %v5485_v26  ;;  %2637 = vmatpush1.bf16.msra.mxu1 %v5488_v48 }
 0xa1c   :  { %2597 = vmatprep.subr.bf16.mxu0 %v5491_v56  ;;  %2638 = vmatprep.subr.bf16.mxu1 %v5494_v33 }
 0xa1d   :  { %v4114_v34 = vpop.eup %4113 }
 0xa1e   :  { %v4116_v36 = vpop.eup %4115  ;;  %v2458_v38 = vmul.f32 0.5, %v4114_v34 }
 0xa1f   :  { %v2462_v41 = vmul.f32 0.5, %v4116_v36  ;;  %2598 = vmatpush1.bf16.msra.mxu0 %v5497_v42  ;;  %2639 = vmatpush1.bf16.msra.mxu1 %v5500_v20  ;;  %v4118_v32 = vpop.eup %4117  ;;  %v2477_v36 = vld [vmem:[#allocation3 + $0x150] sm:$0xff] }
 0xa20   :  { %v2459_v30 = vadd.f32 0.5, %v2458_v38  ;;  %2599 = vmatprep.subr.bf16.mxu0 %v5503_v44  ;;  %2640 = vmatprep.subr.bf16.mxu1 %v5506_v31 }
 0xa21   :  { %v2463_v49 = vadd.f32 0.5, %v2462_v41  ;;  %v2483_v41 = vunpack.c.l.bf16 %v2477_v36 }
 0xa22   :  { %v2470_v3 = vmul.f32 %v4118_v32, %v2459_v30  ;;  %v2478_v32 = vld [vmem:[#allocation3 + $0x158] sm:$0xff] }
 0xa23   :  { %v2469_v50 = vmul.f32 %v2463_v49, %v5414_v59  ;;  %2600 = vmatpush1.bf16.msra.mxu0 %v5510_v15  ;;  %2641 = vmatpush1.bf16.msra.mxu1 %v5513_v46  ;;  %v4120_v59 = vpop.eup %4119  ;;  %v2484_v49 = vunpack.c.h.bf16 %v2477_v36  ;;  %v5622_v36 = vld [vmem:[#allocation6 + $0xcc] ss:$16 sps:$4 sm:$0xff]  }
 0xa24   :  { %2601 = vmatprep.subr.bf16.mxu0 %v5516_v47  ;;  %2642 = vmatprep.subr.bf16.mxu1 %v5519_v16  ;;  %v2467_v29 = vmul.f32 0.5, %v4120_v59 }
 0xa25   :  { %v5522_v19 = vadd.f32 %v2470_v3, %v2469_v50 }
 0xa26   :  { %v2468_v25 = vadd.f32 0.5, %v2467_v29  ;;  %v2485_v29 = vunpack.c.l.bf16 %v2478_v32 }
 0xa27   :  { %4121 = vtanh.f32 %v5522_v19  ;;  %2602 = vmatpush1.bf16.msra.mxu0 %v5233_v21  ;;  %2643 = vmatpush1.bf16.msra.mxu1 %v5236_v22 }
 0xa28   :  { %2603 = vmatprep.subr.bf16.mxu0 %v5239_v12  ;;  %2644 = vmatprep.subr.bf16.mxu1 %v5242_v23 }
 0xa2b   :  { %2604 = vmatpush1.bf16.msra.mxu0 %v5245_v39  ;;  %2645 = vmatpush1.bf16.msra.mxu1 %v5248_v43 }
 0xa2c   :  { %2605 = vmatprep.subr.bf16.mxu0 %v5251_v45  ;;  %2646 = vmatprep.subr.bf16.mxu1 %v5254_v27 }
 0xa2f   :  { %2606 = vmatpush1.bf16.msra.mxu0 %v5257_v5  ;;  %2647 = vmatpush1.bf16.msra.mxu1 %v5260_v51 }
 0xa30   :  { %2607 = vmatprep.subr.bf16.mxu0 %v5263_v7  ;;  %2648 = vmatprep.subr.bf16.mxu1 %v5266_v9 }
 0xa31   :  { %v4122_v6 = vpop.eup %4121 }
 0xa32   :  { %v2473_v10 = vmul.f32 %v4122_v6, %v2468_v25 }
 0xa33   :  { %2608 = vmatpush1.bf16.msra.mxu0 %v5269_v17  ;;  %2649 = vmatpush1.bf16.msra.mxu1 %v5272_v18 }
 0xa34   :  { %v2592_v11 = vpack.c.bf16 %v2473_v10, %v2473_v10  ;;  %2711 = vmatprep.subr.bf16.mxu0 %v5275_v4  ;;  %2752 = vmatprep.subr.bf16.mxu1 %v5278_v24 }
 0xa36   :  { %2626 = vmatmul.mubr.bf16.vlgmr.msra.gmra.mrb[84].mxu0 %v2592_v11  ;;  %2667 = vmatmul.mubr.bf16.vlgmr.msra.gmra.mrb[84].mxu1 %v2592_v11 }
 0xa37   :  { %2712 = vmatpush1.bf16.msra.mxu0 %v5471_v60  ;;  %2753 = vmatpush1.bf16.msra.mxu1 %v5474_v61 }
 0xa38   :  { %2713 = vmatprep.subr.bf16.mxu0 %v5477_v2  ;;  %2754 = vmatprep.subr.bf16.mxu1 %v5480_v8 }
 0xa39   :  { %2743 = vmatprep.mubr.bf16.mxu0 %v4445_v0  ;;  %2784 = vmatprep.mubr.bf16.mxu1 %v4445_v0 }
 0xa3b   :  { %2714 = vmatpush1.bf16.msra.mxu0 %v5485_v26  ;;  %2755 = vmatpush1.bf16.msra.mxu1 %v5488_v48 }
 0xa3c   :  { %2715 = vmatprep.subr.bf16.mxu0 %v5491_v56  ;;  %2756 = vmatprep.subr.bf16.mxu1 %v5494_v33 }
 0xa3f   :  { %2716 = vmatpush1.bf16.msra.mxu0 %v5497_v42  ;;  %2757 = vmatpush1.bf16.msra.mxu1 %v5500_v20 }
 0xa40   :  { %2717 = vmatprep.subr.bf16.mxu0 %v5503_v44  ;;  %2758 = vmatprep.subr.bf16.mxu1 %v5506_v31 }
 0xa43   :  { %2718 = vmatpush1.bf16.msra.mxu0 %v5510_v15  ;;  %2759 = vmatpush1.bf16.msra.mxu1 %v5513_v46 }
 0xa44   :  { %2719 = vmatprep.subr.bf16.mxu0 %v5516_v47  ;;  %2760 = vmatprep.subr.bf16.mxu1 %v5519_v16 }
 0xa47   :  { %2720 = vmatpush1.bf16.msra.mxu0 %v5233_v21  ;;  %2761 = vmatpush1.bf16.msra.mxu1 %v5236_v22  ;;  %v2475_v21 = vld [vmem:[#allocation3 + $0x140] sm:$0xff] }
 0xa48   :  { %2721 = vmatprep.subr.bf16.mxu0 %v5239_v12  ;;  %2762 = vmatprep.subr.bf16.mxu1 %v5242_v23  ;;  %v2479_v22 = vunpack.c.l.bf16 %v2475_v21  ;;  %v2476_v12 = vld [vmem:[#allocation3 + $0x148] sm:$0xff]  ;;  %v2480_v23 = vunpack.c.h.bf16 %v2475_v21 }
 0xa4b   :  { %2722 = vmatpush1.bf16.msra.mxu0 %v5245_v39  ;;  %2763 = vmatpush1.bf16.msra.mxu1 %v5248_v43 }
 0xa4c   :  { %2723 = vmatprep.subr.bf16.mxu0 %v5251_v45  ;;  %2764 = vmatprep.subr.bf16.mxu1 %v5254_v27  ;;  %v2481_v27 = vunpack.c.l.bf16 %v2476_v12 }
 0xa4f   :  { %2724 = vmatpush1.bf16.msra.mxu0 %v5257_v5  ;;  %2765 = vmatpush1.bf16.msra.mxu1 %v5260_v51 }
 0xa50   :  { %2725 = vmatprep.subr.bf16.mxu0 %v5263_v7  ;;  %2766 = vmatprep.subr.bf16.mxu1 %v5266_v9 }
 0xa53   :  { %2726 = vmatpush1.bf16.msra.mxu0 %v5269_v17  ;;  %2767 = vmatpush1.bf16.msra.mxu1 %v5272_v18 }
 0xa54   :  { %2816 = vmatprep.subr.bf16.mxu0 %v5275_v4  ;;  %2857 = vmatprep.subr.bf16.mxu1 %v5278_v24  ;;  %v2482_v24 = vunpack.c.h.bf16 %v2476_v12 }
 0xae9   :  { %v2522_v39 = vpop.f32.mrb[80].mxu0  ;;  %v2563_v43 = vpop.f32.mrb[80].mxu1 }
 0xaea   :  { %v2570_v45 = vadd.f32 %v2522_v39, %v2479_v22  ;;  %v2524_v5 = vpop.f32.mrb[81].mxu0  ;;  %v2565_v51 = vpop.f32.mrb[81].mxu1  ;;  %v2572_v4 = vadd.f32 %v2563_v43, %v2481_v27 }
 0xaeb   :  { %v2571_v7 = vadd.f32 %v2524_v5, %v2480_v23  ;;  %v2526_v9 = vpop.f32.mrb[82].mxu0  ;;  %v2567_v1 = vpop.f32.mrb[82].mxu1  ;;  %v2573_v62 = vadd.f32 %v2565_v51, %v2482_v24  ;;  %v2486_v5 = vunpack.c.h.bf16 %v2478_v32  ;;  %v5631_v32 = vld [vmem:[#allocation6 + $0xe4] ss:$16 sps:$4 sm:$0xff]  }
 0xaec   :  { %v2574_v17 = vmul.f32 0.5, %v2570_v45  ;;  %v2527_v28 = vpop.f32.mrb[83].mxu0  ;;  %v2568_v18 = vpop.f32.mrb[83].mxu1 }
 0xaed   :  { %v2578_v35 = vmul.f32 0.5, %v2571_v7  ;;  %v2583_v37 = vmul.f32 0.5, %v2573_v62 }
 0xaee   :  { %4123 = vtanh.f32 %v2574_v17 }
 0xaef   :  { %4125 = vtanh.f32 %v2578_v35 }
 0xaf0   :  { %4127 = vtanh.f32 %v2572_v4 }
 0xaf1   :  { %4129 = vtanh.f32 %v2583_v37 }
 0xaf8   :  { %v4124_v52 = vpop.eup %4123 }
 0xaf9   :  { %v4126_v53 = vpop.eup %4125  ;;  %v2576_v54 = vmul.f32 0.5, %v4124_v52 }
 0xafa   :  { %v2580_v55 = vmul.f32 0.5, %v4126_v53  ;;  %v4128_v57 = vpop.eup %4127  ;;  %v5601_v53 = vld [vmem:[#allocation6 + $0x80] ss:$16 sps:$4 sm:$0xff]  }
 0xafb   :  { %v2577_v40 = vadd.f32 0.5, %v2576_v54  ;;  %v4130_v38 = vpop.eup %4129  ;;  %v5604_v54 = vld [vmem:[#allocation6 + $0x88] ss:$16 sps:$4 sm:$0xff]  }
 0xafc   :  { %v2581_v58 = vadd.f32 0.5, %v2580_v55  ;;  %v2585_v30 = vmul.f32 0.5, %v4130_v38  ;;  %v5610_v55 = vld [vmem:[#allocation6 + $0xac] ss:$16 sps:$4 sm:$0xff]   ;;  %v5625_v38 = vld [vmem:[#allocation6 + $0xc0] ss:$16 sps:$4 sm:$0xff]  }
 0xafd   :  { %v2588_v63 = vmul.f32 %v4128_v57, %v2577_v40  ;;  %v5613_v57 = vld [vmem:[#allocation6 + $0xa0] ss:$16 sps:$4 sm:$0xff]  }
 0xafe   :  { %v2587_v13 = vmul.f32 %v2581_v58, %v5468_v14  ;;  %v2586_v10 = vadd.f32 0.5, %v2585_v30  ;;  %v5616_v58 = vld [vmem:[#allocation6 + $0xa8] ss:$16 sps:$4 sm:$0xff]  }
 0xb00   :  { %v5576_v34 = vadd.f32 %v2588_v63, %v2587_v13  ;;  %v5619_v13 = vld [vmem:[#allocation6 + $0xc4] ss:$16 sps:$4 sm:$0xff]  }
 0xb02   :  { %4131 = vtanh.f32 %v5576_v34 }
 0xb09   :  { %v2627_v3 = vpop.f32.mrb[84].mxu0  ;;  %v2668_v50 = vpop.f32.mrb[84].mxu1 }
 0xb0a   :  { %v2675_v59 = vadd.f32 %v2627_v3, %v2483_v41  ;;  %v2629_v25 = vpop.f32.mrb[85].mxu0  ;;  %v2670_v6 = vpop.f32.mrb[85].mxu1  ;;  %v2677_v27 = vadd.f32 %v2668_v50, %v2485_v29  ;;  %v5628_v41 = vld [vmem:[#allocation6 + $0xc8] ss:$16 sps:$4 sm:$0xff]  }
 0xb0b   :  { %v2676_v11 = vadd.f32 %v2629_v25, %v2484_v49  ;;  %v2631_v21 = vpop.f32.mrb[86].mxu0  ;;  %v2672_v14 = vpop.f32.mrb[86].mxu1  ;;  %v2678_v7 = vadd.f32 %v2670_v6, %v2486_v5  ;;  %v5634_v49 = vld [vmem:[#allocation6 + $0xec] ss:$16 sps:$4 sm:$0xff]   ;;  %v5640_v29 = vld [vmem:[#allocation6 + $0xe8] ss:$16 sps:$4 sm:$0xff]  }
 0xb0c   :  { %v4132_v22 = vpop.eup %4131  ;;  %v2679_v12 = vmul.f32 0.5, %v2675_v59  ;;  %v2632_v23 = vpop.f32.mrb[87].mxu0  ;;  %v5637_v59 = vld [vmem:[#allocation6 + $0xe0] ss:$16 sps:$4 sm:$0xff]   ;;  %v5643_v6 = vld [vmem:[#allocation6 + $0x4] ss:$16 sps:$4 sm:$0xff]  }
 0xb0d   :  { %v2673_v39 = vpop.f32.mrb[87].mxu1  ;;  %v2591_v43 = vmul.f32 %v4132_v22, %v2586_v10  ;;  %v2683_v45 = vmul.f32 0.5, %v2676_v11  ;;  %v2688_v9 = vmul.f32 0.5, %v2678_v7  ;;  %v5646_v10 = vld [vmem:[#allocation6 + $0xc] ss:$16 sps:$4 sm:$0xff]   ;;  %v2698_v11 = vld [vmem:[#allocation3 + $0x160] sm:$0xff] }
 0xb0e   :  { %4133 = vtanh.f32 %v2679_v12  ;;  %v2702_v21 = vunpack.c.l.bf16 %v2698_v11  ;;  %v2699_v14 = vld [vmem:[#allocation3 + $0x168] sm:$0xff]  ;;  %v2703_v22 = vunpack.c.h.bf16 %v2698_v11 }
 0xb0f   :  { %v2710_v51 = vpack.c.bf16 %v2591_v43, %v2591_v43  ;;  %4135 = vtanh.f32 %v2683_v45  ;;  %v2704_v43 = vunpack.c.l.bf16 %v2699_v14 }
 0xb10   :  { %4137 = vtanh.f32 %v2677_v27 }
 0xb11   :  { %2744 = vmatmul.mubr.bf16.vlgmr.msra.gmra.mrb[88].mxu0 %v2710_v51  ;;  %2785 = vmatmul.mubr.bf16.vlgmr.msra.gmra.mrb[88].mxu1 %v2710_v51  ;;  %4139 = vtanh.f32 %v2688_v9 }
 0xb12   :  { %2817 = vmatpush1.bf16.msra.mxu0 %v5471_v60  ;;  %2858 = vmatpush1.bf16.msra.mxu1 %v5474_v61 }
 0xb13   :  { %2818 = vmatprep.subr.bf16.mxu0 %v5477_v2  ;;  %2859 = vmatprep.subr.bf16.mxu1 %v5480_v8 }
 0xb14   :  { %2848 = vmatprep.mubr.bf16.mxu0 %v4445_v0  ;;  %2889 = vmatprep.mubr.bf16.mxu1 %v4445_v0 }
 0xb16   :  { %2819 = vmatpush1.bf16.msra.mxu0 %v5485_v26  ;;  %2860 = vmatpush1.bf16.msra.mxu1 %v5488_v48 }
 0xb17   :  { %2820 = vmatprep.subr.bf16.mxu0 %v5491_v56  ;;  %2861 = vmatprep.subr.bf16.mxu1 %v5494_v33 }
 0xb18   :  { %v4134_v1 = vpop.eup %4133 }
 0xb19   :  { %v4136_v17 = vpop.eup %4135  ;;  %v2681_v28 = vmul.f32 0.5, %v4134_v1 }
 0xb1a   :  { %v2685_v18 = vmul.f32 0.5, %v4136_v17  ;;  %2821 = vmatpush1.bf16.msra.mxu0 %v5497_v42  ;;  %2862 = vmatpush1.bf16.msra.mxu1 %v5500_v20  ;;  %v4138_v4 = vpop.eup %4137 }
 0xb1b   :  { %v2682_v35 = vadd.f32 0.5, %v2681_v28  ;;  %2822 = vmatprep.subr.bf16.mxu0 %v5503_v44  ;;  %2863 = vmatprep.subr.bf16.mxu1 %v5506_v31  ;;  %v4140_v40 = vpop.eup %4139 }
 0xb1c   :  { %v2686_v24 = vadd.f32 0.5, %v2685_v18  ;;  %v2690_v63 = vmul.f32 0.5, %v4140_v40 }
 0xb1d   :  { %v2693_v62 = vmul.f32 %v4138_v4, %v2682_v35  ;;  %v2705_v35 = vunpack.c.h.bf16 %v2699_v14  ;;  %v2700_v14 = vld [vmem:[#allocation3 + $0x170] sm:$0xff] }
 0xb1e   :  { %v2692_v37 = vmul.f32 %v2686_v24, %v5522_v19  ;;  %2823 = vmatpush1.bf16.msra.mxu0 %v5510_v15  ;;  %2864 = vmatpush1.bf16.msra.mxu1 %v5513_v46  ;;  %v5607_v19 = vld [vmem:[#allocation6 + $0xa4] ss:$16 sps:$4 sm:$0xff]   ;;  %v2691_v30 = vadd.f32 0.5, %v2690_v63 }
 0xb1f   :  { %2824 = vmatprep.subr.bf16.mxu0 %v5516_v47  ;;  %2865 = vmatprep.subr.bf16.mxu1 %v5519_v16 }
 0xb20   :  { %v5598_v52 = vadd.f32 %v2693_v62, %v2692_v37 }
 0xb22   :  { %4141 = vtanh.f32 %v5598_v52  ;;  %2825 = vmatpush1.bf16.msra.mxu0 %v5601_v53  ;;  %2866 = vmatpush1.bf16.msra.mxu1 %v5604_v54 }
 0xb23   :  { %2826 = vmatprep.subr.bf16.mxu0 %v5607_v19  ;;  %2867 = vmatprep.subr.bf16.mxu1 %v5610_v55 }
 0xb26   :  { %2827 = vmatpush1.bf16.msra.mxu0 %v5613_v57  ;;  %2868 = vmatpush1.bf16.msra.mxu1 %v5616_v58 }
 0xb27   :  { %2828 = vmatprep.subr.bf16.mxu0 %v5619_v13  ;;  %2869 = vmatprep.subr.bf16.mxu1 %v5622_v36 }
 0xb2a   :  { %2829 = vmatpush1.bf16.msra.mxu0 %v5625_v38  ;;  %2870 = vmatpush1.bf16.msra.mxu1 %v5628_v41 }
 0xb2b   :  { %2830 = vmatprep.subr.bf16.mxu0 %v5631_v32  ;;  %2871 = vmatprep.subr.bf16.mxu1 %v5634_v49 }
 0xb2c   :  { %v4142_v3 = vpop.eup %4141 }
 0xb2d   :  { %v2696_v50 = vmul.f32 %v4142_v3, %v2691_v30 }
 0xb2e   :  { %2831 = vmatpush1.bf16.msra.mxu0 %v5637_v59  ;;  %2872 = vmatpush1.bf16.msra.mxu1 %v5640_v29 }
 0xb2f   :  { %v2815_v25 = vpack.c.bf16 %v2696_v50, %v2696_v50  ;;  %2934 = vmatprep.subr.bf16.mxu0 %v5643_v6  ;;  %2975 = vmatprep.subr.bf16.mxu1 %v5646_v10 }
 0xb31   :  { %2849 = vmatmul.mubr.bf16.vlgmr.msra.gmra.mrb[92].mxu0 %v2815_v25  ;;  %2890 = vmatmul.mubr.bf16.vlgmr.msra.gmra.mrb[92].mxu1 %v2815_v25 }
 0xb32   :  { %2935 = vmatpush1.bf16.msra.mxu0 %v5471_v60  ;;  %2976 = vmatpush1.bf16.msra.mxu1 %v5474_v61 }
 0xb33   :  { %2936 = vmatprep.subr.bf16.mxu0 %v5477_v2  ;;  %2977 = vmatprep.subr.bf16.mxu1 %v5480_v8 }
 0xb34   :  { %2966 = vmatprep.mubr.bf16.mxu0 %v4445_v0  ;;  %3007 = vmatprep.mubr.bf16.mxu1 %v4445_v0 }
 0xb36   :  { %2937 = vmatpush1.bf16.msra.mxu0 %v5485_v26  ;;  %2978 = vmatpush1.bf16.msra.mxu1 %v5488_v48 }
 0xb37   :  { %2938 = vmatprep.subr.bf16.mxu0 %v5491_v56  ;;  %2979 = vmatprep.subr.bf16.mxu1 %v5494_v33 }
 0xb3a   :  { %2939 = vmatpush1.bf16.msra.mxu0 %v5497_v42  ;;  %2980 = vmatpush1.bf16.msra.mxu1 %v5500_v20 }
 0xb3b   :  { %2940 = vmatprep.subr.bf16.mxu0 %v5503_v44  ;;  %2981 = vmatprep.subr.bf16.mxu1 %v5506_v31 }
 0xb3e   :  { %2941 = vmatpush1.bf16.msra.mxu0 %v5510_v15  ;;  %2982 = vmatpush1.bf16.msra.mxu1 %v5513_v46 }
 0xb3f   :  { %2942 = vmatprep.subr.bf16.mxu0 %v5516_v47  ;;  %2983 = vmatprep.subr.bf16.mxu1 %v5519_v16 }
 0xb42   :  { %2943 = vmatpush1.bf16.msra.mxu0 %v5601_v53  ;;  %2984 = vmatpush1.bf16.msra.mxu1 %v5604_v54 }
 0xb43   :  { %2944 = vmatprep.subr.bf16.mxu0 %v5607_v19  ;;  %2985 = vmatprep.subr.bf16.mxu1 %v5610_v55 }
 0xb46   :  { %2945 = vmatpush1.bf16.msra.mxu0 %v5613_v57  ;;  %2986 = vmatpush1.bf16.msra.mxu1 %v5616_v58 }
 0xb47   :  { %2946 = vmatprep.subr.bf16.mxu0 %v5619_v13  ;;  %2987 = vmatprep.subr.bf16.mxu1 %v5622_v36 }
 0xb4a   :  { %2947 = vmatpush1.bf16.msra.mxu0 %v5625_v38  ;;  %2988 = vmatpush1.bf16.msra.mxu1 %v5628_v41 }
 0xb4b   :  { %2948 = vmatprep.subr.bf16.mxu0 %v5631_v32  ;;  %2989 = vmatprep.subr.bf16.mxu1 %v5634_v49 }
 0xb4e   :  { %2949 = vmatpush1.bf16.msra.mxu0 %v5637_v59  ;;  %2990 = vmatpush1.bf16.msra.mxu1 %v5640_v29 }
 0xb4f   :  { %3039 = vmatprep.subr.bf16.mxu0 %v5643_v6  ;;  %3080 = vmatprep.subr.bf16.mxu1 %v5646_v10 }
 0xbe4   :  { %v2745_v12 = vpop.f32.mrb[88].mxu0  ;;  %v2786_v23 = vpop.f32.mrb[88].mxu1 }
 0xbe5   :  { %v2793_v39 = vadd.f32 %v2745_v12, %v2702_v21  ;;  %v2747_v45 = vpop.f32.mrb[89].mxu0  ;;  %v2788_v27 = vpop.f32.mrb[89].mxu1  ;;  %v2795_v18 = vadd.f32 %v2786_v23, %v2704_v43  ;;  %v2706_v12 = vunpack.c.l.bf16 %v2700_v14  ;;  %v2707_v43 = vunpack.c.h.bf16 %v2700_v14 }
 0xbe6   :  { %v2794_v5 = vadd.f32 %v2747_v45, %v2703_v22  ;;  %v2749_v51 = vpop.f32.mrb[90].mxu0  ;;  %v2790_v7 = vpop.f32.mrb[90].mxu1  ;;  %v2796_v4 = vadd.f32 %v2788_v27, %v2705_v35 }
 0xbe7   :  { %v2797_v9 = vmul.f32 0.5, %v2793_v39  ;;  %v2750_v1 = vpop.f32.mrb[91].mxu0  ;;  %v2791_v17 = vpop.f32.mrb[91].mxu1  ;;  %v2701_v39 = vld [vmem:[#allocation3 + $0x178] sm:$0xff] }
 0xbe8   :  { %v2801_v28 = vmul.f32 0.5, %v2794_v5  ;;  %v2806_v24 = vmul.f32 0.5, %v2796_v4  ;;  %v2708_v51 = vunpack.c.l.bf16 %v2701_v39 }
 0xbe9   :  { %4143 = vtanh.f32 %v2797_v9 }
 0xbea   :  { %4145 = vtanh.f32 %v2801_v28 }
 0xbeb   :  { %4147 = vtanh.f32 %v2795_v18 }
 0xbec   :  { %4149 = vtanh.f32 %v2806_v24 }
 0xbf3   :  { %v4144_v62 = vpop.eup %4143 }
 0xbf4   :  { %v4146_v37 = vpop.eup %4145  ;;  %v2799_v40 = vmul.f32 0.5, %v4144_v62 }
 0xbf5   :  { %v2803_v63 = vmul.f32 0.5, %v4146_v37  ;;  %v4148_v3 = vpop.eup %4147 }
 0xbf6   :  { %v2800_v30 = vadd.f32 0.5, %v2799_v40  ;;  %v4150_v22 = vpop.eup %4149 }
 0xbf7   :  { %v2804_v50 = vadd.f32 0.5, %v2803_v63  ;;  %v2808_v23 = vmul.f32 0.5, %v4150_v22  ;;  %v2709_v63 = vunpack.c.h.bf16 %v2701_v39 }
 0xbf8   :  { %v2811_v25 = vmul.f32 %v4148_v3, %v2800_v30 }
 0xbf9   :  { %v2810_v11 = vmul.f32 %v2804_v50, %v5576_v34  ;;  %v2809_v1 = vadd.f32 0.5, %v2808_v23 }
 0xbfb   :  { %v5684_v21 = vadd.f32 %v2811_v25, %v2810_v11 }
 0xbfd   :  { %4151 = vtanh.f32 %v5684_v21 }
 0xc04   :  { %v2850_v45 = vpop.f32.mrb[92].mxu0  ;;  %v2891_v27 = vpop.f32.mrb[92].mxu1 }
 0xc05   :  { %v2898_v5 = vadd.f32 %v2850_v45, %v2706_v12  ;;  %v2852_v7 = vpop.f32.mrb[93].mxu0  ;;  %v2893_v9 = vpop.f32.mrb[93].mxu1  ;;  %v2900_v40 = vadd.f32 %v2891_v27, %v2708_v51 }
 0xc06   :  { %v2899_v17 = vadd.f32 %v2852_v7, %v2707_v43  ;;  %v2854_v28 = vpop.f32.mrb[94].mxu0  ;;  %v2895_v34 = vpop.f32.mrb[94].mxu1  ;;  %v2901_v3 = vadd.f32 %v2893_v9, %v2709_v63 }
 0xc07   :  { %v4152_v18 = vpop.eup %4151  ;;  %v2902_v35 = vmul.f32 0.5, %v2898_v5  ;;  %v2855_v4 = vpop.f32.mrb[95].mxu0  ;;  %v2922_v34 = vld [vmem:[#allocation3 + $0x188] sm:$0xff] }
 0xc08   :  { %v2896_v24 = vpop.f32.mrb[95].mxu1  ;;  %v2814_v62 = vmul.f32 %v4152_v18, %v2809_v1  ;;  %v2906_v37 = vmul.f32 0.5, %v2899_v17  ;;  %v2911_v50 = vmul.f32 0.5, %v2901_v3  ;;  %v2921_v17 = vld [vmem:[#allocation3 + $0x180] sm:$0xff] }
 0xc09   :  { %4153 = vtanh.f32 %v2902_v35  ;;  %v2925_v28 = vunpack.c.l.bf16 %v2921_v17  ;;  %v2926_v18 = vunpack.c.h.bf16 %v2921_v17 }
 0xc0a   :  { %v2933_v30 = vpack.c.bf16 %v2814_v62, %v2814_v62  ;;  %4155 = vtanh.f32 %v2906_v37  ;;  %v2927_v62 = vunpack.c.l.bf16 %v2922_v34 }
 0xc0b   :  { %4157 = vtanh.f32 %v2900_v40 }
 0xc0c   :  { %2967 = vmatmul.mubr.bf16.vlgmr.msra.gmra.mrb[96].mxu0 %v2933_v30  ;;  %3008 = vmatmul.mubr.bf16.vlgmr.msra.gmra.mrb[96].mxu1 %v2933_v30  ;;  %4159 = vtanh.f32 %v2911_v50 }
 0xc0d   :  { %3040 = vmatpush1.bf16.msra.mxu0 %v5471_v60  ;;  %3081 = vmatpush1.bf16.msra.mxu1 %v5474_v61 }
 0xc0e   :  { %3041 = vmatprep.subr.bf16.mxu0 %v5477_v2  ;;  %3082 = vmatprep.subr.bf16.mxu1 %v5480_v8 }
 0xc0f   :  { %3071 = vmatprep.mubr.bf16.mxu0 %v4445_v0  ;;  %3112 = vmatprep.mubr.bf16.mxu1 %v4445_v0 }
 0xc11   :  { %3042 = vmatpush1.bf16.msra.mxu0 %v5485_v26  ;;  %3083 = vmatpush1.bf16.msra.mxu1 %v5488_v48 }
 0xc12   :  { %3043 = vmatprep.subr.bf16.mxu0 %v5491_v56  ;;  %3084 = vmatprep.subr.bf16.mxu1 %v5494_v33 }
 0xc13   :  { %v4154_v25 = vpop.eup %4153 }
 0xc14   :  { %v4156_v11 = vpop.eup %4155  ;;  %v2904_v14 = vmul.f32 0.5, %v4154_v25 }
 0xc15   :  { %v2908_v22 = vmul.f32 0.5, %v4156_v11  ;;  %3044 = vmatpush1.bf16.msra.mxu0 %v5497_v42  ;;  %3085 = vmatpush1.bf16.msra.mxu1 %v5500_v20  ;;  %v4158_v23 = vpop.eup %4157 }
 0xc16   :  { %v2905_v12 = vadd.f32 0.5, %v2904_v14  ;;  %3045 = vmatprep.subr.bf16.mxu0 %v5503_v44  ;;  %3086 = vmatprep.subr.bf16.mxu1 %v5506_v31 }
 0xc17   :  { %v2909_v39 = vadd.f32 0.5, %v2908_v22 }
 0xc18   :  { %v2916_v43 = vmul.f32 %v4158_v23, %v2905_v12  ;;  %v2928_v12 = vunpack.c.h.bf16 %v2922_v34  ;;  %v2923_v34 = vld [vmem:[#allocation3 + $0x190] sm:$0xff] }
 0xc19   :  { %v2915_v45 = vmul.f32 %v2909_v39, %v5598_v52  ;;  %3046 = vmatpush1.bf16.msra.mxu0 %v5510_v15  ;;  %3087 = vmatpush1.bf16.msra.mxu1 %v5513_v46  ;;  %v4160_v52 = vpop.eup %4159 }
 0xc1a   :  { %3047 = vmatprep.subr.bf16.mxu0 %v5516_v47  ;;  %3088 = vmatprep.subr.bf16.mxu1 %v5519_v16  ;;  %v2913_v5 = vmul.f32 0.5, %v4160_v52 }
 0xc1b   :  { %v5706_v27 = vadd.f32 %v2916_v43, %v2915_v45 }
 0xc1c   :  { %v2914_v51 = vadd.f32 0.5, %v2913_v5 }
 0xc1d   :  { %4161 = vtanh.f32 %v5706_v27  ;;  %3048 = vmatpush1.bf16.msra.mxu0 %v5601_v53  ;;  %3089 = vmatpush1.bf16.msra.mxu1 %v5604_v54 }
 0xc1e   :  { %3049 = vmatprep.subr.bf16.mxu0 %v5607_v19  ;;  %3090 = vmatprep.subr.bf16.mxu1 %v5610_v55 }
 0xc21   :  { %3050 = vmatpush1.bf16.msra.mxu0 %v5613_v57  ;;  %3091 = vmatpush1.bf16.msra.mxu1 %v5616_v58 }
 0xc22   :  { %3051 = vmatprep.subr.bf16.mxu0 %v5619_v13  ;;  %3092 = vmatprep.subr.bf16.mxu1 %v5622_v36 }
 0xc25   :  { %3052 = vmatpush1.bf16.msra.mxu0 %v5625_v38  ;;  %3093 = vmatpush1.bf16.msra.mxu1 %v5628_v41 }
 0xc26   :  { %3053 = vmatprep.subr.bf16.mxu0 %v5631_v32  ;;  %3094 = vmatprep.subr.bf16.mxu1 %v5634_v49 }
 0xc27   :  { %v4162_v7 = vpop.eup %4161 }
 0xc28   :  { %v2919_v9 = vmul.f32 %v4162_v7, %v2914_v51 }
 0xc29   :  { %3054 = vmatpush1.bf16.msra.mxu0 %v5637_v59  ;;  %3095 = vmatpush1.bf16.msra.mxu1 %v5640_v29 }
 0xc2a   :  { %v3038_v1 = vpack.c.bf16 %v2919_v9, %v2919_v9  ;;  %3157 = vmatprep.subr.bf16.mxu0 %v5643_v6  ;;  %3198 = vmatprep.subr.bf16.mxu1 %v5646_v10 }
 0xc2c   :  { %3072 = vmatmul.mubr.bf16.vlgmr.msra.gmra.mrb[100].mxu0 %v3038_v1  ;;  %3113 = vmatmul.mubr.bf16.vlgmr.msra.gmra.mrb[100].mxu1 %v3038_v1 }
 0xc2d   :  { %3158 = vmatpush1.bf16.msra.mxu0 %v5471_v60  ;;  %3199 = vmatpush1.bf16.msra.mxu1 %v5474_v61 }
 0xc2e   :  { %3159 = vmatprep.subr.bf16.mxu0 %v5477_v2  ;;  %3200 = vmatprep.subr.bf16.mxu1 %v5480_v8 }
 0xc2f   :  { %3189 = vmatprep.mubr.bf16.mxu0 %v4445_v0  ;;  %3230 = vmatprep.mubr.bf16.mxu1 %v4445_v0 }
 0xc31   :  { %3160 = vmatpush1.bf16.msra.mxu0 %v5485_v26  ;;  %3201 = vmatpush1.bf16.msra.mxu1 %v5488_v48 }
 0xc32   :  { %3161 = vmatprep.subr.bf16.mxu0 %v5491_v56  ;;  %3202 = vmatprep.subr.bf16.mxu1 %v5494_v33 }
 0xc35   :  { %3162 = vmatpush1.bf16.msra.mxu0 %v5497_v42  ;;  %3203 = vmatpush1.bf16.msra.mxu1 %v5500_v20 }
 0xc36   :  { %3163 = vmatprep.subr.bf16.mxu0 %v5503_v44  ;;  %3204 = vmatprep.subr.bf16.mxu1 %v5506_v31 }
 0xc39   :  { %3164 = vmatpush1.bf16.msra.mxu0 %v5510_v15  ;;  %3205 = vmatpush1.bf16.msra.mxu1 %v5513_v46 }
 0xc3a   :  { %3165 = vmatprep.subr.bf16.mxu0 %v5516_v47  ;;  %3206 = vmatprep.subr.bf16.mxu1 %v5519_v16 }
 0xc3d   :  { %3166 = vmatpush1.bf16.msra.mxu0 %v5601_v53  ;;  %3207 = vmatpush1.bf16.msra.mxu1 %v5604_v54 }
 0xc3e   :  { %3167 = vmatprep.subr.bf16.mxu0 %v5607_v19  ;;  %3208 = vmatprep.subr.bf16.mxu1 %v5610_v55 }
 0xc41   :  { %3168 = vmatpush1.bf16.msra.mxu0 %v5613_v57  ;;  %3209 = vmatpush1.bf16.msra.mxu1 %v5616_v58 }
 0xc42   :  { %3169 = vmatprep.subr.bf16.mxu0 %v5619_v13  ;;  %3210 = vmatprep.subr.bf16.mxu1 %v5622_v36 }
 0xc45   :  { %3170 = vmatpush1.bf16.msra.mxu0 %v5625_v38  ;;  %3211 = vmatpush1.bf16.msra.mxu1 %v5628_v41 }
 0xc46   :  { %3171 = vmatprep.subr.bf16.mxu0 %v5631_v32  ;;  %3212 = vmatprep.subr.bf16.mxu1 %v5634_v49 }
 0xc49   :  { %3172 = vmatpush1.bf16.msra.mxu0 %v5637_v59  ;;  %3213 = vmatpush1.bf16.msra.mxu1 %v5640_v29 }
 0xc4a   :  { %3262 = vmatprep.subr.bf16.mxu0 %v5643_v6  ;;  %3303 = vmatprep.subr.bf16.mxu1 %v5646_v10 }
 0xcdf   :  { %v2968_v35 = vpop.f32.mrb[96].mxu0  ;;  %v3009_v4 = vpop.f32.mrb[96].mxu1 }
 0xce0   :  { %v3016_v24 = vadd.f32 %v2968_v35, %v2925_v28  ;;  %v2970_v37 = vpop.f32.mrb[97].mxu0  ;;  %v3011_v40 = vpop.f32.mrb[97].mxu1  ;;  %v3018_v22 = vadd.f32 %v3009_v4, %v2927_v62  ;;  %v2929_v35 = vunpack.c.l.bf16 %v2923_v34  ;;  %v2930_v62 = vunpack.c.h.bf16 %v2923_v34  ;;  %v5810_v34 = vld [vmem:[#allocation6 + $0x2c] ss:$16 sps:$4 sm:$0xff]  }
 0xce1   :  { %v3017_v63 = vadd.f32 %v2970_v37, %v2926_v18  ;;  %v2972_v30 = vpop.f32.mrb[98].mxu0  ;;  %v3013_v3 = vpop.f32.mrb[98].mxu1  ;;  %v3019_v23 = vadd.f32 %v3011_v40, %v2928_v12 }
 0xce2   :  { %v3020_v50 = vmul.f32 0.5, %v3016_v24  ;;  %v2973_v25 = vpop.f32.mrb[99].mxu0  ;;  %v3014_v11 = vpop.f32.mrb[99].mxu1  ;;  %v2924_v24 = vld [vmem:[#allocation3 + $0x198] sm:$0xff] }
 0xce3   :  { %v3024_v14 = vmul.f32 0.5, %v3017_v63  ;;  %v3029_v39 = vmul.f32 0.5, %v3019_v23  ;;  %v2931_v30 = vunpack.c.l.bf16 %v2924_v24 }
 0xce4   :  { %4163 = vtanh.f32 %v3020_v50 }
 0xce5   :  { %4165 = vtanh.f32 %v3024_v14 }
 0xce6   :  { %4167 = vtanh.f32 %v3018_v22 }
 0xce7   :  { %4169 = vtanh.f32 %v3029_v39 }
 0xcee   :  { %v4164_v43 = vpop.eup %4163 }
 0xcef   :  { %v4166_v45 = vpop.eup %4165  ;;  %v3022_v52 = vmul.f32 0.5, %v4164_v43 }
 0xcf0   :  { %v3026_v5 = vmul.f32 0.5, %v4166_v45  ;;  %v4168_v7 = vpop.eup %4167 }
 0xcf1   :  { %v3023_v51 = vadd.f32 0.5, %v3022_v52  ;;  %v4170_v18 = vpop.eup %4169 }
 0xcf2   :  { %v3027_v9 = vadd.f32 0.5, %v3026_v5  ;;  %v3031_v4 = vmul.f32 0.5, %v4170_v18  ;;  %v2932_v5 = vunpack.c.h.bf16 %v2924_v24  ;;  %v5815_v18 = vld [vmem:[#allocation6 + $0x20] ss:$16 sps:$4 sm:$0xff]   ;;  %v5824_v24 = vld [vmem:[#allocation6 + $0x4c] ss:$16 sps:$4 sm:$0xff]  }
 0xcf3   :  { %v3034_v1 = vmul.f32 %v4168_v7, %v3023_v51 }
 0xcf4   :  { %v3033_v17 = vmul.f32 %v3027_v9, %v5684_v21  ;;  %v3032_v25 = vadd.f32 0.5, %v3031_v4  ;;  %v5821_v4 = vld [vmem:[#allocation6 + $0x44] ss:$16 sps:$4 sm:$0xff]  }
 0xcf6   :  { %v5760_v28 = vadd.f32 %v3034_v1, %v3033_v17 }
 0xcf8   :  { %4171 = vtanh.f32 %v5760_v28 }
 0xcff   :  { %v3073_v37 = vpop.f32.mrb[100].mxu0  ;;  %v3114_v40 = vpop.f32.mrb[100].mxu1 }
 0xd00   :  { %v3121_v63 = vadd.f32 %v3073_v37, %v2929_v35  ;;  %v3075_v3 = vpop.f32.mrb[101].mxu0  ;;  %v3116_v50 = vpop.f32.mrb[101].mxu1  ;;  %v3123_v52 = vadd.f32 %v3114_v40, %v2931_v30  ;;  %v5818_v35 = vld [vmem:[#allocation6 + $0x28] ss:$16 sps:$4 sm:$0xff]   ;;  %v5833_v40 = vld [vmem:[#allocation6 + $0x64] ss:$16 sps:$4 sm:$0xff]  }
 0xd01   :  { %v3122_v11 = vadd.f32 %v3075_v3, %v2930_v62  ;;  %v3077_v14 = vpop.f32.mrb[102].mxu0  ;;  %v3118_v21 = vpop.f32.mrb[102].mxu1  ;;  %v3124_v7 = vadd.f32 %v3116_v50, %v2932_v5  ;;  %v5827_v62 = vld [vmem:[#allocation6 + $0x40] ss:$16 sps:$4 sm:$0xff]   ;;  %v5830_v37 = vld [vmem:[#allocation6 + $0x48] ss:$16 sps:$4 sm:$0xff]  }
 0xd02   :  { %v4172_v22 = vpop.eup %4171  ;;  %v3125_v12 = vmul.f32 0.5, %v3121_v63  ;;  %v3078_v23 = vpop.f32.mrb[103].mxu0  ;;  %v5836_v63 = vld [vmem:[#allocation6 + $0x6c] ss:$16 sps:$4 sm:$0xff]   ;;  %v5839_v30 = vld [vmem:[#allocation6 + $0x60] ss:$16 sps:$4 sm:$0xff]  }
 0xd03   :  { %v3119_v39 = vpop.f32.mrb[103].mxu1  ;;  %v3037_v43 = vmul.f32 %v4172_v22, %v3032_v25  ;;  %v3129_v45 = vmul.f32 0.5, %v3122_v11  ;;  %v3134_v9 = vmul.f32 0.5, %v3124_v7  ;;  %v5842_v3 = vld [vmem:[#allocation6 + $0x68] ss:$16 sps:$4 sm:$0xff]   ;;  %v3144_v11 = vld [vmem:[#allocation3 + $0x1a0] sm:$0xff] }
 0xd04   :  { %4173 = vtanh.f32 %v3125_v12  ;;  %v5845_v50 = vld [vmem:[#allocation6 + $0x84] ss:$16 sps:$4 sm:$0xff]   ;;  %v5848_v25 = vld [vmem:[#allocation6 + $0x8c] ss:$16 sps:$4 sm:$0xff]   ;;  %v3148_v14 = vunpack.c.l.bf16 %v3144_v11  ;;  %v3149_v22 = vunpack.c.h.bf16 %v3144_v11 }
 0xd05   :  { %v3156_v51 = vpack.c.bf16 %v3037_v43, %v3037_v43  ;;  %4175 = vtanh.f32 %v3129_v45  ;;  %v3145_v21 = vld [vmem:[#allocation3 + $0x1a8] sm:$0xff] }
 0xd06   :  { %4177 = vtanh.f32 %v3123_v52  ;;  %v3150_v43 = vunpack.c.l.bf16 %v3145_v21 }
 0xd07   :  { %3190 = vmatmul.mubr.bf16.vlgmr.msra.gmra.mrb[104].mxu0 %v3156_v51  ;;  %3231 = vmatmul.mubr.bf16.vlgmr.msra.gmra.mrb[104].mxu1 %v3156_v51  ;;  %4179 = vtanh.f32 %v3134_v9 }
 0xd08   :  { %3263 = vmatpush1.bf16.msra.mxu0 %v5471_v60  ;;  %3304 = vmatpush1.bf16.msra.mxu1 %v5474_v61 }
 0xd09   :  { %3264 = vmatprep.subr.bf16.mxu0 %v5477_v2  ;;  %3305 = vmatprep.subr.bf16.mxu1 %v5480_v8 }
 0xd0a   :  { %3294 = vmatprep.mubr.bf16.mxu0 %v4445_v0  ;;  %3335 = vmatprep.mubr.bf16.mxu1 %v4445_v0 }
 0xd0c   :  { %3265 = vmatpush1.bf16.msra.mxu0 %v5485_v26  ;;  %3306 = vmatpush1.bf16.msra.mxu1 %v5488_v48 }
 0xd0d   :  { %3266 = vmatprep.subr.bf16.mxu0 %v5491_v56  ;;  %3307 = vmatprep.subr.bf16.mxu1 %v5494_v33 }
 0xd0e   :  { %v4174_v60 = vpop.eup %4173 }
 0xd0f   :  { %v4176_v1 = vpop.eup %4175  ;;  %v3127_v61 = vmul.f32 0.5, %v4174_v60 }
 0xd10   :  { %v3131_v17 = vmul.f32 0.5, %v4176_v1  ;;  %3267 = vmatpush1.bf16.msra.mxu0 %v5497_v42  ;;  %3308 = vmatpush1.bf16.msra.mxu1 %v5500_v20  ;;  %v4178_v8 = vpop.eup %4177 }
 0xd11   :  { %v3128_v2 = vadd.f32 0.5, %v3127_v61  ;;  %3268 = vmatprep.subr.bf16.mxu0 %v5503_v44  ;;  %3309 = vmatprep.subr.bf16.mxu1 %v5506_v31  ;;  %v4180_v42 = vpop.eup %4179 }
 0xd12   :  { %v3132_v26 = vadd.f32 0.5, %v3131_v17  ;;  %v3136_v20 = vmul.f32 0.5, %v4180_v42 }
 0xd13   :  { %v3139_v48 = vmul.f32 %v4178_v8, %v3128_v2  ;;  %v3151_v2 = vunpack.c.h.bf16 %v3145_v21  ;;  %v3146_v21 = vld [vmem:[#allocation3 + $0x1b0] sm:$0xff] }
 0xd14   :  { %v3138_v56 = vmul.f32 %v3132_v26, %v5706_v27  ;;  %3269 = vmatpush1.bf16.msra.mxu0 %v5510_v15  ;;  %3310 = vmatpush1.bf16.msra.mxu1 %v5513_v46  ;;  %v3137_v44 = vadd.f32 0.5, %v3136_v20  ;;  %v5807_v27 = vld [vmem:[#allocation6 + $0x24] ss:$16 sps:$4 sm:$0xff]  }
 0xd15   :  { %3270 = vmatprep.subr.bf16.mxu0 %v5516_v47  ;;  %3311 = vmatprep.subr.bf16.mxu1 %v5519_v16  ;;  %v5801_v47 = vld [vmem:[#allocation6] ss:$16 sps:$4 sm:$0xff]   ;;  %v5804_v16 = vld [vmem:[#allocation6 + $0x8] ss:$16 sps:$4 sm:$0xff]  }
 0xd16   :  { %v5782_v33 = vadd.f32 %v3139_v48, %v3138_v56 }
 0xd18   :  { %4181 = vtanh.f32 %v5782_v33  ;;  %3271 = vmatpush1.bf16.msra.mxu0 %v5601_v53  ;;  %3312 = vmatpush1.bf16.msra.mxu1 %v5604_v54 }
 0xd19   :  { %3272 = vmatprep.subr.bf16.mxu0 %v5607_v19  ;;  %3313 = vmatprep.subr.bf16.mxu1 %v5610_v55 }
 0xd1c   :  { %3273 = vmatpush1.bf16.msra.mxu0 %v5613_v57  ;;  %3314 = vmatpush1.bf16.msra.mxu1 %v5616_v58 }
 0xd1d   :  { %3274 = vmatprep.subr.bf16.mxu0 %v5619_v13  ;;  %3315 = vmatprep.subr.bf16.mxu1 %v5622_v36 }
 0xd20   :  { %3275 = vmatpush1.bf16.msra.mxu0 %v5625_v38  ;;  %3316 = vmatpush1.bf16.msra.mxu1 %v5628_v41 }
 0xd21   :  { %3276 = vmatprep.subr.bf16.mxu0 %v5631_v32  ;;  %3317 = vmatprep.subr.bf16.mxu1 %v5634_v49 }
 0xd22   :  { %v4182_v31 = vpop.eup %4181 }
 0xd23   :  { %v3142_v15 = vmul.f32 %v4182_v31, %v3137_v44 }
 0xd24   :  { %3277 = vmatpush1.bf16.msra.mxu0 %v5637_v59  ;;  %3318 = vmatpush1.bf16.msra.mxu1 %v5640_v29 }
 0xd25   :  { %v3261_v46 = vpack.c.bf16 %v3142_v15, %v3142_v15  ;;  %3380 = vmatprep.subr.bf16.mxu0 %v5643_v6  ;;  %3421 = vmatprep.subr.bf16.mxu1 %v5646_v10 }
 0xd27   :  { %3295 = vmatmul.mubr.bf16.vlgmr.msra.gmra.mrb[108].mxu0 %v3261_v46  ;;  %3336 = vmatmul.mubr.bf16.vlgmr.msra.gmra.mrb[108].mxu1 %v3261_v46 }
 0xd28   :  { %3381 = vmatpush1.bf16.msra.mxu0 %v5801_v47  ;;  %3422 = vmatpush1.bf16.msra.mxu1 %v5804_v16 }
 0xd29   :  { %3382 = vmatprep.subr.bf16.mxu0 %v5807_v27  ;;  %3423 = vmatprep.subr.bf16.mxu1 %v5810_v34 }
 0xd2a   :  { %3412 = vmatprep.mubr.bf16.mxu0 %v4445_v0  ;;  %3453 = vmatprep.mubr.bf16.mxu1 %v4445_v0 }
 0xd2c   :  { %3383 = vmatpush1.bf16.msra.mxu0 %v5815_v18  ;;  %3424 = vmatpush1.bf16.msra.mxu1 %v5818_v35 }
 0xd2d   :  { %3384 = vmatprep.subr.bf16.mxu0 %v5821_v4  ;;  %3425 = vmatprep.subr.bf16.mxu1 %v5824_v24 }
 0xd30   :  { %3385 = vmatpush1.bf16.msra.mxu0 %v5827_v62  ;;  %3426 = vmatpush1.bf16.msra.mxu1 %v5830_v37 }
 0xd31   :  { %3386 = vmatprep.subr.bf16.mxu0 %v5833_v40  ;;  %3427 = vmatprep.subr.bf16.mxu1 %v5836_v63 }
 0xd34   :  { %3387 = vmatpush1.bf16.msra.mxu0 %v5839_v30  ;;  %3428 = vmatpush1.bf16.msra.mxu1 %v5842_v3 }
 0xd35   :  { %3388 = vmatprep.subr.bf16.mxu0 %v5845_v50  ;;  %3429 = vmatprep.subr.bf16.mxu1 %v5848_v25 }
 0xd38   :  { %3389 = vmatpush1.bf16.msra.mxu0 %v5601_v53  ;;  %3430 = vmatpush1.bf16.msra.mxu1 %v5604_v54 }
 0xd39   :  { %3390 = vmatprep.subr.bf16.mxu0 %v5607_v19  ;;  %3431 = vmatprep.subr.bf16.mxu1 %v5610_v55 }
 0xd3c   :  { %3391 = vmatpush1.bf16.msra.mxu0 %v5613_v57  ;;  %3432 = vmatpush1.bf16.msra.mxu1 %v5616_v58 }
 0xd3d   :  { %3392 = vmatprep.subr.bf16.mxu0 %v5619_v13  ;;  %3433 = vmatprep.subr.bf16.mxu1 %v5622_v36 }
 0xd40   :  { %3393 = vmatpush1.bf16.msra.mxu0 %v5625_v38  ;;  %3434 = vmatpush1.bf16.msra.mxu1 %v5628_v41 }
 0xd41   :  { %3394 = vmatprep.subr.bf16.mxu0 %v5631_v32  ;;  %3435 = vmatprep.subr.bf16.mxu1 %v5634_v49 }
 0xd44   :  { %3395 = vmatpush1.bf16.msra.mxu0 %v5637_v59  ;;  %3436 = vmatpush1.bf16.msra.mxu1 %v5640_v29 }
 0xd45   :  { %3485 = vmatprep.subr.bf16.mxu0 %v5643_v6  ;;  %3526 = vmatprep.subr.bf16.mxu1 %v5646_v10 }
 0xdda   :  { %v3191_v12 = vpop.f32.mrb[104].mxu0  ;;  %v3232_v23 = vpop.f32.mrb[104].mxu1 }
 0xddb   :  { %v3239_v39 = vadd.f32 %v3191_v12, %v3148_v14  ;;  %v3193_v45 = vpop.f32.mrb[105].mxu0  ;;  %v3234_v52 = vpop.f32.mrb[105].mxu1  ;;  %v3241_v17 = vadd.f32 %v3232_v23, %v3150_v43  ;;  %v3152_v12 = vunpack.c.l.bf16 %v3146_v21  ;;  %v3153_v43 = vunpack.c.h.bf16 %v3146_v21 }
 0xddc   :  { %v3240_v5 = vadd.f32 %v3193_v45, %v3149_v22  ;;  %v3195_v51 = vpop.f32.mrb[106].mxu0  ;;  %v3236_v7 = vpop.f32.mrb[106].mxu1  ;;  %v3242_v8 = vadd.f32 %v3234_v52, %v3151_v2 }
 0xddd   :  { %v3243_v9 = vmul.f32 0.5, %v3239_v39  ;;  %v3196_v60 = vpop.f32.mrb[107].mxu0  ;;  %v3237_v1 = vpop.f32.mrb[107].mxu1  ;;  %v3147_v39 = vld [vmem:[#allocation3 + $0x1b8] sm:$0xff] }
 0xdde   :  { %v3247_v61 = vmul.f32 0.5, %v3240_v5  ;;  %v3252_v26 = vmul.f32 0.5, %v3242_v8  ;;  %v3154_v51 = vunpack.c.l.bf16 %v3147_v39 }
 0xddf   :  { %4183 = vtanh.f32 %v3243_v9 }
 0xde0   :  { %4185 = vtanh.f32 %v3247_v61 }
 0xde1   :  { %4187 = vtanh.f32 %v3241_v17 }
 0xde2   :  { %4189 = vtanh.f32 %v3252_v26 }
 0xde9   :  { %v4184_v48 = vpop.eup %4183 }
 0xdea   :  { %v4186_v56 = vpop.eup %4185  ;;  %v3245_v42 = vmul.f32 0.5, %v4184_v48 }
 0xdeb   :  { %v3249_v20 = vmul.f32 0.5, %v4186_v56  ;;  %v4188_v31 = vpop.eup %4187 }
 0xdec   :  { %v3246_v44 = vadd.f32 0.5, %v3245_v42  ;;  %v4190_v22 = vpop.eup %4189 }
 0xded   :  { %v3250_v15 = vadd.f32 0.5, %v3249_v20  ;;  %v3254_v23 = vmul.f32 0.5, %v4190_v22  ;;  %v3155_v20 = vunpack.c.h.bf16 %v3147_v39 }
 0xdee   :  { %v3257_v46 = vmul.f32 %v4188_v31, %v3246_v44 }
 0xdef   :  { %v3256_v11 = vmul.f32 %v3250_v15, %v5760_v28  ;;  %v3255_v60 = vadd.f32 0.5, %v3254_v23 }
 0xdf1   :  { %v5868_v14 = vadd.f32 %v3257_v46, %v3256_v11 }
 0xdf3   :  { %4191 = vtanh.f32 %v5868_v14 }
 0xdfa   :  { %v3296_v45 = vpop.f32.mrb[108].mxu0  ;;  %v3337_v52 = vpop.f32.mrb[108].mxu1 }
 0xdfb   :  { %v3344_v5 = vadd.f32 %v3296_v45, %v3152_v12  ;;  %v3298_v7 = vpop.f32.mrb[109].mxu0  ;;  %v3339_v9 = vpop.f32.mrb[109].mxu1  ;;  %v3346_v42 = vadd.f32 %v3337_v52, %v3154_v51 }
 0xdfc   :  { %v3345_v1 = vadd.f32 %v3298_v7, %v3153_v43  ;;  %v3300_v61 = vpop.f32.mrb[110].mxu0  ;;  %v3341_v28 = vpop.f32.mrb[110].mxu1  ;;  %v3347_v31 = vadd.f32 %v3339_v9, %v3155_v20 }
 0xdfd   :  { %v4192_v17 = vpop.eup %4191  ;;  %v3348_v2 = vmul.f32 0.5, %v3344_v5  ;;  %v3301_v8 = vpop.f32.mrb[111].mxu0 }
 0xdfe   :  { %v3342_v26 = vpop.f32.mrb[111].mxu1  ;;  %v3260_v48 = vmul.f32 %v4192_v17, %v3255_v60  ;;  %v3352_v56 = vmul.f32 0.5, %v3345_v1  ;;  %v3357_v15 = vmul.f32 0.5, %v3347_v31 }
 0xdff   :  { %4193 = vtanh.f32 %v3348_v2 }
 0xe00   :  { %v3379_v44 = vpack.c.bf16 %v3260_v48, %v3260_v48  ;;  %4195 = vtanh.f32 %v3352_v56 }
 0xe01   :  { %4197 = vtanh.f32 %v3346_v42 }
 0xe02   :  { %3413 = vmatmul.mubr.bf16.vlgmr.msra.gmra.mrb[112].mxu0 %v3379_v44  ;;  %3454 = vmatmul.mubr.bf16.vlgmr.msra.gmra.mrb[112].mxu1 %v3379_v44  ;;  %4199 = vtanh.f32 %v3357_v15 }
 0xe03   :  { %3486 = vmatpush1.bf16.msra.mxu0 %v5801_v47  ;;  %3527 = vmatpush1.bf16.msra.mxu1 %v5804_v16 }
 0xe04   :  { %3487 = vmatprep.subr.bf16.mxu0 %v5807_v27  ;;  %3528 = vmatprep.subr.bf16.mxu1 %v5810_v34 }
 0xe05   :  { %3517 = vmatprep.mubr.bf16.mxu0 %v4445_v0  ;;  %3558 = vmatprep.mubr.bf16.mxu1 %v4445_v0 }
 0xe07   :  { %3488 = vmatpush1.bf16.msra.mxu0 %v5815_v18  ;;  %3529 = vmatpush1.bf16.msra.mxu1 %v5818_v35 }
 0xe08   :  { %3489 = vmatprep.subr.bf16.mxu0 %v5821_v4  ;;  %3530 = vmatprep.subr.bf16.mxu1 %v5824_v24 }
 0xe09   :  { %v4194_v46 = vpop.eup %4193 }
 0xe0a   :  { %v4196_v11 = vpop.eup %4195  ;;  %v3350_v21 = vmul.f32 0.5, %v4194_v46 }
 0xe0b   :  { %v3354_v22 = vmul.f32 0.5, %v4196_v11  ;;  %3490 = vmatpush1.bf16.msra.mxu0 %v5827_v62  ;;  %3531 = vmatpush1.bf16.msra.mxu1 %v5830_v37  ;;  %v4198_v23 = vpop.eup %4197  ;;  %v3369_v11 = vld [vmem:[#allocation3 + $0x1d0] sm:$0xff] }
 0xe0c   :  { %v3351_v12 = vadd.f32 0.5, %v3350_v21  ;;  %3491 = vmatprep.subr.bf16.mxu0 %v5833_v40  ;;  %3532 = vmatprep.subr.bf16.mxu1 %v5836_v63 }
 0xe0d   :  { %v3355_v39 = vadd.f32 0.5, %v3354_v22  ;;  %v3375_v22 = vunpack.c.l.bf16 %v3369_v11 }
 0xe0e   :  { %v3362_v43 = vmul.f32 %v4198_v23, %v3351_v12  ;;  %v3370_v23 = vld [vmem:[#allocation3 + $0x1d8] sm:$0xff] }
 0xe0f   :  { %v3361_v45 = vmul.f32 %v3355_v39, %v5782_v33  ;;  %3492 = vmatpush1.bf16.msra.mxu0 %v5839_v30  ;;  %3533 = vmatpush1.bf16.msra.mxu1 %v5842_v3  ;;  %v4200_v33 = vpop.eup %4199  ;;  %v3376_v39 = vunpack.c.h.bf16 %v3369_v11 }
 0xe10   :  { %3493 = vmatprep.subr.bf16.mxu0 %v5845_v50  ;;  %3534 = vmatprep.subr.bf16.mxu1 %v5848_v25  ;;  %v3359_v5 = vmul.f32 0.5, %v4200_v33 }
 0xe11   :  { %v5890_v52 = vadd.f32 %v3362_v43, %v3361_v45 }
 0xe12   :  { %v3360_v51 = vadd.f32 0.5, %v3359_v5  ;;  %v3377_v5 = vunpack.c.l.bf16 %v3370_v23 }
 0xe13   :  { %4201 = vtanh.f32 %v5890_v52  ;;  %3494 = vmatpush1.bf16.msra.mxu0 %v5601_v53  ;;  %3535 = vmatpush1.bf16.msra.mxu1 %v5604_v54 }
 0xe14   :  { %3495 = vmatprep.subr.bf16.mxu0 %v5607_v19  ;;  %3536 = vmatprep.subr.bf16.mxu1 %v5610_v55 }
 0xe17   :  { %3496 = vmatpush1.bf16.msra.mxu0 %v5613_v57  ;;  %3537 = vmatpush1.bf16.msra.mxu1 %v5616_v58 }
 0xe18   :  { %3497 = vmatprep.subr.bf16.mxu0 %v5619_v13  ;;  %3538 = vmatprep.subr.bf16.mxu1 %v5622_v36 }
 0xe1b   :  { %3498 = vmatpush1.bf16.msra.mxu0 %v5625_v38  ;;  %3539 = vmatpush1.bf16.msra.mxu1 %v5628_v41 }
 0xe1c   :  { %3499 = vmatprep.subr.bf16.mxu0 %v5631_v32  ;;  %3540 = vmatprep.subr.bf16.mxu1 %v5634_v49 }
 0xe1d   :  { %v4202_v7 = vpop.eup %4201 }
 0xe1e   :  { %v3365_v9 = vmul.f32 %v4202_v7, %v3360_v51 }
 0xe1f   :  { %3500 = vmatpush1.bf16.msra.mxu0 %v5637_v59  ;;  %3541 = vmatpush1.bf16.msra.mxu1 %v5640_v29 }
 0xe20   :  { %v3484_v60 = vpack.c.bf16 %v3365_v9, %v3365_v9  ;;  %3603 = vmatprep.subr.bf16.mxu0 %v5643_v6  ;;  %3644 = vmatprep.subr.bf16.mxu1 %v5646_v10 }
 0xe22   :  { %3518 = vmatmul.mubr.bf16.vlgmr.msra.gmra.mrb[116].mxu0 %v3484_v60  ;;  %3559 = vmatmul.mubr.bf16.vlgmr.msra.gmra.mrb[116].mxu1 %v3484_v60 }
 0xe23   :  { %3604 = vmatpush1.bf16.msra.mxu0 %v5801_v47  ;;  %3645 = vmatpush1.bf16.msra.mxu1 %v5804_v16 }
 0xe24   :  { %3605 = vmatprep.subr.bf16.mxu0 %v5807_v27  ;;  %3646 = vmatprep.subr.bf16.mxu1 %v5810_v34 }
 0xe25   :  { %3635 = vmatprep.mubr.bf16.mxu0 %v4445_v0  ;;  %3676 = vmatprep.mubr.bf16.mxu1 %v4445_v0 }
 0xe27   :  { %3606 = vmatpush1.bf16.msra.mxu0 %v5815_v18  ;;  %3647 = vmatpush1.bf16.msra.mxu1 %v5818_v35 }
 0xe28   :  { %3607 = vmatprep.subr.bf16.mxu0 %v5821_v4  ;;  %3648 = vmatprep.subr.bf16.mxu1 %v5824_v24 }
 0xe2b   :  { %3608 = vmatpush1.bf16.msra.mxu0 %v5827_v62  ;;  %3649 = vmatpush1.bf16.msra.mxu1 %v5830_v37 }
 0xe2c   :  { %3609 = vmatprep.subr.bf16.mxu0 %v5833_v40  ;;  %3650 = vmatprep.subr.bf16.mxu1 %v5836_v63 }
 0xe2f   :  { %3610 = vmatpush1.bf16.msra.mxu0 %v5839_v30  ;;  %3651 = vmatpush1.bf16.msra.mxu1 %v5842_v3 }
 0xe30   :  { %3611 = vmatprep.subr.bf16.mxu0 %v5845_v50  ;;  %3652 = vmatprep.subr.bf16.mxu1 %v5848_v25 }
 0xe33   :  { %3612 = vmatpush1.bf16.msra.mxu0 %v5601_v53  ;;  %3653 = vmatpush1.bf16.msra.mxu1 %v5604_v54  ;;  %v3367_v53 = vld [vmem:[#allocation3 + $0x1c0] sm:$0xff] }
 0xe34   :  { %3613 = vmatprep.subr.bf16.mxu0 %v5607_v19  ;;  %3654 = vmatprep.subr.bf16.mxu1 %v5610_v55  ;;  %v3371_v54 = vunpack.c.l.bf16 %v3367_v53  ;;  %v3368_v19 = vld [vmem:[#allocation3 + $0x1c8] sm:$0xff]  ;;  %v3372_v55 = vunpack.c.h.bf16 %v3367_v53 }
 0xe37   :  { %3614 = vmatpush1.bf16.msra.mxu0 %v5613_v57  ;;  %3655 = vmatpush1.bf16.msra.mxu1 %v5616_v58 }
 0xe38   :  { %3615 = vmatprep.subr.bf16.mxu0 %v5619_v13  ;;  %3656 = vmatprep.subr.bf16.mxu1 %v5622_v36  ;;  %v3373_v36 = vunpack.c.l.bf16 %v3368_v19 }
 0xe3b   :  { %3616 = vmatpush1.bf16.msra.mxu0 %v5625_v38  ;;  %3657 = vmatpush1.bf16.msra.mxu1 %v5628_v41 }
 0xe3c   :  { %3617 = vmatprep.subr.bf16.mxu0 %v5631_v32  ;;  %3658 = vmatprep.subr.bf16.mxu1 %v5634_v49 }
 0xe3f   :  { %3618 = vmatpush1.bf16.msra.mxu0 %v5637_v59  ;;  %3659 = vmatpush1.bf16.msra.mxu1 %v5640_v29 }
 0xe40   :  { %3708 = vmatprep.subr.bf16.mxu0 %v5643_v6  ;;  %3749 = vmatprep.subr.bf16.mxu1 %v5646_v10  ;;  %v3374_v10 = vunpack.c.h.bf16 %v3368_v19 }
 0xed5   :  { %v3414_v57 = vpop.f32.mrb[112].mxu0  ;;  %v3455_v58 = vpop.f32.mrb[112].mxu1 }
 0xed6   :  { %v3462_v13 = vadd.f32 %v3414_v57, %v3371_v54  ;;  %v3416_v38 = vpop.f32.mrb[113].mxu0  ;;  %v3457_v41 = vpop.f32.mrb[113].mxu1  ;;  %v3464_v6 = vadd.f32 %v3455_v58, %v3373_v36 }
 0xed7   :  { %v3463_v32 = vadd.f32 %v3416_v38, %v3372_v55  ;;  %v3418_v49 = vpop.f32.mrb[114].mxu0  ;;  %v3459_v1 = vpop.f32.mrb[114].mxu1  ;;  %v3465_v17 = vadd.f32 %v3457_v41, %v3374_v10  ;;  %v3378_v38 = vunpack.c.h.bf16 %v3370_v23  ;;  %v4366_v10 = vld [vmem:[#allocation6 + $0xec] ss:$16 sps:$4 sm:$0xff]  }
 0xed8   :  { %v3466_v59 = vmul.f32 0.5, %v3462_v13  ;;  %v3419_v61 = vpop.f32.mrb[115].mxu0  ;;  %v3460_v29 = vpop.f32.mrb[115].mxu1 }
 0xed9   :  { %v3470_v28 = vmul.f32 0.5, %v3463_v32  ;;  %v3475_v2 = vmul.f32 0.5, %v3465_v17  ;;  %v4363_v61 = vld [vmem:[#allocation6 + $0xc0] ss:$16 sps:$4 sm:$0xff]   ;;  %v4364_v29 = vld [vmem:[#allocation6 + $0xc8] ss:$16 sps:$4 sm:$0xff]  }
 0xeda   :  { %4203 = vtanh.f32 %v3466_v59 }
 0xedb   :  { %4205 = vtanh.f32 %v3470_v28 }
 0xedc   :  { %4207 = vtanh.f32 %v3464_v6  ;;  %v4365_v6 = vld [vmem:[#allocation6 + $0xe4] ss:$16 sps:$4 sm:$0xff]  }
 0xedd   :  { %4209 = vtanh.f32 %v3475_v2 }
 0xee4   :  { %v4204_v8 = vpop.eup %4203 }
 0xee5   :  { %v4206_v26 = vpop.eup %4205  ;;  %v3468_v48 = vmul.f32 0.5, %v4204_v8  ;;  %v4367_v8 = vld [vmem:[#allocation6 + $0xe0] ss:$16 sps:$4 sm:$0xff]  }
 0xee6   :  { %v3472_v56 = vmul.f32 0.5, %v4206_v26  ;;  %v4208_v20 = vpop.eup %4207  ;;  %v4368_v26 = vld [vmem:[#allocation6 + $0xe8] ss:$16 sps:$4 sm:$0xff]  }
 0xee7   :  { %v3469_v42 = vadd.f32 0.5, %v3468_v48  ;;  %v4210_v21 = vpop.eup %4209 }
 0xee8   :  { %v3473_v44 = vadd.f32 0.5, %v3472_v56  ;;  %v3477_v12 = vmul.f32 0.5, %v4210_v21  ;;  %v3590_v56 = vld [vmem:[#allocation3 + $0x1e0] sm:$0xff] }
 0xee9   :  { %v3480_v31 = vmul.f32 %v4208_v20, %v3469_v42  ;;  %v3594_v42 = vunpack.c.l.bf16 %v3590_v56  ;;  %v3591_v20 = vld [vmem:[#allocation3 + $0x1e8] sm:$0xff] }
 0xeea   :  { %v3479_v15 = vmul.f32 %v3473_v44, %v5868_v14  ;;  %v3478_v9 = vadd.f32 0.5, %v3477_v12  ;;  %v3595_v44 = vunpack.c.h.bf16 %v3590_v56  ;;  %v3596_v21 = vunpack.c.l.bf16 %v3591_v20 }
 0xeec   :  { %v5944_v46 = vadd.f32 %v3480_v31, %v3479_v15 }
 0xeee   :  { %4211 = vtanh.f32 %v5944_v46 }
 0xef5   :  { %v3519_v43 = vpop.f32.mrb[116].mxu0  ;;  %v3560_v45 = vpop.f32.mrb[116].mxu1 }
 0xef6   :  { %v3567_v33 = vadd.f32 %v3519_v43, %v3375_v22  ;;  %v3521_v51 = vpop.f32.mrb[117].mxu0  ;;  %v3562_v7 = vpop.f32.mrb[117].mxu1  ;;  %v3569_v36 = vadd.f32 %v3560_v45, %v3377_v5 }
 0xef7   :  { %v3568_v60 = vadd.f32 %v3521_v51, %v3376_v39  ;;  %v3523_v53 = vpop.f32.mrb[118].mxu0  ;;  %v3564_v14 = vpop.f32.mrb[118].mxu1  ;;  %v3570_v32 = vadd.f32 %v3562_v7, %v3378_v38 }
 0xef8   :  { %v4212_v54 = vpop.eup %4211  ;;  %v3571_v19 = vmul.f32 0.5, %v3567_v33  ;;  %v3524_v55 = vpop.f32.mrb[119].mxu0 }
 0xef9   :  { %v3565_v57 = vpop.f32.mrb[119].mxu1  ;;  %v3483_v58 = vmul.f32 %v4212_v54, %v3478_v9  ;;  %v3575_v13 = vmul.f32 0.5, %v3568_v60  ;;  %v3580_v49 = vmul.f32 0.5, %v3570_v32  ;;  %v3597_v9 = vunpack.c.h.bf16 %v3591_v20  ;;  %v3592_v32 = vld [vmem:[#allocation3 + $0x1f0] sm:$0xff] }
 0xefa   :  { %4213 = vtanh.f32 %v3571_v19 }
 0xefb   :  { %v3602_v41 = vpack.c.bf16 %v3483_v58, %v3483_v58  ;;  %4215 = vtanh.f32 %v3575_v13 }
 0xefc   :  { %4217 = vtanh.f32 %v3569_v36 }
 0xefd   :  { %3636 = vmatmul.mubr.bf16.vlgmr.msra.gmra.mrb[120].mxu0 %v3602_v41  ;;  %3677 = vmatmul.mubr.bf16.vlgmr.msra.gmra.mrb[120].mxu1 %v3602_v41  ;;  %4219 = vtanh.f32 %v3580_v49 }
 0xefe   :  { %3709 = vmatpush1.bf16.msra.mxu0 %v5801_v47  ;;  %3750 = vmatpush1.bf16.msra.mxu1 %v5804_v16 }
 0xeff   :  { %3710 = vmatprep.subr.bf16.mxu0 %v5807_v27  ;;  %3751 = vmatprep.subr.bf16.mxu1 %v5810_v34 }
 0xf00   :  { %3740 = vmatprep.mubr.bf16.mxu0 %v4445_v0  ;;  %3781 = vmatprep.mubr.bf16.mxu1 %v4445_v0 }
 0xf02   :  { %3711 = vmatpush1.bf16.msra.mxu0 %v5815_v18  ;;  %3752 = vmatpush1.bf16.msra.mxu1 %v5818_v35 }
 0xf03   :  { %3712 = vmatprep.subr.bf16.mxu0 %v5821_v4  ;;  %3753 = vmatprep.subr.bf16.mxu1 %v5824_v24  ;;  %v4355_v24 = vld [vmem:[#allocation6 + $0x80] ss:$16 sps:$4 sm:$0xff]  }
 0xf04   :  { %v4214_v47 = vpop.eup %4213 }
 0xf05   :  { %v4216_v1 = vpop.eup %4215  ;;  %v3573_v16 = vmul.f32 0.5, %v4214_v47  ;;  %v3598_v47 = vunpack.c.l.bf16 %v3592_v32 }
 0xf06   :  { %v3577_v59 = vmul.f32 0.5, %v4216_v1  ;;  %3713 = vmatpush1.bf16.msra.mxu0 %v5827_v62  ;;  %3754 = vmatpush1.bf16.msra.mxu1 %v5830_v37  ;;  %v4218_v0 = vpop.eup %4217  ;;  %v4356_v62 = vld [vmem:[#allocation6 + $0x88] ss:$16 sps:$4 sm:$0xff]   ;;  %v4357_v37 = vld [vmem:[#allocation6 + $0xa4] ss:$16 sps:$4 sm:$0xff]  }
 0xf07   :  { %v3574_v27 = vadd.f32 0.5, %v3573_v16  ;;  %3714 = vmatprep.subr.bf16.mxu0 %v5833_v40  ;;  %3755 = vmatprep.subr.bf16.mxu1 %v5836_v63  ;;  %v4358_v40 = vld [vmem:[#allocation6 + $0xac] ss:$16 sps:$4 sm:$0xff]   ;;  %v4220_v63 = vpop.eup %4219 }
 0xf08   :  { %v3578_v34 = vadd.f32 0.5, %v3577_v59  ;;  %v3593_v16 = vld [vmem:[#allocation3 + $0x1f8] sm:$0xff]  ;;  %v3599_v59 = vunpack.c.h.bf16 %v3592_v32 }
 0xf09   :  { %v3585_v18 = vmul.f32 %v4218_v0, %v3574_v27 }
 0xf0a   :  { %v3584_v35 = vmul.f32 %v3578_v34, %v5890_v52  ;;  %3715 = vmatpush1.bf16.msra.mxu0 %v5839_v30  ;;  %3756 = vmatpush1.bf16.msra.mxu1 %v5842_v3  ;;  %v4359_v30 = vld [vmem:[#allocation6 + $0xa0] ss:$16 sps:$4 sm:$0xff]   ;;  %v4360_v3 = vld [vmem:[#allocation6 + $0xa8] ss:$16 sps:$4 sm:$0xff]   ;;  %v4361_v52 = vld [vmem:[#allocation6 + $0xc4] ss:$16 sps:$4 sm:$0xff]  }
 0xf0b   :  { %3716 = vmatprep.subr.bf16.mxu0 %v5845_v50  ;;  %3757 = vmatprep.subr.bf16.mxu1 %v5848_v25  ;;  %v3582_v50 = vmul.f32 0.5, %v4220_v63  ;;  %v4362_v25 = vld [vmem:[#allocation6 + $0xcc] ss:$16 sps:$4 sm:$0xff]  }
 0xf0c   :  { %v5966_v4 = vadd.f32 %v3585_v18, %v3584_v35  ;;  %v3600_v18 = vunpack.c.l.bf16 %v3593_v16 }
 0xf0d   :  { %v3583_v28 = vadd.f32 0.5, %v3582_v50 }
 0xf0e   :  { %4221 = vtanh.f32 %v5966_v4  ;;  %3717 = vmatpush1.bf16.msra.mxu0 %v4355_v24  ;;  %3758 = vmatpush1.bf16.msra.mxu1 %v4356_v62 }
 0xf0f   :  { %3718 = vmatprep.subr.bf16.mxu0 %v4357_v37  ;;  %3759 = vmatprep.subr.bf16.mxu1 %v4358_v40 }
 0xf12   :  { %3719 = vmatpush1.bf16.msra.mxu0 %v4359_v30  ;;  %3760 = vmatpush1.bf16.msra.mxu1 %v4360_v3 }
 0xf13   :  { %3720 = vmatprep.subr.bf16.mxu0 %v4361_v52  ;;  %3761 = vmatprep.subr.bf16.mxu1 %v4362_v25 }
 0xf16   :  { %3721 = vmatpush1.bf16.msra.mxu0 %v4363_v61  ;;  %3762 = vmatpush1.bf16.msra.mxu1 %v4364_v29  ;;  %v3601_v29 = vunpack.c.h.bf16 %v3593_v16 }
 0xf17   :  { %3722 = vmatprep.subr.bf16.mxu0 %v4365_v6  ;;  %3763 = vmatprep.subr.bf16.mxu1 %v4366_v10 }
 0xf18   :  { %v4222_v17 = vpop.eup %4221 }
 0xf19   :  { %v3588_v2 = vmul.f32 %v4222_v17, %v3583_v28 }
 0xf1a   :  { %3723 = vmatpush1.bf16.msra.mxu0 %v4367_v8  ;;  %3764 = vmatpush1.bf16.msra.mxu1 %v4368_v26 }
 0xf1b   :  { %v3707_v48 = vpack.c.bf16 %v3588_v2, %v3588_v2 }
 0xf1d   :  { %3741 = vmatmul.mubr.bf16.vlgmr.msra.gmra.mrb[124].mxu0 %v3707_v48  ;;  %3782 = vmatmul.mubr.bf16.vlgmr.msra.gmra.mrb[124].mxu1 %v3707_v48 }
 0xfd0   :  { %v3637_v31 = vpop.f32.mrb[120].mxu0  ;;  %v3678_v15 = vpop.f32.mrb[120].mxu1 }
 0xfd1   :  { %v3685_v11 = vadd.f32 %v3637_v31, %v3594_v42  ;;  %v3639_v22 = vpop.f32.mrb[121].mxu0  ;;  %v3680_v12 = vpop.f32.mrb[121].mxu1  ;;  %v3687_v7 = vadd.f32 %v3678_v15, %v3596_v21 }
 0xfd2   :  { %v3686_v23 = vadd.f32 %v3639_v22, %v3595_v44  ;;  %v3641_v39 = vpop.f32.mrb[122].mxu0  ;;  %v3682_v43 = vpop.f32.mrb[122].mxu1  ;;  %v3688_v60 = vadd.f32 %v3680_v12, %v3597_v9 }
 0xfd3   :  { %v3689_v45 = vmul.f32 0.5, %v3685_v11  ;;  %v3642_v33 = vpop.f32.mrb[123].mxu0  ;;  %v3683_v5 = vpop.f32.mrb[123].mxu1 }
 0xfd4   :  { %v3693_v51 = vmul.f32 0.5, %v3686_v23  ;;  %v3698_v53 = vmul.f32 0.5, %v3688_v60 }
 0xfd5   :  { %4223 = vtanh.f32 %v3689_v45 }
 0xfd6   :  { %4225 = vtanh.f32 %v3693_v51 }
 0xfd7   :  { %4227 = vtanh.f32 %v3687_v7 }
 0xfd8   :  { %4229 = vtanh.f32 %v3698_v53 }
 0xfdf   :  { %v4224_v14 = vpop.eup %4223 }
 0xfe0   :  { %v4226_v54 = vpop.eup %4225  ;;  %v3691_v19 = vmul.f32 0.5, %v4224_v14 }
 0xfe1   :  { %v3695_v55 = vmul.f32 0.5, %v4226_v54  ;;  %v4228_v58 = vpop.eup %4227 }
 0xfe2   :  { %v3692_v57 = vadd.f32 0.5, %v3691_v19  ;;  %v4230_v49 = vpop.eup %4229 }
 0xfe3   :  { %v3696_v13 = vadd.f32 0.5, %v3695_v55  ;;  %v3700_v1 = vmul.f32 0.5, %v4230_v49 }
 0xfe4   :  { %v3703_v36 = vmul.f32 %v4228_v58, %v3692_v57 }
 0xfe5   :  { %v3702_v38 = vmul.f32 %v3696_v13, %v5944_v46  ;;  %v3701_v62 = vadd.f32 0.5, %v3700_v1 }
 0xfe7   :  { %v3704_v41 = vadd.f32 %v3703_v36, %v3702_v38 }
 0xfe9   :  { %4231 = vtanh.f32 %v3704_v41 }
 0xff0   :  { %v3742_v27 = vpop.f32.mrb[124].mxu0  ;;  %v3783_v0 = vpop.f32.mrb[124].mxu1 }
 0xff1   :  { %v3790_v34 = vadd.f32 %v3742_v27, %v3598_v47  ;;  %v3744_v35 = vpop.f32.mrb[125].mxu0  ;;  %v3785_v24 = vpop.f32.mrb[125].mxu1  ;;  %v3792_v61 = vadd.f32 %v3783_v0, %v3600_v18 }
 0xff2   :  { %v3791_v37 = vadd.f32 %v3744_v35, %v3599_v59  ;;  %v3746_v40 = vpop.f32.mrb[126].mxu0  ;;  %v3787_v63 = vpop.f32.mrb[126].mxu1  ;;  %v3793_v28 = vadd.f32 %v3785_v24, %v3601_v29 }
 0xff3   :  { %v4232_v30 = vpop.eup %4231  ;;  %v3794_v46 = vmul.f32 0.5, %v3790_v34  ;;  %v3747_v3 = vpop.f32.mrb[127].mxu0 }
 0xff4   :  { %v3788_v50 = vpop.f32.mrb[127].mxu1  ;;  %v3706_v52 = vmul.f32 %v4232_v30, %v3701_v62  ;;  %v3798_v25 = vmul.f32 0.5, %v3791_v37  ;;  %v3803_v6 = vmul.f32 0.5, %v3793_v28 }
 0xff5   :  { %4233 = vtanh.f32 %v3794_v46 }
 0xff6   :  { %3812 = vst [vmem:[#allocation8] sm:$0xff] %v3706_v52  ;;  %4235 = vtanh.f32 %v3798_v25 }
 0xff7   :  { %4237 = vtanh.f32 %v3792_v61 }
 0xff8   :  { %4239 = vtanh.f32 %v3803_v6 }
 0xfff   :  { %v4234_v10 = vpop.eup %4233 }
0x1000   :  { %v4236_v17 = vpop.eup %4235  ;;  %v3796_v2 = vmul.f32 0.5, %v4234_v10 }
0x1001   :  { %v3800_v8 = vmul.f32 0.5, %v4236_v17  ;;  %v4238_v48 = vpop.eup %4237 }
0x1002   :  { %v3797_v26 = vadd.f32 0.5, %v3796_v2  ;;  %v4240_v31 = vpop.eup %4239 }
0x1003   :  { %v3801_v56 = vadd.f32 0.5, %v3800_v8  ;;  %v3805_v15 = vmul.f32 0.5, %v4240_v31 }
0x1004   :  { %v3808_v42 = vmul.f32 %v4238_v48, %v3797_v26 }
0x1005   :  { %v3807_v20 = vmul.f32 %v3801_v56, %v5966_v4  ;;  %v3806_v11 = vadd.f32 0.5, %v3805_v15 }
0x1007   :  { %v3809_v44 = vadd.f32 %v3808_v42, %v3807_v20 }
0x1009   :  { %4241 = vtanh.f32 %v3809_v44 }
0x1013   :  { %v4242_v21 = vpop.eup %4241 }
0x1014   :  { %v3811_v22 = vmul.f32 %v4242_v21, %v3806_v11 }
0x1016   :  { %3813 = vst [vmem:[#allocation8 + $0x8] sm:$0xff] %v3811_v22 }
0x1017   :  { %4424 = shalt.err (!%p4421_p6)
}
0x1018   :  { %s4425_s10 = scalar_lea.hbm %s5985_s2, 256 }
0x1019   :  { %p4426_p7 = scmp.ne.s32.totalorder %s5985_s2, %s4425_s10  ;;  %p4429_p8 = scmp.lt.u32.totalorder %s4425_s10, %s5985_s2 }
0x101b   :  { %p4431_p9 = pnand %p4429_p8, %p4426_p7 }
0x101d   :  { %4434 = shalt.err (!%p4431_p9)
}
0x101e   :  { %s4448_s15 = smov 128   ;;  %s4449_s16 = smov 8  }
0x101f   :  { %3827 = dma.vmem_to_hbm [thread:$0]  %s3822_s6, 256, %s5985_s2, [#allocation5], %s4448_s15, %s4448_s15, %s4449_s16  }
0x1020   :  { %4439 = dma.done.wait [#allocation5], 256  }
0x1021   :  { %4440 = vsyncadd [#allocation5], 4294967040 }
0x1022   :  { %3831 = vsyncpa [#allocation4], 1 }
0x1023   :  { %3832 = vsyncpa [#allocation7], 1 }
0x1024   :  { %3833 = vsyncpa [#allocation5], 1 }

</bundles_post_ra>
